<compile_context>
chip_gen: v5e
topology: v5e:2x2
jax: 0.10.0
libtpu: 0.0.40
codegen_flags: <defaults>
</compile_context>

<pallas_src>
import math

import jax
import jax.numpy as jnp
from jax.experimental import pallas as pl
from jax.experimental.pallas import tpu as pltpu

# ---------------- model config (small, consistent with the module) ----------------
VOCAB = 64
SEQ_LEN = 8
HIDDEN = 32
PROJ = 64
N_HEADS = 2
HEAD_DIM = 16            # N_HEADS * HEAD_DIM == HIDDEN
ENC_LAYERS = 2
DEC_LAYERS = 2
PAD_IDX = 0
LN_EPS = 1e-5
VOCAB_PAD = 128          # lane-dense padded logits width (>= 128, multiple of 128)


# ---------------- BlockSpec helpers ----------------
def _fullspec(shape):
    nd = len(shape)
    return pl.BlockSpec(tuple(shape), lambda l, _nd=nd: (0,) * _nd)


def _stackspec(shape):
    nd = len(shape)
    return pl.BlockSpec((1,) + tuple(shape[1:]),
                        lambda l, _nd=nd: (l,) + (0,) * (_nd - 1))


# ---------------- in-kernel compute helpers (operate on VMEM-resident values) ----------------
def _add_ln(x, resid, g, b):
    """Post-LN: LayerNorm(x + resid) with affine. x,resid: (M,H) f32; g,b: (1,H)."""
    y = x + resid
    mu = jnp.mean(y, axis=-1, keepdims=True)
    var = jnp.mean(jnp.square(y - mu), axis=-1, keepdims=True)
    return (y - mu) * jax.lax.rsqrt(var + LN_EPS) * g + b


def _mha_compute(x_q, x_kv, mask, wqkv, bqkv, wo, bo, g, b):
    """Post-LN multi-head attention, all heads/batches in one shot.
    x_q: (B,Lq,H) f32; x_kv: (B,Lk,H) f32; mask: (B,Lq,Lk) f32 (>0 == masked).
    wqkv: (H,3H) bf16; bqkv: (1,3H) f32; wo: (H,H) bf16; bo,g,b: (1,H) f32.
    Returns (out (B,Lq,H) f32, new_mem (B,Lk,2H) f32, [per-head probs (B,Lq,Lk)])."""
    B, Lq, H = x_q.shape
    Lk = x_kv.shape[1]
    xq2 = x_q.reshape(B * Lq, H).astype(jnp.bfloat16)
    xk2 = x_kv.reshape(B * Lk, H).astype(jnp.bfloat16)

    # fused QKV weights: q from the query stream, (k,v) in one matmul from the key stream
    q = jnp.dot(xq2, wqkv[:, :H], preferred_element_type=jnp.float32) + bqkv[:, :H]
    kv = jnp.dot(xk2, wqkv[:, H:], preferred_element_type=jnp.float32) + bqkv[:, H:]
    k, v = kv[:, :H], kv[:, H:]
    new_mem = jnp.concatenate([k, v], axis=-1).reshape(B, Lk, 2 * H)

    q3 = q.reshape(B, Lq, H)
    k3 = k.reshape(B, Lk, H)
    v3 = v.reshape(B, Lk, H)
    scale = 1.0 / math.sqrt(HEAD_DIM)

    ctx_heads, probs = [], []
    for h in range(N_HEADS):
        cs = slice(h * HEAD_DIM, (h + 1) * HEAD_DIM)
        qh = q3[:, :, cs].astype(jnp.bfloat16)
        kh = k3[:, :, cs].astype(jnp.bfloat16)
        vh = v3[:, :, cs].astype(jnp.bfloat16)
        s = jnp.einsum('bqd,bkd->bqk', qh, kh,
                       preferred_element_type=jnp.float32) * scale
        s = jnp.where(mask > 0.0, -1e30, s)
        m = jnp.max(s, axis=-1, keepdims=True)
        e = jnp.exp(s - m)
        z = jnp.sum(e, axis=-1, keepdims=True)
        p = e * pl.reciprocal(z, approx=True)
        probs.append(p)
        ctx_heads.append(jnp.einsum('bqk,bkd->bqd', p.astype(jnp.bfloat16), vh,
                                    preferred_element_type=jnp.float32))

    ctx = jnp.concatenate(ctx_heads, axis=-1).reshape(B * Lq, H)
    o = jnp.dot(ctx.astype(jnp.bfloat16), wo, preferred_element_type=jnp.float32) + bo
    out = _add_ln(o, x_q.reshape(B * Lq, H), g, b)
    return out.reshape(B, Lq, H), new_mem, probs


def _ff_compute(x, w1, b1, w2, b2, g, b):
    """ResidualFF (post-LN): LayerNorm(x + W2 relu(W1 x))."""
    B, L, H = x.shape
    x2 = x.reshape(B * L, H)
    h = jnp.maximum(jnp.dot(x2.astype(jnp.bfloat16), w1,
                            preferred_element_type=jnp.float32) + b1, 0.0)
    y = jnp.dot(h.astype(jnp.bfloat16), w2, preferred_element_type=jnp.float32) + b2
    return _add_ln(y, x2, g, b).reshape(B, L, H)


# ---------------- fused encoder kernel (all layers, grid over layers) ----------------
def _encoder_kernel(x0_ref, mask_ref,
                    wqkv_ref, bqkv_ref, wo_ref, bo_ref, g_ref, b_ref,
                    fw1_ref, fb1_ref, fw2_ref, fb2_ref, fg_ref, fb_ref,
                    pw1_ref, pb1_ref, pw2_ref, pb2_ref,
                    out_ref, att_ref, temb_ref,
                    acc_ref):
    l = pl.program_id(0)

    @pl.when(l == 0)
    def _():
        acc_ref[...] = x0_ref[...]

    x = acc_ref[...]                                     # (B, SL, H)
    out, _, probs = _mha_compute(
        x, x, mask_ref[...],
        wqkv_ref[0, 0], bqkv_ref[0, 0], wo_ref[0, 0], bo_ref[0, 0],
        g_ref[0, 0], b_ref[0, 0])
    for h in range(N_HEADS):
        att_ref[0, h] = probs[h]
    out = _ff_compute(out, fw1_ref[0], fb1_ref[0], fw2_ref[0], fb2_ref[0],
                      fg_ref[0], fb_ref[0])
    acc_ref[...] = out
    out_ref[...] = out

    # epilogue: tgt_emb_prediction(enc_out[:, 0]) -- Linear -> ReLU -> Linear -> LN(no affine)
    @pl.when(l == pl.num_programs(0) - 1)
    def _():
        first = out[:, 0, :]                             # (B, H)
        h1 = jnp.maximum(
            jnp.dot(first.astype(jnp.bfloat16), pw1_ref[...],
                    preferred_element_type=jnp.float32) + pb1_ref[...], 0.0)
        h2 = jnp.dot(h1.astype(jnp.bfloat16), pw2_ref[...],
                     preferred_element_type=jnp.float32) + pb2_ref[...]
        mu = jnp.mean(h2, axis=-1, keepdims=True)
        var = jnp.mean(jnp.square(h2 - mu), axis=-1, keepdims=True)
        temb_ref[...] = (h2 - mu) * jax.lax.rsqrt(var + LN_EPS)


def encoder_call(params, x0, mask):
    B, SL, _ = x0.shape
    L = ENC_LAYERS
    a = params["enc"]["att"]
    f = params["enc"]["ff"]
    p = params["pred"]
    args = (x0, mask,
            a["wqkv"], a["bqkv"], a["wo"], a["bo"], a["g"], a["b"],
            f["w1"], f["b1"], f["w2"], f["b2"], f["g"], f["b"],
            p["w1"], p["b1"], p["w2"], p["b2"])
    in_specs = ([_fullspec(x0.shape), _fullspec(mask.shape)]
                + [_stackspec(x.shape) for x in args[2:14]]
                + [_fullspec(x.shape) for x in args[14:]])
    out_shape = (jax.ShapeDtypeStruct((B, SL, HIDDEN), jnp.float32),
                 jax.ShapeDtypeStruct((L, N_HEADS, B, SL, SL), jnp.float32),
                 jax.ShapeDtypeStruct((B, HIDDEN), jnp.float32))
    out_specs = (_fullspec((B, SL, HIDDEN)),
                 _stackspec((L, N_HEADS, B, SL, SL)),
                 _fullspec((B, HIDDEN)))
    return pl.pallas_call(
        _encoder_kernel,
        grid=(L,),
        in_specs=in_specs,
        out_specs=out_specs,
        out_shape=out_shape,
        scratch_shapes=[pltpu.VMEM((B, SL, HIDDEN), jnp.float32)],
        compiler_params=pltpu.CompilerParams(dimension_semantics=("arbitrary",)),
    )(*args)


# ---------------- fused decoder kernel (all layers + final logits, grid over layers) -------
def _decoder_kernel(x0_ref, enc_ref, temb_ref, tmask_ref, smask_ref,
                    awqkv_ref, abqkv_ref, awo_ref, abo_ref, ag_ref, ab_ref,
                    fw1_ref, fb1_ref, fw2_ref, fb2_ref, fg_ref, fb_ref,
                    finw_ref,
                    logits_ref, mem_ref, satt_ref, iatt_ref,
                    acc_ref):
    l = pl.program_id(0)

    @pl.when(l == 0)
    def _():
        acc_ref[...] = x0_ref[...]

    x = acc_ref[...]                                     # (B, TL, H)  decoder states
    src = enc_ref[...]                                   # (B, SL, H)  encoder output
    temb = temb_ref[...]                                 # (B, TL, H)  repeated sentence emb

    def att_args(m):
        return (awqkv_ref[0, m], abqkv_ref[0, m], awo_ref[0, m], abo_ref[0, m],
                ag_ref[0, m], ab_ref[0, m])

    # 1) masked self-attention over decoder states
    out_s, mem_self, sprobs = _mha_compute(x, x, tmask_ref[...], *att_args(0))
    # 2) sentence-aware attention: query = sentence embedding, keys/values = decoder states
    out_e, mem_sent, _ = _mha_compute(temb, x, tmask_ref[...], *att_args(1))
    # 3) cross-attention: query = (self-att out - sentence-att out), keys/values = encoder out
    out_c, _, iprobs = _mha_compute(out_s - out_e, src, smask_ref[...], *att_args(2))
    # 4) position-wise feedforward
    out = _ff_compute(out_c, fw1_ref[0], fb1_ref[0], fw2_ref[0], fb2_ref[0],
                      fg_ref[0], fb_ref[0])

    acc_ref[...] = out
    mem_ref[0] = jnp.concatenate([mem_self, mem_sent], axis=-1)   # (B, TL, 4H) lane-dense
    for h in range(N_HEADS):
        satt_ref[0, h] = sprobs[h]
        iatt_ref[0, h] = iprobs[h]

    # epilogue: final vocab projection (bias-free), padded to 128 lanes
    @pl.when(l == pl.num_programs(0) - 1)
    def _():
        bb, tl, hh = out.shape
        lg = jnp.dot(out.reshape(bb * tl, hh).astype(jnp.bfloat16), finw_ref[...],
                     preferred_element_type=jnp.float32)
        logits_ref[...] = lg.reshape(bb, tl, VOCAB_PAD)


def decoder_call(params, x0, enc_out, temb, tmask, smask):
    B, TL, _ = x0.shape
    SL = enc_out.shape[1]
    L = DEC_LAYERS
    a = params["dec"]["att"]
    f = params["dec"]["ff"]
    args = (x0, enc_out, temb, tmask, smask,
            a["wqkv"], a["bqkv"], a["wo"], a["bo"], a["g"], a["b"],
            f["w1"], f["b1"], f["w2"], f["b2"], f["g"], f["b"],
            params["final_w"])
    in_specs = ([_fullspec(x.shape) for x in args[:5]]
                + [_stackspec(x.shape) for x in args[5:17]]
                + [_fullspec(args[17].shape)])
    out_shape = (jax.ShapeDtypeStruct((B, TL, VOCAB_PAD), jnp.float32),
                 jax.ShapeDtypeStruct((L, B, TL, 4 * HIDDEN), jnp.float32),
                 jax.ShapeDtypeStruct((L, N_HEADS, B, TL, TL), jnp.float32),
                 jax.ShapeDtypeStruct((L, N_HEADS, B, TL, SL), jnp.float32))
    out_specs = (_fullspec((B, TL, VOCAB_PAD)),
                 _stackspec((L, B, TL, 4 * HIDDEN)),
                 _stackspec((L, N_HEADS, B, TL, TL)),
                 _stackspec((L, N_HEADS, B, TL, SL)))
    return pl.pallas_call(
        _decoder_kernel,
        grid=(L,),
        in_specs=in_specs,
        out_specs=out_specs,
        out_shape=out_shape,
        scratch_shapes=[pltpu.VMEM((B, TL, HIDDEN), jnp.float32)],
        compiler_params=pltpu.CompilerParams(dimension_semantics=("arbitrary",)),
    )(*args)


# ---------------- parameter init (deterministic, synthetic) ----------------
def _emb_params(key):
    kw, kp = jax.random.split(key)
    word = jax.random.normal(kw, (VOCAB, HIDDEN), jnp.float32) * 0.02
    word = word.at[PAD_IDX].set(0.0)
    pos = jax.random.normal(kp, (SEQ_LEN, HIDDEN), jnp.float32) * 0.02
    return {"word": word, "pos": pos}


def _att_stack(key, n_layers, n_modules):
    ks = jax.random.split(key, n_layers * n_modules * 2)
    wqkv, bqkv, wo, bo = [], [], [], []
    idx = 0
    for _ in range(n_layers):
        wq_l, bq_l, wo_l, bo_l = [], [], [], []
        for _ in range(n_modules):
            k1, k2 = ks[idx], ks[idx + 1]
            idx += 2
            wq_l.append(jax.random.normal(k1, (HIDDEN, 3 * HIDDEN), jnp.float32) * 0.02)
            bq_l.append(jnp.zeros((1, 3 * HIDDEN), jnp.float32))
            wo_l.append(jax.random.normal(k2, (HIDDEN, HIDDEN), jnp.float32) * 0.02)
            bo_l.append(jnp.zeros((1, HIDDEN), jnp.float32))
        wqkv.append(jnp.stack(wq_l))
        bqkv.append(jnp.stack(bq_l))
        wo.append(jnp.stack(wo_l))
        bo.append(jnp.stack(bo_l))
    return {
        "wqkv": jnp.stack(wqkv).astype(jnp.bfloat16),    # (L, M, H, 3H)
        "bqkv": jnp.stack(bqkv),                         # (L, M, 1, 3H)
        "wo": jnp.stack(wo).astype(jnp.bfloat16),        # (L, M, H, H)
        "bo": jnp.stack(bo),                             # (L, M, 1, H)
        "g": jnp.ones((n_layers, n_modules, 1, HIDDEN), jnp.float32),
        "b": jnp.zeros((n_layers, n_modules, 1, HIDDEN), jnp.float32),
    }


def _ff_stack(key, n_layers):
    ks = jax.random.split(key, n_layers * 2)
    w1 = [jax.random.normal(ks[2 * i], (HIDDEN, PROJ), jnp.float32) * 0.02
          for i in range(n_layers)]
    w2 = [jax.random.normal(ks[2 * i + 1], (PROJ, HIDDEN), jnp.float32) * 0.02
          for i in range(n_layers)]
    return {
        "w1": jnp.stack(w1).astype(jnp.bfloat16),        # (L, H, P)
        "b1": jnp.zeros((n_layers, 1, PROJ), jnp.float32),
        "w2": jnp.stack(w2).astype(jnp.bfloat16),        # (L, P, H)
        "b2": jnp.zeros((n_layers, 1, HIDDEN), jnp.float32),
        "g": jnp.ones((n_layers, 1, HIDDEN), jnp.float32),
        "b": jnp.zeros((n_layers, 1, HIDDEN), jnp.float32),
    }


def init_params(key):
    ks = jax.random.split(key, 10)
    enc = {"att": _att_stack(ks[0], ENC_LAYERS, 1), "ff": _ff_stack(ks[1], ENC_LAYERS)}
    # decoder attention modules per layer: [self_att, sentence_att, multihead(cross)_att]
    dec = {"att": _att_stack(ks[2], DEC_LAYERS, 3), "ff": _ff_stack(ks[3], DEC_LAYERS)}
    pred = {
        "w1": (jax.random.normal(ks[4], (HIDDEN, 4 * HIDDEN), jnp.float32) * 0.02
               ).astype(jnp.bfloat16),
        "b1": jnp.zeros((1, 4 * HIDDEN), jnp.float32),
        "w2": (jax.random.normal(ks[5], (4 * HIDDEN, HIDDEN), jnp.float32) * 0.02
               ).astype(jnp.bfloat16),
        "b2": jnp.zeros((1, HIDDEN), jnp.float32),
    }
    fw = jax.random.normal(ks[6], (HIDDEN, VOCAB), jnp.float32) * 0.02
    final_w = jnp.zeros((HIDDEN, VOCAB_PAD), jnp.float32).at[:, :VOCAB].set(fw)
    tgt_conv = {
        "emb": _emb_params(ks[7])["word"],
        "w": jax.random.normal(ks[8], (3 * HIDDEN, HIDDEN), jnp.float32) * 0.02,
        "b": jnp.zeros((1, HIDDEN), jnp.float32),
    }
    return {
        "enc_emb": _emb_params(jax.random.fold_in(ks[9], 0)),
        "dec_emb": _emb_params(jax.random.fold_in(ks[9], 1)),   # shared_embedding=False
        "enc": enc,
        "dec": dec,
        "pred": pred,
        "final_w": final_w.astype(jnp.bfloat16),
        "tgt_conv": tgt_conv,
    }


# ---------------- JAX glue (inside jit): embeddings, masks, TextConv ----------------
def embed(emb, tokens):
    L = tokens.shape[1]
    return jnp.take(emb["word"], tokens, axis=0) * math.sqrt(HIDDEN) + emb["pos"][None, :L, :]


def _pad_mask(lens, max_len):
    return (jnp.arange(max_len)[None, :] >= lens[:, None]).astype(jnp.float32)


def encoder_get_mask(src_len, qs):
    m = _pad_mask(src_len, qs)                           # (B, qs); encoder is bidirectional
    return jnp.broadcast_to(m[:, None, :], (m.shape[0], qs, qs))


def decoder_get_mask(tgt_len, qs):
    m = _pad_mask(tgt_len, qs)
    causal = jnp.triu(jnp.ones((qs, qs), jnp.float32), 1)
    return m[:, None, :] + causal[None]                  # >0 means masked


def tgt_to_src_mask(src_len, sl, tl):
    m = _pad_mask(src_len, sl)
    return jnp.broadcast_to(m[:, None, :], (m.shape[0], tl, sl))


def encode_tgt(params, tgt):
    # TODO(synk): TextConv is not defined in the provided source; approximated by a
    # kernel-size-3 text CNN (embed -> conv -> ReLU -> max-over-time) in plain JAX.
    c = params["tgt_conv"]
    emb = jnp.take(c["emb"], tgt, axis=0)                # (B, L, H)
    pad = jnp.pad(emb, ((0, 0), (1, 1), (0, 0)))
    win = jnp.concatenate([pad[:, :-2], pad[:, 1:-1], pad[:, 2:]], axis=-1)   # (B, L, 3H)
    h = jnp.maximum(jnp.einsum("blk,kd->bld", win, c["w"]) + c["b"], 0.0)
    return jnp.max(h, axis=1)                            # (B, H)


# ---------------- SentenceAwareModel.forward (eval mode) ----------------
def sentence_aware_forward(params, src, tgt, src_len, tgt_len):
    B, SL = src.shape
    TL = tgt.shape[1]

    src_mask = encoder_get_mask(src_len, SL)
    tgt_mask = decoder_get_mask(tgt_len, TL)
    t2s_mask = tgt_to_src_mask(src_len, SL, TL)

    # encode_src: encoder stack + tgt_emb_prediction(enc_out[:, 0]) in ONE pallas_call
    enc_x0 = embed(params["enc_emb"], src)
    enc_out, enc_att, tgt_emb_hat = encoder_call(params, enc_x0, src_mask)

    # encode_tgt (computed & returned; in eval mode the decoder consumes tgt_emb_hat)
    tgt_emb_out = encode_tgt(params, tgt)

    tgt_emb = jax.lax.stop_gradient(tgt_emb_hat)         # .detach()
    tgt_emb_ext = jnp.broadcast_to(tgt_emb[:, None, :], (B, TL, HIDDEN))

    # decoder stack + final logits projection in ONE pallas_call
    dec_x0 = embed(params["dec_emb"], tgt)
    logits_pad, mem, satt, iatt = decoder_call(
        params, dec_x0, enc_out, tgt_emb_ext, tgt_mask, t2s_mask)

    logits = logits_pad[..., :VOCAB]
    enc_self_att = [jnp.transpose(enc_att[i], (1, 0, 2, 3)) for i in range(ENC_LAYERS)]
    dec_self_att = [jnp.transpose(satt[i], (1, 0, 2, 3)) for i in range(DEC_LAYERS)]
    inter_att = [jnp.transpose(iatt[i], (1, 0, 2, 3)) for i in range(DEC_LAYERS)]
    tgt_mem = [mem[i] for i in range(DEC_LAYERS)]        # each (B, TL, 4*HIDDEN)

    return {"logits": logits, "tgt_mem": tgt_mem, "tgt_emb": tgt_emb_out,
            "tgt_emb_hat": tgt_emb_hat, "dec_self_att": dec_self_att,
            "inter_att": inter_att, "enc_out": enc_out, "enc_self_att": enc_self_att}


# ---------------- main ----------------
if __name__ == "__main__":
    key = jax.random.PRNGKey(0)
    params = init_params(jax.random.fold_in(key, 1))

    bs = 2
    ksrc, ktgt = jax.random.split(jax.random.fold_in(key, 2))
    src = jax.random.randint(ksrc, (bs, SEQ_LEN), 1, VOCAB, dtype=jnp.int32)
    tgt = jax.random.randint(ktgt, (bs, SEQ_LEN), 1, VOCAB, dtype=jnp.int32)
    src_len = jnp.array([SEQ_LEN, SEQ_LEN - 2], jnp.int32)
    tgt_len = jnp.array([SEQ_LEN, SEQ_LEN - 1], jnp.int32)

    forward = jax.jit(sentence_aware_forward)
    out = forward(params, src, tgt, src_len, tgt_len)
    out = jax.block_until_ready(out)

    assert out["logits"].shape == (bs, SEQ_LEN, VOCAB)
    assert len(out["tgt_mem"]) == DEC_LAYERS
    assert all(m.shape == (bs, SEQ_LEN, 4 * HIDDEN) for m in out["tgt_mem"])
    assert out["dec_self_att"][0].shape == (bs, N_HEADS, SEQ_LEN, SEQ_LEN)
    assert out["inter_att"][0].shape == (bs, N_HEADS, SEQ_LEN, SEQ_LEN)
    assert out["enc_self_att"][0].shape == (bs, N_HEADS, SEQ_LEN, SEQ_LEN)
    assert out["tgt_emb_hat"].shape == (bs, HIDDEN)
    assert bool(jnp.all(jnp.isfinite(out["logits"])))
    print("KERNEL_OK")
</pallas_src>

<mosaic_0001>
module attributes {stable_mosaic.version = 11 : i64} {
  func.func @_decoder_kernel(%arg0: i32, %arg1: memref<2x8x32xf32, #tpu.memory_space<vmem>>, %arg2: memref<2x8x32xf32, #tpu.memory_space<vmem>>, %arg3: memref<2x8x32xf32, #tpu.memory_space<vmem>>, %arg4: memref<2x8x8xf32, #tpu.memory_space<vmem>>, %arg5: memref<2x8x8xf32, #tpu.memory_space<vmem>>, %arg6: memref<1x3x32x96xbf16, #tpu.memory_space<vmem>>, %arg7: memref<1x3x1x96xf32, #tpu.memory_space<vmem>>, %arg8: memref<1x3x32x32xbf16, #tpu.memory_space<vmem>>, %arg9: memref<1x3x1x32xf32, #tpu.memory_space<vmem>>, %arg10: memref<1x3x1x32xf32, #tpu.memory_space<vmem>>, %arg11: memref<1x3x1x32xf32, #tpu.memory_space<vmem>>, %arg12: memref<1x32x64xbf16, #tpu.memory_space<vmem>>, %arg13: memref<1x1x64xf32, #tpu.memory_space<vmem>>, %arg14: memref<1x64x32xbf16, #tpu.memory_space<vmem>>, %arg15: memref<1x1x32xf32, #tpu.memory_space<vmem>>, %arg16: memref<1x1x32xf32, #tpu.memory_space<vmem>>, %arg17: memref<1x1x32xf32, #tpu.memory_space<vmem>>, %arg18: memref<32x128xbf16, #tpu.memory_space<vmem>>, %arg19: memref<2x8x128xf32, #tpu.memory_space<vmem>>, %arg20: memref<1x2x8x128xf32, #tpu.memory_space<vmem>>, %arg21: memref<1x2x2x8x8xf32, #tpu.memory_space<vmem>>, %arg22: memref<1x2x2x8x8xf32, #tpu.memory_space<vmem>>, %arg23: memref<2x8x32xf32, #tpu.memory_space<vmem>>) attributes {dimension_semantics = [#tpu.dimension_semantics<arbitrary>], iteration_bounds = array<i64: 2>, scalar_prefetch = 0 : i64, scratch_operands = 1 : i64, tpu.core_type = #tpu.core_type<tc>, window_params = [{pipeline_mode = #tpu.pipeline_mode<synchronous>, transform_indices = @transform_0, window_bounds = array<i64: 2, 8, 32>}, {pipeline_mode = #tpu.pipeline_mode<synchronous>, transform_indices = @transform_1, window_bounds = array<i64: 2, 8, 32>}, {pipeline_mode = #tpu.pipeline_mode<synchronous>, transform_indices = @transform_2, window_bounds = array<i64: 2, 8, 32>}, {pipeline_mode = #tpu.pipeline_mode<synchronous>, transform_indices = @transform_3, window_bounds = array<i64: 2, 8, 8>}, {pipeline_mode = #tpu.pipeline_mode<synchronous>, transform_indices = @transform_4, window_bounds = array<i64: 2, 8, 8>}, {transform_indices = @transform_5, window_bounds = array<i64: 1, 3, 32, 96>}, {transform_indices = @transform_6, window_bounds = array<i64: 1, 3, 1, 96>}, {transform_indices = @transform_7, window_bounds = array<i64: 1, 3, 32, 32>}, {transform_indices = @transform_8, window_bounds = array<i64: 1, 3, 1, 32>}, {transform_indices = @transform_9, window_bounds = array<i64: 1, 3, 1, 32>}, {transform_indices = @transform_10, window_bounds = array<i64: 1, 3, 1, 32>}, {transform_indices = @transform_11, window_bounds = array<i64: 1, 32, 64>}, {transform_indices = @transform_12, window_bounds = array<i64: 1, 1, 64>}, {transform_indices = @transform_13, window_bounds = array<i64: 1, 64, 32>}, {transform_indices = @transform_14, window_bounds = array<i64: 1, 1, 32>}, {transform_indices = @transform_15, window_bounds = array<i64: 1, 1, 32>}, {transform_indices = @transform_16, window_bounds = array<i64: 1, 1, 32>}, {pipeline_mode = #tpu.pipeline_mode<synchronous>, transform_indices = @transform_17, window_bounds = array<i64: 32, 128>}, {pipeline_mode = #tpu.pipeline_mode<synchronous>, transform_indices = @transform_18, window_bounds = array<i64: 2, 8, 128>}, {transform_indices = @transform_19, window_bounds = array<i64: 1, 2, 8, 128>}, {transform_indices = @transform_20, window_bounds = array<i64: 1, 2, 2, 8, 8>}, {transform_indices = @transform_21, window_bounds = array<i64: 1, 2, 2, 8, 8>}]} {
    %c0_i32 = arith.constant 0 : i32
    %0 = arith.cmpi eq, %arg0, %c0_i32 : i32
    %1 = arith.extui %0 : i1 to i32
    %c0_i32_0 = arith.constant 0 : i32
    %2 = arith.cmpi ne, %1, %c0_i32_0 : i32
    scf.if %2 {
      %c0_207 = arith.constant 0 : index
      %c0_208 = arith.constant 0 : index
      %c0_209 = arith.constant 0 : index
      %417 = vector.load %arg1[%c0_207, %c0_208, %c0_209] : memref<2x8x32xf32, #tpu.memory_space<vmem>>, vector<2x8x32xf32>
      %c0_210 = arith.constant 0 : index
      %c0_211 = arith.constant 0 : index
      %c0_212 = arith.constant 0 : index
      %418 = vector.load %arg23[%c0_210, %c0_211, %c0_212] : memref<2x8x32xf32, #tpu.memory_space<vmem>>, vector<2x8x32xf32>
      tpu.vector_store %arg23[%c0_210, %c0_211, %c0_212], %417 {strides = array<i32>} : memref<2x8x32xf32, #tpu.memory_space<vmem>>, vector<2x8x32xf32>,
    } else {
    }
    %c0 = arith.constant 0 : index
    %c0_1 = arith.constant 0 : index
    %c0_2 = arith.constant 0 : index
    %3 = vector.load %arg23[%c0, %c0_1, %c0_2] : memref<2x8x32xf32, #tpu.memory_space<vmem>>, vector<2x8x32xf32>
    %c0_3 = arith.constant 0 : index
    %c0_4 = arith.constant 0 : index
    %c0_5 = arith.constant 0 : index
    %4 = vector.load %arg2[%c0_3, %c0_4, %c0_5] : memref<2x8x32xf32, #tpu.memory_space<vmem>>, vector<2x8x32xf32>
    %c0_6 = arith.constant 0 : index
    %c0_7 = arith.constant 0 : index
    %c0_8 = arith.constant 0 : index
    %5 = vector.load %arg3[%c0_6, %c0_7, %c0_8] : memref<2x8x32xf32, #tpu.memory_space<vmem>>, vector<2x8x32xf32>
    %c0_9 = arith.constant 0 : index
    %c0_10 = arith.constant 0 : index
    %c0_11 = arith.constant 0 : index
    %6 = vector.load %arg4[%c0_9, %c0_10, %c0_11] : memref<2x8x8xf32, #tpu.memory_space<vmem>>, vector<2x8x8xf32>
    %c0_12 = arith.constant 0 : index
    %c0_13 = arith.constant 0 : index
    %c0_14 = arith.constant 0 : index
    %c0_15 = arith.constant 0 : index
    %7 = vector.load %arg6[%c0_12, %c0_13, %c0_14, %c0_15] : memref<1x3x32x96xbf16, #tpu.memory_space<vmem>>, vector<1x1x32x96xbf16>
    %8 = vector.shape_cast %7 : vector<1x1x32x96xbf16> to vector<32x96xbf16>
    %c0_16 = arith.constant 0 : index
    %c0_17 = arith.constant 0 : index
    %c0_18 = arith.constant 0 : index
    %c0_19 = arith.constant 0 : index
    %9 = vector.load %arg7[%c0_16, %c0_17, %c0_18, %c0_19] : memref<1x3x1x96xf32, #tpu.memory_space<vmem>>, vector<1x1x1x96xf32>
    %10 = vector.shape_cast %9 : vector<1x1x1x96xf32> to vector<1x96xf32>
    %c0_20 = arith.constant 0 : index
    %c0_21 = arith.constant 0 : index
    %c0_22 = arith.constant 0 : index
    %c0_23 = arith.constant 0 : index
    %11 = vector.load %arg8[%c0_20, %c0_21, %c0_22, %c0_23] : memref<1x3x32x32xbf16, #tpu.memory_space<vmem>>, vector<1x1x32x32xbf16>
    %12 = vector.shape_cast %11 : vector<1x1x32x32xbf16> to vector<32x32xbf16>
    %c0_24 = arith.constant 0 : index
    %c0_25 = arith.constant 0 : index
    %c0_26 = arith.constant 0 : index
    %c0_27 = arith.constant 0 : index
    %13 = vector.load %arg9[%c0_24, %c0_25, %c0_26, %c0_27] : memref<1x3x1x32xf32, #tpu.memory_space<vmem>>, vector<1x1x1x32xf32>
    %14 = vector.shape_cast %13 : vector<1x1x1x32xf32> to vector<1x32xf32>
    %c0_28 = arith.constant 0 : index
    %c0_29 = arith.constant 0 : index
    %c0_30 = arith.constant 0 : index
    %c0_31 = arith.constant 0 : index
    %15 = vector.load %arg10[%c0_28, %c0_29, %c0_30, %c0_31] : memref<1x3x1x32xf32, #tpu.memory_space<vmem>>, vector<1x1x1x32xf32>
    %16 = vector.shape_cast %15 : vector<1x1x1x32xf32> to vector<1x32xf32>
    %c0_32 = arith.constant 0 : index
    %c0_33 = arith.constant 0 : index
    %c0_34 = arith.constant 0 : index
    %c0_35 = arith.constant 0 : index
    %17 = vector.load %arg11[%c0_32, %c0_33, %c0_34, %c0_35] : memref<1x3x1x32xf32, #tpu.memory_space<vmem>>, vector<1x1x1x32xf32>
    %18 = vector.shape_cast %17 : vector<1x1x1x32xf32> to vector<1x32xf32>
    %19 = vector.shape_cast %3 : vector<2x8x32xf32> to vector<16x32xf32>
    %20 = arith.truncf %19 : vector<16x32xf32> to vector<16x32xbf16>
    %21 = vector.shape_cast %3 : vector<2x8x32xf32> to vector<16x32xf32>
    %22 = arith.truncf %21 : vector<16x32xf32> to vector<16x32xbf16>
    %23 = vector.extract_strided_slice %8 {offsets = [0, 0], sizes = [32, 32], strides = [1, 1]} : vector<32x96xbf16> to vector<32x32xbf16>
    %cst = arith.constant dense<0.000000e+00> : vector<16x32xf32>
    %24 = tpu.matmul %20, %23, %cst {dimension_numbers = #tpu.dot_dimension_numbers<[1], [0], [0], [1], [0, 0, 1, 1], [], []>} : vector<16x32xbf16>, vector<32x32xbf16>, vector<16x32xf32> -> vector<16x32xf32>
    %25 = vector.extract_strided_slice %10 {offsets = [0, 0], sizes = [1, 32], strides = [1, 1]} : vector<1x96xf32> to vector<1x32xf32>
    %26 = vector.broadcast %25 : vector<1x32xf32> to vector<16x32xf32>
    %27 = arith.addf %24, %26 : vector<16x32xf32>
    %28 = vector.extract_strided_slice %8 {offsets = [0, 32], sizes = [32, 64], strides = [1, 1]} : vector<32x96xbf16> to vector<32x64xbf16>
    %cst_36 = arith.constant dense<0.000000e+00> : vector<16x64xf32>
    %29 = tpu.matmul %22, %28, %cst_36 {dimension_numbers = #tpu.dot_dimension_numbers<[1], [0], [0], [1], [0, 0, 1, 1], [], []>} : vector<16x32xbf16>, vector<32x64xbf16>, vector<16x64xf32> -> vector<16x64xf32>
    %30 = vector.extract_strided_slice %10 {offsets = [0, 32], sizes = [1, 64], strides = [1, 1]} : vector<1x96xf32> to vector<1x64xf32>
    %31 = vector.broadcast %30 : vector<1x64xf32> to vector<16x64xf32>
    %32 = arith.addf %29, %31 : vector<16x64xf32>
    %33 = vector.extract_strided_slice %32 {offsets = [0, 0], sizes = [16, 32], strides = [1, 1]} : vector<16x64xf32> to vector<16x32xf32>
    %34 = vector.extract_strided_slice %32 {offsets = [0, 32], sizes = [16, 32], strides = [1, 1]} : vector<16x64xf32> to vector<16x32xf32>
    %35 = tpu.concatenate %33, %34 in 1 : vector<16x32xf32>, vector<16x32xf32> -> vector<16x64xf32>
    %36 = vector.shape_cast %35 : vector<16x64xf32> to vector<2x8x64xf32>
    %37 = vector.shape_cast %27 : vector<16x32xf32> to vector<2x8x32xf32>
    %38 = vector.shape_cast %33 : vector<16x32xf32> to vector<2x8x32xf32>
    %39 = vector.shape_cast %34 : vector<16x32xf32> to vector<2x8x32xf32>
    %40 = vector.extract_strided_slice %37 {offsets = [0, 0, 0], sizes = [2, 8, 16], strides = [1, 1, 1]} : vector<2x8x32xf32> to vector<2x8x16xf32>
    %41 = arith.truncf %40 : vector<2x8x16xf32> to vector<2x8x16xbf16>
    %42 = vector.extract_strided_slice %38 {offsets = [0, 0, 0], sizes = [2, 8, 16], strides = [1, 1, 1]} : vector<2x8x32xf32> to vector<2x8x16xf32>
    %43 = arith.truncf %42 : vector<2x8x16xf32> to vector<2x8x16xbf16>
    %44 = vector.extract_strided_slice %39 {offsets = [0, 0, 0], sizes = [2, 8, 16], strides = [1, 1, 1]} : vector<2x8x32xf32> to vector<2x8x16xf32>
    %45 = arith.truncf %44 : vector<2x8x16xf32> to vector<2x8x16xbf16>
    "tpu.trace_start"() <{level = 10 : i32, message = "bqd,bkd->bqk"}> : () -> ()
    %cst_37 = arith.constant dense<0.000000e+00> : vector<2x8x8xf32>
    %46 = tpu.matmul %41, %43, %cst_37 {dimension_numbers = #tpu.dot_dimension_numbers<[2], [2], [1], [1], [0, 0, 0, 1, 1, 1], [0], [0]>} : vector<2x8x16xbf16>, vector<2x8x16xbf16>, vector<2x8x8xf32> -> vector<2x8x8xf32>
    "tpu.trace_stop"() : () -> ()
    %cst_38 = arith.constant 2.500000e-01 : f32
    %47 = vector.broadcast %cst_38 : f32 to vector<2x8x8xf32>
    %48 = arith.mulf %46, %47 : vector<2x8x8xf32>
    %cst_39 = arith.constant 0.000000e+00 : f32
    %49 = vector.broadcast %cst_39 : f32 to vector<2x8x8xf32>
    %50 = arith.cmpf ogt, %6, %49 : vector<2x8x8xf32>
    %cst_40 = arith.constant -1.000000e+30 : f32
    %51 = vector.broadcast %cst_40 : f32 to vector<2x8x8xf32>
    %52 = arith.select %50, %51, %48 : vector<2x8x8xi1>, vector<2x8x8xf32>
    %cst_41 = arith.constant dense<0xFF800000> : vector<2x8xf32>
    %53 = vector.multi_reduction <maximumf>, %52, %cst_41 [2] : vector<2x8x8xf32> to vector<2x8xf32>
    %54 = vector.shape_cast %53 : vector<2x8xf32> to vector<2x8x1xf32>
    %55 = vector.broadcast %54 : vector<2x8x1xf32> to vector<2x8x8xf32>
    %56 = arith.subf %52, %55 : vector<2x8x8xf32>
    %57 = math.exp %56 : vector<2x8x8xf32>
    %cst_42 = arith.constant dense<0.000000e+00> : vector<2x8xf32>
    %58 = vector.multi_reduction <add>, %57, %cst_42 [2] : vector<2x8x8xf32> to vector<2x8xf32>
    %59 = vector.shape_cast %58 : vector<2x8xf32> to vector<2x8x1xf32>
    %60 = tpu.reciprocal %59 {approx = true} : vector<2x8x1xf32> -> vector<2x8x1xf32>
    %61 = vector.broadcast %60 : vector<2x8x1xf32> to vector<2x8x8xf32>
    %62 = arith.mulf %57, %61 : vector<2x8x8xf32>
    %63 = arith.truncf %62 : vector<2x8x8xf32> to vector<2x8x8xbf16>
    "tpu.trace_start"() <{level = 10 : i32, message = "bqk,bkd->bqd"}> : () -> ()
    %cst_43 = arith.constant dense<0.000000e+00> : vector<2x8x16xf32>
    %64 = tpu.matmul %63, %45, %cst_43 {dimension_numbers = #tpu.dot_dimension_numbers<[2], [1], [1], [2], [0, 0, 0, 1, 1, 2], [0], [0]>} : vector<2x8x8xbf16>, vector<2x8x16xbf16>, vector<2x8x16xf32> -> vector<2x8x16xf32>
    "tpu.trace_stop"() : () -> ()
    %65 = vector.extract_strided_slice %37 {offsets = [0, 0, 16], sizes = [2, 8, 16], strides = [1, 1, 1]} : vector<2x8x32xf32> to vector<2x8x16xf32>
    %66 = arith.truncf %65 : vector<2x8x16xf32> to vector<2x8x16xbf16>
    %67 = vector.extract_strided_slice %38 {offsets = [0, 0, 16], sizes = [2, 8, 16], strides = [1, 1, 1]} : vector<2x8x32xf32> to vector<2x8x16xf32>
    %68 = arith.truncf %67 : vector<2x8x16xf32> to vector<2x8x16xbf16>
    %69 = vector.extract_strided_slice %39 {offsets = [0, 0, 16], sizes = [2, 8, 16], strides = [1, 1, 1]} : vector<2x8x32xf32> to vector<2x8x16xf32>
    %70 = arith.truncf %69 : vector<2x8x16xf32> to vector<2x8x16xbf16>
    "tpu.trace_start"() <{level = 10 : i32, message = "bqd,bkd->bqk"}> : () -> ()
    %cst_44 = arith.constant dense<0.000000e+00> : vector<2x8x8xf32>
    %71 = tpu.matmul %66, %68, %cst_44 {dimension_numbers = #tpu.dot_dimension_numbers<[2], [2], [1], [1], [0, 0, 0, 1, 1, 1], [0], [0]>} : vector<2x8x16xbf16>, vector<2x8x16xbf16>, vector<2x8x8xf32> -> vector<2x8x8xf32>
    "tpu.trace_stop"() : () -> ()
    %cst_45 = arith.constant 2.500000e-01 : f32
    %72 = vector.broadcast %cst_45 : f32 to vector<2x8x8xf32>
    %73 = arith.mulf %71, %72 : vector<2x8x8xf32>
    %cst_46 = arith.constant 0.000000e+00 : f32
    %74 = vector.broadcast %cst_46 : f32 to vector<2x8x8xf32>
    %75 = arith.cmpf ogt, %6, %74 : vector<2x8x8xf32>
    %cst_47 = arith.constant -1.000000e+30 : f32
    %76 = vector.broadcast %cst_47 : f32 to vector<2x8x8xf32>
    %77 = arith.select %75, %76, %73 : vector<2x8x8xi1>, vector<2x8x8xf32>
    %cst_48 = arith.constant dense<0xFF800000> : vector<2x8xf32>
    %78 = vector.multi_reduction <maximumf>, %77, %cst_48 [2] : vector<2x8x8xf32> to vector<2x8xf32>
    %79 = vector.shape_cast %78 : vector<2x8xf32> to vector<2x8x1xf32>
    %80 = vector.broadcast %79 : vector<2x8x1xf32> to vector<2x8x8xf32>
    %81 = arith.subf %77, %80 : vector<2x8x8xf32>
    %82 = math.exp %81 : vector<2x8x8xf32>
    %cst_49 = arith.constant dense<0.000000e+00> : vector<2x8xf32>
    %83 = vector.multi_reduction <add>, %82, %cst_49 [2] : vector<2x8x8xf32> to vector<2x8xf32>
    %84 = vector.shape_cast %83 : vector<2x8xf32> to vector<2x8x1xf32>
    %85 = tpu.reciprocal %84 {approx = true} : vector<2x8x1xf32> -> vector<2x8x1xf32>
    %86 = vector.broadcast %85 : vector<2x8x1xf32> to vector<2x8x8xf32>
    %87 = arith.mulf %82, %86 : vector<2x8x8xf32>
    %88 = arith.truncf %87 : vector<2x8x8xf32> to vector<2x8x8xbf16>
    "tpu.trace_start"() <{level = 10 : i32, message = "bqk,bkd->bqd"}> : () -> ()
    %cst_50 = arith.constant dense<0.000000e+00> : vector<2x8x16xf32>
    %89 = tpu.matmul %88, %70, %cst_50 {dimension_numbers = #tpu.dot_dimension_numbers<[2], [1], [1], [2], [0, 0, 0, 1, 1, 2], [0], [0]>} : vector<2x8x8xbf16>, vector<2x8x16xbf16>, vector<2x8x16xf32> -> vector<2x8x16xf32>
    "tpu.trace_stop"() : () -> ()
    %90 = tpu.concatenate %64, %89 in 2 : vector<2x8x16xf32>, vector<2x8x16xf32> -> vector<2x8x32xf32>
    %91 = vector.shape_cast %90 : vector<2x8x32xf32> to vector<16x32xf32>
    %92 = arith.truncf %91 : vector<16x32xf32> to vector<16x32xbf16>
    %cst_51 = arith.constant dense<0.000000e+00> : vector<16x32xf32>
    %93 = tpu.matmul %92, %12, %cst_51 {dimension_numbers = #tpu.dot_dimension_numbers<[1], [0], [0], [1], [0, 0, 1, 1], [], []>} : vector<16x32xbf16>, vector<32x32xbf16>, vector<16x32xf32> -> vector<16x32xf32>
    %94 = vector.broadcast %14 : vector<1x32xf32> to vector<16x32xf32>
    %95 = arith.addf %93, %94 : vector<16x32xf32>
    %96 = vector.shape_cast %3 : vector<2x8x32xf32> to vector<16x32xf32>
    %97 = arith.addf %95, %96 : vector<16x32xf32>
    %cst_52 = arith.constant dense<0.000000e+00> : vector<16xf32>
    %98 = vector.multi_reduction <add>, %97, %cst_52 [1] : vector<16x32xf32> to vector<16xf32>
    %99 = vector.shape_cast %98 : vector<16xf32> to vector<16x1xf32>
    %cst_53 = arith.constant 3.200000e+01 : f32
    %100 = vector.broadcast %cst_53 : f32 to vector<16x1xf32>
    %101 = arith.divf %99, %100 : vector<16x1xf32>
    %102 = vector.broadcast %101 : vector<16x1xf32> to vector<16x32xf32>
    %103 = arith.subf %97, %102 : vector<16x32xf32>
    %104 = arith.mulf %103, %103 : vector<16x32xf32>
    %cst_54 = arith.constant dense<0.000000e+00> : vector<16xf32>
    %105 = vector.multi_reduction <add>, %104, %cst_54 [1] : vector<16x32xf32> to vector<16xf32>
    %106 = vector.shape_cast %105 : vector<16xf32> to vector<16x1xf32>
    %cst_55 = arith.constant 3.200000e+01 : f32
    %107 = vector.broadcast %cst_55 : f32 to vector<16x1xf32>
    %108 = arith.divf %106, %107 : vector<16x1xf32>
    %109 = vector.broadcast %101 : vector<16x1xf32> to vector<16x32xf32>
    %110 = arith.subf %97, %109 : vector<16x32xf32>
    %cst_56 = arith.constant 9.99999974E-6 : f32
    %111 = vector.broadcast %cst_56 : f32 to vector<16x1xf32>
    %112 = arith.addf %108, %111 : vector<16x1xf32>
    %113 = math.rsqrt %112 : vector<16x1xf32>
    %114 = vector.broadcast %113 : vector<16x1xf32> to vector<16x32xf32>
    %115 = arith.mulf %110, %114 : vector<16x32xf32>
    %116 = vector.broadcast %16 : vector<1x32xf32> to vector<16x32xf32>
    %117 = arith.mulf %115, %116 : vector<16x32xf32>
    %118 = vector.broadcast %18 : vector<1x32xf32> to vector<16x32xf32>
    %119 = arith.addf %117, %118 : vector<16x32xf32>
    %120 = vector.shape_cast %119 : vector<16x32xf32> to vector<2x8x32xf32>
    %c0_57 = arith.constant 0 : index
    %c0_58 = arith.constant 0 : index
    %c0_59 = arith.constant 0 : index
    %121 = vector.load %arg4[%c0_57, %c0_58, %c0_59] : memref<2x8x8xf32, #tpu.memory_space<vmem>>, vector<2x8x8xf32>
    %c0_60 = arith.constant 0 : index
    %c1 = arith.constant 1 : index
    %c0_61 = arith.constant 0 : index
    %c0_62 = arith.constant 0 : index
    %122 = vector.load %arg6[%c0_60, %c1, %c0_61, %c0_62] : memref<1x3x32x96xbf16, #tpu.memory_space<vmem>>, vector<1x1x32x96xbf16>
    %123 = vector.shape_cast %122 : vector<1x1x32x96xbf16> to vector<32x96xbf16>
    %c0_63 = arith.constant 0 : index
    %c1_64 = arith.constant 1 : index
    %c0_65 = arith.constant 0 : index
    %c0_66 = arith.constant 0 : index
    %124 = vector.load %arg7[%c0_63, %c1_64, %c0_65, %c0_66] : memref<1x3x1x96xf32, #tpu.memory_space<vmem>>, vector<1x1x1x96xf32>
    %125 = vector.shape_cast %124 : vector<1x1x1x96xf32> to vector<1x96xf32>
    %c0_67 = arith.constant 0 : index
    %c1_68 = arith.constant 1 : index
    %c0_69 = arith.constant 0 : index
    %c0_70 = arith.constant 0 : index
    %126 = vector.load %arg8[%c0_67, %c1_68, %c0_69, %c0_70] : memref<1x3x32x32xbf16, #tpu.memory_space<vmem>>, vector<1x1x32x32xbf16>
    %127 = vector.shape_cast %126 : vector<1x1x32x32xbf16> to vector<32x32xbf16>
    %c0_71 = arith.constant 0 : index
    %c1_72 = arith.constant 1 : index
    %c0_73 = arith.constant 0 : index
    %c0_74 = arith.constant 0 : index
    %128 = vector.load %arg9[%c0_71, %c1_72, %c0_73, %c0_74] : memref<1x3x1x32xf32, #tpu.memory_space<vmem>>, vector<1x1x1x32xf32>
    %129 = vector.shape_cast %128 : vector<1x1x1x32xf32> to vector<1x32xf32>
    %c0_75 = arith.constant 0 : index
    %c1_76 = arith.constant 1 : index
    %c0_77 = arith.constant 0 : index
    %c0_78 = arith.constant 0 : index
    %130 = vector.load %arg10[%c0_75, %c1_76, %c0_77, %c0_78] : memref<1x3x1x32xf32, #tpu.memory_space<vmem>>, vector<1x1x1x32xf32>
    %131 = vector.shape_cast %130 : vector<1x1x1x32xf32> to vector<1x32xf32>
    %c0_79 = arith.constant 0 : index
    %c1_80 = arith.constant 1 : index
    %c0_81 = arith.constant 0 : index
    %c0_82 = arith.constant 0 : index
    %132 = vector.load %arg11[%c0_79, %c1_80, %c0_81, %c0_82] : memref<1x3x1x32xf32, #tpu.memory_space<vmem>>, vector<1x1x1x32xf32>
    %133 = vector.shape_cast %132 : vector<1x1x1x32xf32> to vector<1x32xf32>
    %134 = vector.shape_cast %5 : vector<2x8x32xf32> to vector<16x32xf32>
    %135 = arith.truncf %134 : vector<16x32xf32> to vector<16x32xbf16>
    %136 = vector.shape_cast %3 : vector<2x8x32xf32> to vector<16x32xf32>
    %137 = arith.truncf %136 : vector<16x32xf32> to vector<16x32xbf16>
    %138 = vector.extract_strided_slice %123 {offsets = [0, 0], sizes = [32, 32], strides = [1, 1]} : vector<32x96xbf16> to vector<32x32xbf16>
    %cst_83 = arith.constant dense<0.000000e+00> : vector<16x32xf32>
    %139 = tpu.matmul %135, %138, %cst_83 {dimension_numbers = #tpu.dot_dimension_numbers<[1], [0], [0], [1], [0, 0, 1, 1], [], []>} : vector<16x32xbf16>, vector<32x32xbf16>, vector<16x32xf32> -> vector<16x32xf32>
    %140 = vector.extract_strided_slice %125 {offsets = [0, 0], sizes = [1, 32], strides = [1, 1]} : vector<1x96xf32> to vector<1x32xf32>
    %141 = vector.broadcast %140 : vector<1x32xf32> to vector<16x32xf32>
    %142 = arith.addf %139, %141 : vector<16x32xf32>
    %143 = vector.extract_strided_slice %123 {offsets = [0, 32], sizes = [32, 64], strides = [1, 1]} : vector<32x96xbf16> to vector<32x64xbf16>
    %cst_84 = arith.constant dense<0.000000e+00> : vector<16x64xf32>
    %144 = tpu.matmul %137, %143, %cst_84 {dimension_numbers = #tpu.dot_dimension_numbers<[1], [0], [0], [1], [0, 0, 1, 1], [], []>} : vector<16x32xbf16>, vector<32x64xbf16>, vector<16x64xf32> -> vector<16x64xf32>
    %145 = vector.extract_strided_slice %125 {offsets = [0, 32], sizes = [1, 64], strides = [1, 1]} : vector<1x96xf32> to vector<1x64xf32>
    %146 = vector.broadcast %145 : vector<1x64xf32> to vector<16x64xf32>
    %147 = arith.addf %144, %146 : vector<16x64xf32>
    %148 = vector.extract_strided_slice %147 {offsets = [0, 0], sizes = [16, 32], strides = [1, 1]} : vector<16x64xf32> to vector<16x32xf32>
    %149 = vector.extract_strided_slice %147 {offsets = [0, 32], sizes = [16, 32], strides = [1, 1]} : vector<16x64xf32> to vector<16x32xf32>
    %150 = tpu.concatenate %148, %149 in 1 : vector<16x32xf32>, vector<16x32xf32> -> vector<16x64xf32>
    %151 = vector.shape_cast %150 : vector<16x64xf32> to vector<2x8x64xf32>
    %152 = vector.shape_cast %142 : vector<16x32xf32> to vector<2x8x32xf32>
    %153 = vector.shape_cast %148 : vector<16x32xf32> to vector<2x8x32xf32>
    %154 = vector.shape_cast %149 : vector<16x32xf32> to vector<2x8x32xf32>
    %155 = vector.extract_strided_slice %152 {offsets = [0, 0, 0], sizes = [2, 8, 16], strides = [1, 1, 1]} : vector<2x8x32xf32> to vector<2x8x16xf32>
    %156 = arith.truncf %155 : vector<2x8x16xf32> to vector<2x8x16xbf16>
    %157 = vector.extract_strided_slice %153 {offsets = [0, 0, 0], sizes = [2, 8, 16], strides = [1, 1, 1]} : vector<2x8x32xf32> to vector<2x8x16xf32>
    %158 = arith.truncf %157 : vector<2x8x16xf32> to vector<2x8x16xbf16>
    %159 = vector.extract_strided_slice %154 {offsets = [0, 0, 0], sizes = [2, 8, 16], strides = [1, 1, 1]} : vector<2x8x32xf32> to vector<2x8x16xf32>
    %160 = arith.truncf %159 : vector<2x8x16xf32> to vector<2x8x16xbf16>
    "tpu.trace_start"() <{level = 10 : i32, message = "bqd,bkd->bqk"}> : () -> ()
    %cst_85 = arith.constant dense<0.000000e+00> : vector<2x8x8xf32>
    %161 = tpu.matmul %156, %158, %cst_85 {dimension_numbers = #tpu.dot_dimension_numbers<[2], [2], [1], [1], [0, 0, 0, 1, 1, 1], [0], [0]>} : vector<2x8x16xbf16>, vector<2x8x16xbf16>, vector<2x8x8xf32> -> vector<2x8x8xf32>
    "tpu.trace_stop"() : () -> ()
    %cst_86 = arith.constant 2.500000e-01 : f32
    %162 = vector.broadcast %cst_86 : f32 to vector<2x8x8xf32>
    %163 = arith.mulf %161, %162 : vector<2x8x8xf32>
    %cst_87 = arith.constant 0.000000e+00 : f32
    %164 = vector.broadcast %cst_87 : f32 to vector<2x8x8xf32>
    %165 = arith.cmpf ogt, %121, %164 : vector<2x8x8xf32>
    %cst_88 = arith.constant -1.000000e+30 : f32
    %166 = vector.broadcast %cst_88 : f32 to vector<2x8x8xf32>
    %167 = arith.select %165, %166, %163 : vector<2x8x8xi1>, vector<2x8x8xf32>
    %cst_89 = arith.constant dense<0xFF800000> : vector<2x8xf32>
    %168 = vector.multi_reduction <maximumf>, %167, %cst_89 [2] : vector<2x8x8xf32> to vector<2x8xf32>
    %169 = vector.shape_cast %168 : vector<2x8xf32> to vector<2x8x1xf32>
    %170 = vector.broadcast %169 : vector<2x8x1xf32> to vector<2x8x8xf32>
    %171 = arith.subf %167, %170 : vector<2x8x8xf32>
    %172 = math.exp %171 : vector<2x8x8xf32>
    %cst_90 = arith.constant dense<0.000000e+00> : vector<2x8xf32>
    %173 = vector.multi_reduction <add>, %172, %cst_90 [2] : vector<2x8x8xf32> to vector<2x8xf32>
    %174 = vector.shape_cast %173 : vector<2x8xf32> to vector<2x8x1xf32>
    %175 = tpu.reciprocal %174 {approx = true} : vector<2x8x1xf32> -> vector<2x8x1xf32>
    %176 = vector.broadcast %175 : vector<2x8x1xf32> to vector<2x8x8xf32>
    %177 = arith.mulf %172, %176 : vector<2x8x8xf32>
    %178 = arith.truncf %177 : vector<2x8x8xf32> to vector<2x8x8xbf16>
    "tpu.trace_start"() <{level = 10 : i32, message = "bqk,bkd->bqd"}> : () -> ()
    %cst_91 = arith.constant dense<0.000000e+00> : vector<2x8x16xf32>
    %179 = tpu.matmul %178, %160, %cst_91 {dimension_numbers = #tpu.dot_dimension_numbers<[2], [1], [1], [2], [0, 0, 0, 1, 1, 2], [0], [0]>} : vector<2x8x8xbf16>, vector<2x8x16xbf16>, vector<2x8x16xf32> -> vector<2x8x16xf32>
    "tpu.trace_stop"() : () -> ()
    %180 = vector.extract_strided_slice %152 {offsets = [0, 0, 16], sizes = [2, 8, 16], strides = [1, 1, 1]} : vector<2x8x32xf32> to vector<2x8x16xf32>
    %181 = arith.truncf %180 : vector<2x8x16xf32> to vector<2x8x16xbf16>
    %182 = vector.extract_strided_slice %153 {offsets = [0, 0, 16], sizes = [2, 8, 16], strides = [1, 1, 1]} : vector<2x8x32xf32> to vector<2x8x16xf32>
    %183 = arith.truncf %182 : vector<2x8x16xf32> to vector<2x8x16xbf16>
    %184 = vector.extract_strided_slice %154 {offsets = [0, 0, 16], sizes = [2, 8, 16], strides = [1, 1, 1]} : vector<2x8x32xf32> to vector<2x8x16xf32>
    %185 = arith.truncf %184 : vector<2x8x16xf32> to vector<2x8x16xbf16>
    "tpu.trace_start"() <{level = 10 : i32, message = "bqd,bkd->bqk"}> : () -> ()
    %cst_92 = arith.constant dense<0.000000e+00> : vector<2x8x8xf32>
    %186 = tpu.matmul %181, %183, %cst_92 {dimension_numbers = #tpu.dot_dimension_numbers<[2], [2], [1], [1], [0, 0, 0, 1, 1, 1], [0], [0]>} : vector<2x8x16xbf16>, vector<2x8x16xbf16>, vector<2x8x8xf32> -> vector<2x8x8xf32>
    "tpu.trace_stop"() : () -> ()
    %cst_93 = arith.constant 2.500000e-01 : f32
    %187 = vector.broadcast %cst_93 : f32 to vector<2x8x8xf32>
    %188 = arith.mulf %186, %187 : vector<2x8x8xf32>
    %cst_94 = arith.constant 0.000000e+00 : f32
    %189 = vector.broadcast %cst_94 : f32 to vector<2x8x8xf32>
    %190 = arith.cmpf ogt, %121, %189 : vector<2x8x8xf32>
    %cst_95 = arith.constant -1.000000e+30 : f32
    %191 = vector.broadcast %cst_95 : f32 to vector<2x8x8xf32>
    %192 = arith.select %190, %191, %188 : vector<2x8x8xi1>, vector<2x8x8xf32>
    %cst_96 = arith.constant dense<0xFF800000> : vector<2x8xf32>
    %193 = vector.multi_reduction <maximumf>, %192, %cst_96 [2] : vector<2x8x8xf32> to vector<2x8xf32>
    %194 = vector.shape_cast %193 : vector<2x8xf32> to vector<2x8x1xf32>
    %195 = vector.broadcast %194 : vector<2x8x1xf32> to vector<2x8x8xf32>
    %196 = arith.subf %192, %195 : vector<2x8x8xf32>
    %197 = math.exp %196 : vector<2x8x8xf32>
    %cst_97 = arith.constant dense<0.000000e+00> : vector<2x8xf32>
    %198 = vector.multi_reduction <add>, %197, %cst_97 [2] : vector<2x8x8xf32> to vector<2x8xf32>
    %199 = vector.shape_cast %198 : vector<2x8xf32> to vector<2x8x1xf32>
    %200 = tpu.reciprocal %199 {approx = true} : vector<2x8x1xf32> -> vector<2x8x1xf32>
    %201 = vector.broadcast %200 : vector<2x8x1xf32> to vector<2x8x8xf32>
    %202 = arith.mulf %197, %201 : vector<2x8x8xf32>
    %203 = arith.truncf %202 : vector<2x8x8xf32> to vector<2x8x8xbf16>
    "tpu.trace_start"() <{level = 10 : i32, message = "bqk,bkd->bqd"}> : () -> ()
    %cst_98 = arith.constant dense<0.000000e+00> : vector<2x8x16xf32>
    %204 = tpu.matmul %203, %185, %cst_98 {dimension_numbers = #tpu.dot_dimension_numbers<[2], [1], [1], [2], [0, 0, 0, 1, 1, 2], [0], [0]>} : vector<2x8x8xbf16>, vector<2x8x16xbf16>, vector<2x8x16xf32> -> vector<2x8x16xf32>
    "tpu.trace_stop"() : () -> ()
    %205 = tpu.concatenate %179, %204 in 2 : vector<2x8x16xf32>, vector<2x8x16xf32> -> vector<2x8x32xf32>
    %206 = vector.shape_cast %205 : vector<2x8x32xf32> to vector<16x32xf32>
    %207 = arith.truncf %206 : vector<16x32xf32> to vector<16x32xbf16>
    %cst_99 = arith.constant dense<0.000000e+00> : vector<16x32xf32>
    %208 = tpu.matmul %207, %127, %cst_99 {dimension_numbers = #tpu.dot_dimension_numbers<[1], [0], [0], [1], [0, 0, 1, 1], [], []>} : vector<16x32xbf16>, vector<32x32xbf16>, vector<16x32xf32> -> vector<16x32xf32>
    %209 = vector.broadcast %129 : vector<1x32xf32> to vector<16x32xf32>
    %210 = arith.addf %208, %209 : vector<16x32xf32>
    %211 = vector.shape_cast %5 : vector<2x8x32xf32> to vector<16x32xf32>
    %212 = arith.addf %210, %211 : vector<16x32xf32>
    %cst_100 = arith.constant dense<0.000000e+00> : vector<16xf32>
    %213 = vector.multi_reduction <add>, %212, %cst_100 [1] : vector<16x32xf32> to vector<16xf32>
    %214 = vector.shape_cast %213 : vector<16xf32> to vector<16x1xf32>
    %cst_101 = arith.constant 3.200000e+01 : f32
    %215 = vector.broadcast %cst_101 : f32 to vector<16x1xf32>
    %216 = arith.divf %214, %215 : vector<16x1xf32>
    %217 = vector.broadcast %216 : vector<16x1xf32> to vector<16x32xf32>
    %218 = arith.subf %212, %217 : vector<16x32xf32>
    %219 = arith.mulf %218, %218 : vector<16x32xf32>
    %cst_102 = arith.constant dense<0.000000e+00> : vector<16xf32>
    %220 = vector.multi_reduction <add>, %219, %cst_102 [1] : vector<16x32xf32> to vector<16xf32>
    %221 = vector.shape_cast %220 : vector<16xf32> to vector<16x1xf32>
    %cst_103 = arith.constant 3.200000e+01 : f32
    %222 = vector.broadcast %cst_103 : f32 to vector<16x1xf32>
    %223 = arith.divf %221, %222 : vector<16x1xf32>
    %224 = vector.broadcast %216 : vector<16x1xf32> to vector<16x32xf32>
    %225 = arith.subf %212, %224 : vector<16x32xf32>
    %cst_104 = arith.constant 9.99999974E-6 : f32
    %226 = vector.broadcast %cst_104 : f32 to vector<16x1xf32>
    %227 = arith.addf %223, %226 : vector<16x1xf32>
    %228 = math.rsqrt %227 : vector<16x1xf32>
    %229 = vector.broadcast %228 : vector<16x1xf32> to vector<16x32xf32>
    %230 = arith.mulf %225, %229 : vector<16x32xf32>
    %231 = vector.broadcast %131 : vector<1x32xf32> to vector<16x32xf32>
    %232 = arith.mulf %230, %231 : vector<16x32xf32>
    %233 = vector.broadcast %133 : vector<1x32xf32> to vector<16x32xf32>
    %234 = arith.addf %232, %233 : vector<16x32xf32>
    %235 = vector.shape_cast %234 : vector<16x32xf32> to vector<2x8x32xf32>
    %236 = arith.subf %120, %235 : vector<2x8x32xf32>
    %c0_105 = arith.constant 0 : index
    %c0_106 = arith.constant 0 : index
    %c0_107 = arith.constant 0 : index
    %237 = vector.load %arg5[%c0_105, %c0_106, %c0_107] : memref<2x8x8xf32, #tpu.memory_space<vmem>>, vector<2x8x8xf32>
    %c0_108 = arith.constant 0 : index
    %c2 = arith.constant 2 : index
    %c0_109 = arith.constant 0 : index
    %c0_110 = arith.constant 0 : index
    %238 = vector.load %arg6[%c0_108, %c2, %c0_109, %c0_110] : memref<1x3x32x96xbf16, #tpu.memory_space<vmem>>, vector<1x1x32x96xbf16>
    %239 = vector.shape_cast %238 : vector<1x1x32x96xbf16> to vector<32x96xbf16>
    %c0_111 = arith.constant 0 : index
    %c2_112 = arith.constant 2 : index
    %c0_113 = arith.constant 0 : index
    %c0_114 = arith.constant 0 : index
    %240 = vector.load %arg7[%c0_111, %c2_112, %c0_113, %c0_114] : memref<1x3x1x96xf32, #tpu.memory_space<vmem>>, vector<1x1x1x96xf32>
    %241 = vector.shape_cast %240 : vector<1x1x1x96xf32> to vector<1x96xf32>
    %c0_115 = arith.constant 0 : index
    %c2_116 = arith.constant 2 : index
    %c0_117 = arith.constant 0 : index
    %c0_118 = arith.constant 0 : index
    %242 = vector.load %arg8[%c0_115, %c2_116, %c0_117, %c0_118] : memref<1x3x32x32xbf16, #tpu.memory_space<vmem>>, vector<1x1x32x32xbf16>
    %243 = vector.shape_cast %242 : vector<1x1x32x32xbf16> to vector<32x32xbf16>
    %c0_119 = arith.constant 0 : index
    %c2_120 = arith.constant 2 : index
    %c0_121 = arith.constant 0 : index
    %c0_122 = arith.constant 0 : index
    %244 = vector.load %arg9[%c0_119, %c2_120, %c0_121, %c0_122] : memref<1x3x1x32xf32, #tpu.memory_space<vmem>>, vector<1x1x1x32xf32>
    %245 = vector.shape_cast %244 : vector<1x1x1x32xf32> to vector<1x32xf32>
    %c0_123 = arith.constant 0 : index
    %c2_124 = arith.constant 2 : index
    %c0_125 = arith.constant 0 : index
    %c0_126 = arith.constant 0 : index
    %246 = vector.load %arg10[%c0_123, %c2_124, %c0_125, %c0_126] : memref<1x3x1x32xf32, #tpu.memory_space<vmem>>, vector<1x1x1x32xf32>
    %247 = vector.shape_cast %246 : vector<1x1x1x32xf32> to vector<1x32xf32>
    %c0_127 = arith.constant 0 : index
    %c2_128 = arith.constant 2 : index
    %c0_129 = arith.constant 0 : index
    %c0_130 = arith.constant 0 : index
    %248 = vector.load %arg11[%c0_127, %c2_128, %c0_129, %c0_130] : memref<1x3x1x32xf32, #tpu.memory_space<vmem>>, vector<1x1x1x32xf32>
    %249 = vector.shape_cast %248 : vector<1x1x1x32xf32> to vector<1x32xf32>
    %250 = vector.shape_cast %236 : vector<2x8x32xf32> to vector<16x32xf32>
    %251 = arith.truncf %250 : vector<16x32xf32> to vector<16x32xbf16>
    %252 = vector.shape_cast %4 : vector<2x8x32xf32> to vector<16x32xf32>
    %253 = arith.truncf %252 : vector<16x32xf32> to vector<16x32xbf16>
    %254 = vector.extract_strided_slice %239 {offsets = [0, 0], sizes = [32, 32], strides = [1, 1]} : vector<32x96xbf16> to vector<32x32xbf16>
    %cst_131 = arith.constant dense<0.000000e+00> : vector<16x32xf32>
    %255 = tpu.matmul %251, %254, %cst_131 {dimension_numbers = #tpu.dot_dimension_numbers<[1], [0], [0], [1], [0, 0, 1, 1], [], []>} : vector<16x32xbf16>, vector<32x32xbf16>, vector<16x32xf32> -> vector<16x32xf32>
    %256 = vector.extract_strided_slice %241 {offsets = [0, 0], sizes = [1, 32], strides = [1, 1]} : vector<1x96xf32> to vector<1x32xf32>
    %257 = vector.broadcast %256 : vector<1x32xf32> to vector<16x32xf32>
    %258 = arith.addf %255, %257 : vector<16x32xf32>
    %259 = vector.extract_strided_slice %239 {offsets = [0, 32], sizes = [32, 64], strides = [1, 1]} : vector<32x96xbf16> to vector<32x64xbf16>
    %cst_132 = arith.constant dense<0.000000e+00> : vector<16x64xf32>
    %260 = tpu.matmul %253, %259, %cst_132 {dimension_numbers = #tpu.dot_dimension_numbers<[1], [0], [0], [1], [0, 0, 1, 1], [], []>} : vector<16x32xbf16>, vector<32x64xbf16>, vector<16x64xf32> -> vector<16x64xf32>
    %261 = vector.extract_strided_slice %241 {offsets = [0, 32], sizes = [1, 64], strides = [1, 1]} : vector<1x96xf32> to vector<1x64xf32>
    %262 = vector.broadcast %261 : vector<1x64xf32> to vector<16x64xf32>
    %263 = arith.addf %260, %262 : vector<16x64xf32>
    %264 = vector.extract_strided_slice %263 {offsets = [0, 0], sizes = [16, 32], strides = [1, 1]} : vector<16x64xf32> to vector<16x32xf32>
    %265 = vector.extract_strided_slice %263 {offsets = [0, 32], sizes = [16, 32], strides = [1, 1]} : vector<16x64xf32> to vector<16x32xf32>
    %266 = vector.shape_cast %258 : vector<16x32xf32> to vector<2x8x32xf32>
    %267 = vector.shape_cast %264 : vector<16x32xf32> to vector<2x8x32xf32>
    %268 = vector.shape_cast %265 : vector<16x32xf32> to vector<2x8x32xf32>
    %269 = vector.extract_strided_slice %266 {offsets = [0, 0, 0], sizes = [2, 8, 16], strides = [1, 1, 1]} : vector<2x8x32xf32> to vector<2x8x16xf32>
    %270 = arith.truncf %269 : vector<2x8x16xf32> to vector<2x8x16xbf16>
    %271 = vector.extract_strided_slice %267 {offsets = [0, 0, 0], sizes = [2, 8, 16], strides = [1, 1, 1]} : vector<2x8x32xf32> to vector<2x8x16xf32>
    %272 = arith.truncf %271 : vector<2x8x16xf32> to vector<2x8x16xbf16>
    %273 = vector.extract_strided_slice %268 {offsets = [0, 0, 0], sizes = [2, 8, 16], strides = [1, 1, 1]} : vector<2x8x32xf32> to vector<2x8x16xf32>
    %274 = arith.truncf %273 : vector<2x8x16xf32> to vector<2x8x16xbf16>
    "tpu.trace_start"() <{level = 10 : i32, message = "bqd,bkd->bqk"}> : () -> ()
    %cst_133 = arith.constant dense<0.000000e+00> : vector<2x8x8xf32>
    %275 = tpu.matmul %270, %272, %cst_133 {dimension_numbers = #tpu.dot_dimension_numbers<[2], [2], [1], [1], [0, 0, 0, 1, 1, 1], [0], [0]>} : vector<2x8x16xbf16>, vector<2x8x16xbf16>, vector<2x8x8xf32> -> vector<2x8x8xf32>
    "tpu.trace_stop"() : () -> ()
    %cst_134 = arith.constant 2.500000e-01 : f32
    %276 = vector.broadcast %cst_134 : f32 to vector<2x8x8xf32>
    %277 = arith.mulf %275, %276 : vector<2x8x8xf32>
    %cst_135 = arith.constant 0.000000e+00 : f32
    %278 = vector.broadcast %cst_135 : f32 to vector<2x8x8xf32>
    %279 = arith.cmpf ogt, %237, %278 : vector<2x8x8xf32>
    %cst_136 = arith.constant -1.000000e+30 : f32
    %280 = vector.broadcast %cst_136 : f32 to vector<2x8x8xf32>
    %281 = arith.select %279, %280, %277 : vector<2x8x8xi1>, vector<2x8x8xf32>
    %cst_137 = arith.constant dense<0xFF800000> : vector<2x8xf32>
    %282 = vector.multi_reduction <maximumf>, %281, %cst_137 [2] : vector<2x8x8xf32> to vector<2x8xf32>
    %283 = vector.shape_cast %282 : vector<2x8xf32> to vector<2x8x1xf32>
    %284 = vector.broadcast %283 : vector<2x8x1xf32> to vector<2x8x8xf32>
    %285 = arith.subf %281, %284 : vector<2x8x8xf32>
    %286 = math.exp %285 : vector<2x8x8xf32>
    %cst_138 = arith.constant dense<0.000000e+00> : vector<2x8xf32>
    %287 = vector.multi_reduction <add>, %286, %cst_138 [2] : vector<2x8x8xf32> to vector<2x8xf32>
    %288 = vector.shape_cast %287 : vector<2x8xf32> to vector<2x8x1xf32>
    %289 = tpu.reciprocal %288 {approx = true} : vector<2x8x1xf32> -> vector<2x8x1xf32>
    %290 = vector.broadcast %289 : vector<2x8x1xf32> to vector<2x8x8xf32>
    %291 = arith.mulf %286, %290 : vector<2x8x8xf32>
    %292 = arith.truncf %291 : vector<2x8x8xf32> to vector<2x8x8xbf16>
    "tpu.trace_start"() <{level = 10 : i32, message = "bqk,bkd->bqd"}> : () -> ()
    %cst_139 = arith.constant dense<0.000000e+00> : vector<2x8x16xf32>
    %293 = tpu.matmul %292, %274, %cst_139 {dimension_numbers = #tpu.dot_dimension_numbers<[2], [1], [1], [2], [0, 0, 0, 1, 1, 2], [0], [0]>} : vector<2x8x8xbf16>, vector<2x8x16xbf16>, vector<2x8x16xf32> -> vector<2x8x16xf32>
    "tpu.trace_stop"() : () -> ()
    %294 = vector.extract_strided_slice %266 {offsets = [0, 0, 16], sizes = [2, 8, 16], strides = [1, 1, 1]} : vector<2x8x32xf32> to vector<2x8x16xf32>
    %295 = arith.truncf %294 : vector<2x8x16xf32> to vector<2x8x16xbf16>
    %296 = vector.extract_strided_slice %267 {offsets = [0, 0, 16], sizes = [2, 8, 16], strides = [1, 1, 1]} : vector<2x8x32xf32> to vector<2x8x16xf32>
    %297 = arith.truncf %296 : vector<2x8x16xf32> to vector<2x8x16xbf16>
    %298 = vector.extract_strided_slice %268 {offsets = [0, 0, 16], sizes = [2, 8, 16], strides = [1, 1, 1]} : vector<2x8x32xf32> to vector<2x8x16xf32>
    %299 = arith.truncf %298 : vector<2x8x16xf32> to vector<2x8x16xbf16>
    "tpu.trace_start"() <{level = 10 : i32, message = "bqd,bkd->bqk"}> : () -> ()
    %cst_140 = arith.constant dense<0.000000e+00> : vector<2x8x8xf32>
    %300 = tpu.matmul %295, %297, %cst_140 {dimension_numbers = #tpu.dot_dimension_numbers<[2], [2], [1], [1], [0, 0, 0, 1, 1, 1], [0], [0]>} : vector<2x8x16xbf16>, vector<2x8x16xbf16>, vector<2x8x8xf32> -> vector<2x8x8xf32>
    "tpu.trace_stop"() : () -> ()
    %cst_141 = arith.constant 2.500000e-01 : f32
    %301 = vector.broadcast %cst_141 : f32 to vector<2x8x8xf32>
    %302 = arith.mulf %300, %301 : vector<2x8x8xf32>
    %cst_142 = arith.constant 0.000000e+00 : f32
    %303 = vector.broadcast %cst_142 : f32 to vector<2x8x8xf32>
    %304 = arith.cmpf ogt, %237, %303 : vector<2x8x8xf32>
    %cst_143 = arith.constant -1.000000e+30 : f32
    %305 = vector.broadcast %cst_143 : f32 to vector<2x8x8xf32>
    %306 = arith.select %304, %305, %302 : vector<2x8x8xi1>, vector<2x8x8xf32>
    %cst_144 = arith.constant dense<0xFF800000> : vector<2x8xf32>
    %307 = vector.multi_reduction <maximumf>, %306, %cst_144 [2] : vector<2x8x8xf32> to vector<2x8xf32>
    %308 = vector.shape_cast %307 : vector<2x8xf32> to vector<2x8x1xf32>
    %309 = vector.broadcast %308 : vector<2x8x1xf32> to vector<2x8x8xf32>
    %310 = arith.subf %306, %309 : vector<2x8x8xf32>
    %311 = math.exp %310 : vector<2x8x8xf32>
    %cst_145 = arith.constant dense<0.000000e+00> : vector<2x8xf32>
    %312 = vector.multi_reduction <add>, %311, %cst_145 [2] : vector<2x8x8xf32> to vector<2x8xf32>
    %313 = vector.shape_cast %312 : vector<2x8xf32> to vector<2x8x1xf32>
    %314 = tpu.reciprocal %313 {approx = true} : vector<2x8x1xf32> -> vector<2x8x1xf32>
    %315 = vector.broadcast %314 : vector<2x8x1xf32> to vector<2x8x8xf32>
    %316 = arith.mulf %311, %315 : vector<2x8x8xf32>
    %317 = arith.truncf %316 : vector<2x8x8xf32> to vector<2x8x8xbf16>
    "tpu.trace_start"() <{level = 10 : i32, message = "bqk,bkd->bqd"}> : () -> ()
    %cst_146 = arith.constant dense<0.000000e+00> : vector<2x8x16xf32>
    %318 = tpu.matmul %317, %299, %cst_146 {dimension_numbers = #tpu.dot_dimension_numbers<[2], [1], [1], [2], [0, 0, 0, 1, 1, 2], [0], [0]>} : vector<2x8x8xbf16>, vector<2x8x16xbf16>, vector<2x8x16xf32> -> vector<2x8x16xf32>
    "tpu.trace_stop"() : () -> ()
    %319 = tpu.concatenate %293, %318 in 2 : vector<2x8x16xf32>, vector<2x8x16xf32> -> vector<2x8x32xf32>
    %320 = vector.shape_cast %319 : vector<2x8x32xf32> to vector<16x32xf32>
    %321 = arith.truncf %320 : vector<16x32xf32> to vector<16x32xbf16>
    %cst_147 = arith.constant dense<0.000000e+00> : vector<16x32xf32>
    %322 = tpu.matmul %321, %243, %cst_147 {dimension_numbers = #tpu.dot_dimension_numbers<[1], [0], [0], [1], [0, 0, 1, 1], [], []>} : vector<16x32xbf16>, vector<32x32xbf16>, vector<16x32xf32> -> vector<16x32xf32>
    %323 = vector.broadcast %245 : vector<1x32xf32> to vector<16x32xf32>
    %324 = arith.addf %322, %323 : vector<16x32xf32>
    %325 = vector.shape_cast %236 : vector<2x8x32xf32> to vector<16x32xf32>
    %326 = arith.addf %324, %325 : vector<16x32xf32>
    %cst_148 = arith.constant dense<0.000000e+00> : vector<16xf32>
    %327 = vector.multi_reduction <add>, %326, %cst_148 [1] : vector<16x32xf32> to vector<16xf32>
    %328 = vector.shape_cast %327 : vector<16xf32> to vector<16x1xf32>
    %cst_149 = arith.constant 3.200000e+01 : f32
    %329 = vector.broadcast %cst_149 : f32 to vector<16x1xf32>
    %330 = arith.divf %328, %329 : vector<16x1xf32>
    %331 = vector.broadcast %330 : vector<16x1xf32> to vector<16x32xf32>
    %332 = arith.subf %326, %331 : vector<16x32xf32>
    %333 = arith.mulf %332, %332 : vector<16x32xf32>
    %cst_150 = arith.constant dense<0.000000e+00> : vector<16xf32>
    %334 = vector.multi_reduction <add>, %333, %cst_150 [1] : vector<16x32xf32> to vector<16xf32>
    %335 = vector.shape_cast %334 : vector<16xf32> to vector<16x1xf32>
    %cst_151 = arith.constant 3.200000e+01 : f32
    %336 = vector.broadcast %cst_151 : f32 to vector<16x1xf32>
    %337 = arith.divf %335, %336 : vector<16x1xf32>
    %338 = vector.broadcast %330 : vector<16x1xf32> to vector<16x32xf32>
    %339 = arith.subf %326, %338 : vector<16x32xf32>
    %cst_152 = arith.constant 9.99999974E-6 : f32
    %340 = vector.broadcast %cst_152 : f32 to vector<16x1xf32>
    %341 = arith.addf %337, %340 : vector<16x1xf32>
    %342 = math.rsqrt %341 : vector<16x1xf32>
    %343 = vector.broadcast %342 : vector<16x1xf32> to vector<16x32xf32>
    %344 = arith.mulf %339, %343 : vector<16x32xf32>
    %345 = vector.broadcast %247 : vector<1x32xf32> to vector<16x32xf32>
    %346 = arith.mulf %344, %345 : vector<16x32xf32>
    %347 = vector.broadcast %249 : vector<1x32xf32> to vector<16x32xf32>
    %348 = arith.addf %346, %347 : vector<16x32xf32>
    %349 = vector.shape_cast %348 : vector<16x32xf32> to vector<2x8x32xf32>
    %c0_153 = arith.constant 0 : index
    %c0_154 = arith.constant 0 : index
    %c0_155 = arith.constant 0 : index
    %350 = vector.load %arg12[%c0_153, %c0_154, %c0_155] : memref<1x32x64xbf16, #tpu.memory_space<vmem>>, vector<1x32x64xbf16>
    %351 = vector.shape_cast %350 : vector<1x32x64xbf16> to vector<32x64xbf16>
    %c0_156 = arith.constant 0 : index
    %c0_157 = arith.constant 0 : index
    %c0_158 = arith.constant 0 : index
    %352 = vector.load %arg13[%c0_156, %c0_157, %c0_158] : memref<1x1x64xf32, #tpu.memory_space<vmem>>, vector<1x1x64xf32>
    %353 = vector.shape_cast %352 : vector<1x1x64xf32> to vector<1x64xf32>
    %c0_159 = arith.constant 0 : index
    %c0_160 = arith.constant 0 : index
    %c0_161 = arith.constant 0 : index
    %354 = vector.load %arg14[%c0_159, %c0_160, %c0_161] : memref<1x64x32xbf16, #tpu.memory_space<vmem>>, vector<1x64x32xbf16>
    %355 = vector.shape_cast %354 : vector<1x64x32xbf16> to vector<64x32xbf16>
    %c0_162 = arith.constant 0 : index
    %c0_163 = arith.constant 0 : index
    %c0_164 = arith.constant 0 : index
    %356 = vector.load %arg15[%c0_162, %c0_163, %c0_164] : memref<1x1x32xf32, #tpu.memory_space<vmem>>, vector<1x1x32xf32>
    %357 = vector.shape_cast %356 : vector<1x1x32xf32> to vector<1x32xf32>
    %c0_165 = arith.constant 0 : index
    %c0_166 = arith.constant 0 : index
    %c0_167 = arith.constant 0 : index
    %358 = vector.load %arg16[%c0_165, %c0_166, %c0_167] : memref<1x1x32xf32, #tpu.memory_space<vmem>>, vector<1x1x32xf32>
    %359 = vector.shape_cast %358 : vector<1x1x32xf32> to vector<1x32xf32>
    %c0_168 = arith.constant 0 : index
    %c0_169 = arith.constant 0 : index
    %c0_170 = arith.constant 0 : index
    %360 = vector.load %arg17[%c0_168, %c0_169, %c0_170] : memref<1x1x32xf32, #tpu.memory_space<vmem>>, vector<1x1x32xf32>
    %361 = vector.shape_cast %360 : vector<1x1x32xf32> to vector<1x32xf32>
    %362 = vector.shape_cast %349 : vector<2x8x32xf32> to vector<16x32xf32>
    %363 = arith.truncf %362 : vector<16x32xf32> to vector<16x32xbf16>
    %cst_171 = arith.constant dense<0.000000e+00> : vector<16x64xf32>
    %364 = tpu.matmul %363, %351, %cst_171 {dimension_numbers = #tpu.dot_dimension_numbers<[1], [0], [0], [1], [0, 0, 1, 1], [], []>} : vector<16x32xbf16>, vector<32x64xbf16>, vector<16x64xf32> -> vector<16x64xf32>
    %365 = vector.broadcast %353 : vector<1x64xf32> to vector<16x64xf32>
    %366 = arith.addf %364, %365 : vector<16x64xf32>
    %cst_172 = arith.constant 0.000000e+00 : f32
    %367 = vector.broadcast %cst_172 : f32 to vector<16x64xf32>
    %368 = arith.maximumf %366, %367 : vector<16x64xf32>
    %369 = arith.truncf %368 : vector<16x64xf32> to vector<16x64xbf16>
    %cst_173 = arith.constant dense<0.000000e+00> : vector<16x32xf32>
    %370 = tpu.matmul %369, %355, %cst_173 {dimension_numbers = #tpu.dot_dimension_numbers<[1], [0], [0], [1], [0, 0, 1, 1], [], []>} : vector<16x64xbf16>, vector<64x32xbf16>, vector<16x32xf32> -> vector<16x32xf32>
    %371 = vector.broadcast %357 : vector<1x32xf32> to vector<16x32xf32>
    %372 = arith.addf %370, %371 : vector<16x32xf32>
    %373 = arith.addf %372, %362 : vector<16x32xf32>
    %cst_174 = arith.constant dense<0.000000e+00> : vector<16xf32>
    %374 = vector.multi_reduction <add>, %373, %cst_174 [1] : vector<16x32xf32> to vector<16xf32>
    %375 = vector.shape_cast %374 : vector<16xf32> to vector<16x1xf32>
    %cst_175 = arith.constant 3.200000e+01 : f32
    %376 = vector.broadcast %cst_175 : f32 to vector<16x1xf32>
    %377 = arith.divf %375, %376 : vector<16x1xf32>
    %378 = vector.broadcast %377 : vector<16x1xf32> to vector<16x32xf32>
    %379 = arith.subf %373, %378 : vector<16x32xf32>
    %380 = arith.mulf %379, %379 : vector<16x32xf32>
    %cst_176 = arith.constant dense<0.000000e+00> : vector<16xf32>
    %381 = vector.multi_reduction <add>, %380, %cst_176 [1] : vector<16x32xf32> to vector<16xf32>
    %382 = vector.shape_cast %381 : vector<16xf32> to vector<16x1xf32>
    %cst_177 = arith.constant 3.200000e+01 : f32
    %383 = vector.broadcast %cst_177 : f32 to vector<16x1xf32>
    %384 = arith.divf %382, %383 : vector<16x1xf32>
    %385 = vector.broadcast %377 : vector<16x1xf32> to vector<16x32xf32>
    %386 = arith.subf %373, %385 : vector<16x32xf32>
    %cst_178 = arith.constant 9.99999974E-6 : f32
    %387 = vector.broadcast %cst_178 : f32 to vector<16x1xf32>
    %388 = arith.addf %384, %387 : vector<16x1xf32>
    %389 = math.rsqrt %388 : vector<16x1xf32>
    %390 = vector.broadcast %389 : vector<16x1xf32> to vector<16x32xf32>
    %391 = arith.mulf %386, %390 : vector<16x32xf32>
    %392 = vector.broadcast %359 : vector<1x32xf32> to vector<16x32xf32>
    %393 = arith.mulf %391, %392 : vector<16x32xf32>
    %394 = vector.broadcast %361 : vector<1x32xf32> to vector<16x32xf32>
    %395 = arith.addf %393, %394 : vector<16x32xf32>
    %396 = vector.shape_cast %395 : vector<16x32xf32> to vector<2x8x32xf32>
    %c0_179 = arith.constant 0 : index
    %c0_180 = arith.constant 0 : index
    %c0_181 = arith.constant 0 : index
    %397 = vector.load %arg23[%c0_179, %c0_180, %c0_181] : memref<2x8x32xf32, #tpu.memory_space<vmem>>, vector<2x8x32xf32>
    tpu.vector_store %arg23[%c0_179, %c0_180, %c0_181], %396 {strides = array<i32>} : memref<2x8x32xf32, #tpu.memory_space<vmem>>, vector<2x8x32xf32>,
    %398 = tpu.concatenate %36, %151 in 2 : vector<2x8x64xf32>, vector<2x8x64xf32> -> vector<2x8x128xf32>
    %c0_182 = arith.constant 0 : index
    %c0_183 = arith.constant 0 : index
    %c0_184 = arith.constant 0 : index
    %c0_185 = arith.constant 0 : index
    %399 = vector.load %arg20[%c0_182, %c0_183, %c0_184, %c0_185] : memref<1x2x8x128xf32, #tpu.memory_space<vmem>>, vector<1x2x8x128xf32>
    %400 = vector.shape_cast %399 : vector<1x2x8x128xf32> to vector<2x8x128xf32>
    %401 = vector.shape_cast %398 : vector<2x8x128xf32> to vector<1x2x8x128xf32>
    tpu.vector_store %arg20[%c0_182, %c0_183, %c0_184, %c0_185], %401 {strides = array<i32>} : memref<1x2x8x128xf32, #tpu.memory_space<vmem>>, vector<1x2x8x128xf32>,
    %c0_186 = arith.constant 0 : index
    %c0_187 = arith.constant 0 : index
    %c0_188 = arith.constant 0 : index
    %c0_189 = arith.constant 0 : index
    %c0_190 = arith.constant 0 : index
    %402 = vector.load %arg21[%c0_186, %c0_187, %c0_188, %c0_189, %c0_190] : memref<1x2x2x8x8xf32, #tpu.memory_space<vmem>>, vector<1x1x2x8x8xf32>
    %403 = vector.shape_cast %402 : vector<1x1x2x8x8xf32> to vector<2x8x8xf32>
    %404 = vector.shape_cast %62 : vector<2x8x8xf32> to vector<1x1x2x8x8xf32>
    tpu.vector_store %arg21[%c0_186, %c0_187, %c0_188, %c0_189, %c0_190], %404 {strides = array<i32>} : memref<1x2x2x8x8xf32, #tpu.memory_space<vmem>>, vector<1x1x2x8x8xf32>,
    %c0_191 = arith.constant 0 : index
    %c0_192 = arith.constant 0 : index
    %c0_193 = arith.constant 0 : index
    %c0_194 = arith.constant 0 : index
    %c0_195 = arith.constant 0 : index
    %405 = vector.load %arg22[%c0_191, %c0_192, %c0_193, %c0_194, %c0_195] : memref<1x2x2x8x8xf32, #tpu.memory_space<vmem>>, vector<1x1x2x8x8xf32>
    %406 = vector.shape_cast %405 : vector<1x1x2x8x8xf32> to vector<2x8x8xf32>
    %407 = vector.shape_cast %291 : vector<2x8x8xf32> to vector<1x1x2x8x8xf32>
    tpu.vector_store %arg22[%c0_191, %c0_192, %c0_193, %c0_194, %c0_195], %407 {strides = array<i32>} : memref<1x2x2x8x8xf32, #tpu.memory_space<vmem>>, vector<1x1x2x8x8xf32>,
    %c0_196 = arith.constant 0 : index
    %c1_197 = arith.constant 1 : index
    %c0_198 = arith.constant 0 : index
    %c0_199 = arith.constant 0 : index
    %c0_200 = arith.constant 0 : index
    %408 = vector.load %arg21[%c0_196, %c1_197, %c0_198, %c0_199, %c0_200] : memref<1x2x2x8x8xf32, #tpu.memory_space<vmem>>, vector<1x1x2x8x8xf32>
    %409 = vector.shape_cast %408 : vector<1x1x2x8x8xf32> to vector<2x8x8xf32>
    %410 = vector.shape_cast %87 : vector<2x8x8xf32> to vector<1x1x2x8x8xf32>
    tpu.vector_store %arg21[%c0_196, %c1_197, %c0_198, %c0_199, %c0_200], %410 {strides = array<i32>} : memref<1x2x2x8x8xf32, #tpu.memory_space<vmem>>, vector<1x1x2x8x8xf32>,
    %c0_201 = arith.constant 0 : index
    %c1_202 = arith.constant 1 : index
    %c0_203 = arith.constant 0 : index
    %c0_204 = arith.constant 0 : index
    %c0_205 = arith.constant 0 : index
    %411 = vector.load %arg22[%c0_201, %c1_202, %c0_203, %c0_204, %c0_205] : memref<1x2x2x8x8xf32, #tpu.memory_space<vmem>>, vector<1x1x2x8x8xf32>
    %412 = vector.shape_cast %411 : vector<1x1x2x8x8xf32> to vector<2x8x8xf32>
    %413 = vector.shape_cast %316 : vector<2x8x8xf32> to vector<1x1x2x8x8xf32>
    tpu.vector_store %arg22[%c0_201, %c1_202, %c0_203, %c0_204, %c0_205], %413 {strides = array<i32>} : memref<1x2x2x8x8xf32, #tpu.memory_space<vmem>>, vector<1x1x2x8x8xf32>,
    %c1_i32 = arith.constant 1 : i32
    %414 = arith.cmpi eq, %arg0, %c1_i32 : i32
    %415 = arith.extui %414 : i1 to i32
    %c0_i32_206 = arith.constant 0 : i32
    %416 = arith.cmpi ne, %415, %c0_i32_206 : i32
    scf.if %416 {
      %417 = vector.shape_cast %396 : vector<2x8x32xf32> to vector<16x32xf32>
      %418 = arith.truncf %417 : vector<16x32xf32> to vector<16x32xbf16>
      %c0_207 = arith.constant 0 : index
      %c0_208 = arith.constant 0 : index
      %419 = vector.load %arg18[%c0_207, %c0_208] : memref<32x128xbf16, #tpu.memory_space<vmem>>, vector<32x128xbf16>
      %cst_209 = arith.constant dense<0.000000e+00> : vector<16x128xf32>
      %420 = tpu.matmul %418, %419, %cst_209 {dimension_numbers = #tpu.dot_dimension_numbers<[1], [0], [0], [1], [0, 0, 1, 1], [], []>} : vector<16x32xbf16>, vector<32x128xbf16>, vector<16x128xf32> -> vector<16x128xf32>
      %421 = vector.shape_cast %420 : vector<16x128xf32> to vector<2x8x128xf32>
      %c0_210 = arith.constant 0 : index
      %c0_211 = arith.constant 0 : index
      %c0_212 = arith.constant 0 : index
      %422 = vector.load %arg19[%c0_210, %c0_211, %c0_212] : memref<2x8x128xf32, #tpu.memory_space<vmem>>, vector<2x8x128xf32>
      tpu.vector_store %arg19[%c0_210, %c0_211, %c0_212], %421 {strides = array<i32>} : memref<2x8x128xf32, #tpu.memory_space<vmem>>, vector<2x8x128xf32>,
    } else {
    }
    return
  }
  func.func @transform_0(%arg0: i32) -> (i32, i32, i32) {
    %c0_i32 = arith.constant 0 : i32
    %c0_i32_0 = arith.constant 0 : i32
    %c0_i32_1 = arith.constant 0 : i32
    %c0_i32_2 = arith.constant 0 : i32
    return %c0_i32, %c0_i32_0, %c0_i32_1 : i32, i32, i32
  }
  func.func @transform_1(%arg0: i32) -> (i32, i32, i32) {
    %c0_i32 = arith.constant 0 : i32
    %c0_i32_0 = arith.constant 0 : i32
    %c0_i32_1 = arith.constant 0 : i32
    %c0_i32_2 = arith.constant 0 : i32
    return %c0_i32, %c0_i32_0, %c0_i32_1 : i32, i32, i32
  }
  func.func @transform_2(%arg0: i32) -> (i32, i32, i32) {
    %c0_i32 = arith.constant 0 : i32
    %c0_i32_0 = arith.constant 0 : i32
    %c0_i32_1 = arith.constant 0 : i32
    %c0_i32_2 = arith.constant 0 : i32
    return %c0_i32, %c0_i32_0, %c0_i32_1 : i32, i32, i32
  }
  func.func @transform_3(%arg0: i32) -> (i32, i32, i32) {
    %c0_i32 = arith.constant 0 : i32
    %c0_i32_0 = arith.constant 0 : i32
    %c0_i32_1 = arith.constant 0 : i32
    %c0_i32_2 = arith.constant 0 : i32
    return %c0_i32, %c0_i32_0, %c0_i32_1 : i32, i32, i32
  }
  func.func @transform_4(%arg0: i32) -> (i32, i32, i32) {
    %c0_i32 = arith.constant 0 : i32
    %c0_i32_0 = arith.constant 0 : i32
    %c0_i32_1 = arith.constant 0 : i32
    %c0_i32_2 = arith.constant 0 : i32
    return %c0_i32, %c0_i32_0, %c0_i32_1 : i32, i32, i32
  }
  func.func @transform_5(%arg0: i32) -> (i32, i32, i32, i32) {
    %c0_i32 = arith.constant 0 : i32
    %c0_i32_0 = arith.constant 0 : i32
    %c0_i32_1 = arith.constant 0 : i32
    %c0_i32_2 = arith.constant 0 : i32
    return %arg0, %c0_i32, %c0_i32_0, %c0_i32_1 : i32, i32, i32, i32
  }
  func.func @transform_6(%arg0: i32) -> (i32, i32, i32, i32) {
    %c0_i32 = arith.constant 0 : i32
    %c0_i32_0 = arith.constant 0 : i32
    %c0_i32_1 = arith.constant 0 : i32
    %c0_i32_2 = arith.constant 0 : i32
    return %arg0, %c0_i32, %c0_i32_0, %c0_i32_1 : i32, i32, i32, i32
  }
  func.func @transform_7(%arg0: i32) -> (i32, i32, i32, i32) {
    %c0_i32 = arith.constant 0 : i32
    %c0_i32_0 = arith.constant 0 : i32
    %c0_i32_1 = arith.constant 0 : i32
    %c0_i32_2 = arith.constant 0 : i32
    return %arg0, %c0_i32, %c0_i32_0, %c0_i32_1 : i32, i32, i32, i32
  }
  func.func @transform_8(%arg0: i32) -> (i32, i32, i32, i32) {
    %c0_i32 = arith.constant 0 : i32
    %c0_i32_0 = arith.constant 0 : i32
    %c0_i32_1 = arith.constant 0 : i32
    %c0_i32_2 = arith.constant 0 : i32
    return %arg0, %c0_i32, %c0_i32_0, %c0_i32_1 : i32, i32, i32, i32
  }
  func.func @transform_9(%arg0: i32) -> (i32, i32, i32, i32) {
    %c0_i32 = arith.constant 0 : i32
    %c0_i32_0 = arith.constant 0 : i32
    %c0_i32_1 = arith.constant 0 : i32
    %c0_i32_2 = arith.constant 0 : i32
    return %arg0, %c0_i32, %c0_i32_0, %c0_i32_1 : i32, i32, i32, i32
  }
  func.func @transform_10(%arg0: i32) -> (i32, i32, i32, i32) {
    %c0_i32 = arith.constant 0 : i32
    %c0_i32_0 = arith.constant 0 : i32
    %c0_i32_1 = arith.constant 0 : i32
    %c0_i32_2 = arith.constant 0 : i32
    return %arg0, %c0_i32, %c0_i32_0, %c0_i32_1 : i32, i32, i32, i32
  }
  func.func @transform_11(%arg0: i32) -> (i32, i32, i32) {
    %c0_i32 = arith.constant 0 : i32
    %c0_i32_0 = arith.constant 0 : i32
    %c0_i32_1 = arith.constant 0 : i32
    return %arg0, %c0_i32, %c0_i32_0 : i32, i32, i32
  }
  func.func @transform_12(%arg0: i32) -> (i32, i32, i32) {
    %c0_i32 = arith.constant 0 : i32
    %c0_i32_0 = arith.constant 0 : i32
    %c0_i32_1 = arith.constant 0 : i32
    return %arg0, %c0_i32, %c0_i32_0 : i32, i32, i32
  }
  func.func @transform_13(%arg0: i32) -> (i32, i32, i32) {
    %c0_i32 = arith.constant 0 : i32
    %c0_i32_0 = arith.constant 0 : i32
    %c0_i32_1 = arith.constant 0 : i32
    return %arg0, %c0_i32, %c0_i32_0 : i32, i32, i32
  }
  func.func @transform_14(%arg0: i32) -> (i32, i32, i32) {
    %c0_i32 = arith.constant 0 : i32
    %c0_i32_0 = arith.constant 0 : i32
    %c0_i32_1 = arith.constant 0 : i32
    return %arg0, %c0_i32, %c0_i32_0 : i32, i32, i32
  }
  func.func @transform_15(%arg0: i32) -> (i32, i32, i32) {
    %c0_i32 = arith.constant 0 : i32
    %c0_i32_0 = arith.constant 0 : i32
    %c0_i32_1 = arith.constant 0 : i32
    return %arg0, %c0_i32, %c0_i32_0 : i32, i32, i32
  }
  func.func @transform_16(%arg0: i32) -> (i32, i32, i32) {
    %c0_i32 = arith.constant 0 : i32
    %c0_i32_0 = arith.constant 0 : i32
    %c0_i32_1 = arith.constant 0 : i32
    return %arg0, %c0_i32, %c0_i32_0 : i32, i32, i32
  }
  func.func @transform_17(%arg0: i32) -> (i32, i32) {
    %c0_i32 = arith.constant 0 : i32
    %c0_i32_0 = arith.constant 0 : i32
    %c0_i32_1 = arith.constant 0 : i32
    return %c0_i32, %c0_i32_0 : i32, i32
  }
  func.func @transform_18(%arg0: i32) -> (i32, i32, i32) {
    %c0_i32 = arith.constant 0 : i32
    %c0_i32_0 = arith.constant 0 : i32
    %c0_i32_1 = arith.constant 0 : i32
    %c0_i32_2 = arith.constant 0 : i32
    return %c0_i32, %c0_i32_0, %c0_i32_1 : i32, i32, i32
  }
  func.func @transform_19(%arg0: i32) -> (i32, i32, i32, i32) {
    %c0_i32 = arith.constant 0 : i32
    %c0_i32_0 = arith.constant 0 : i32
    %c0_i32_1 = arith.constant 0 : i32
    %c0_i32_2 = arith.constant 0 : i32
    return %arg0, %c0_i32, %c0_i32_0, %c0_i32_1 : i32, i32, i32, i32
  }
  func.func @transform_20(%arg0: i32) -> (i32, i32, i32, i32, i32) {
    %c0_i32 = arith.constant 0 : i32
    %c0_i32_0 = arith.constant 0 : i32
    %c0_i32_1 = arith.constant 0 : i32
    %c0_i32_2 = arith.constant 0 : i32
    %c0_i32_3 = arith.constant 0 : i32
    return %arg0, %c0_i32, %c0_i32_0, %c0_i32_1, %c0_i32_2 : i32, i32, i32, i32, i32
  }
  func.func @transform_21(%arg0: i32) -> (i32, i32, i32, i32, i32) {
    %c0_i32 = arith.constant 0 : i32
    %c0_i32_0 = arith.constant 0 : i32
    %c0_i32_1 = arith.constant 0 : i32
    %c0_i32_2 = arith.constant 0 : i32
    %c0_i32_3 = arith.constant 0 : i32
    return %arg0, %c0_i32, %c0_i32_0, %c0_i32_1, %c0_i32_2 : i32, i32, i32, i32, i32
  }
}

module attributes {stable_mosaic.version = 11 : i64} {
  func.func @_encoder_kernel(%arg0: i32, %arg1: memref<2x8x32xf32, #tpu.memory_space<vmem>>, %arg2: memref<2x8x8xf32, #tpu.memory_space<vmem>>, %arg3: memref<1x1x32x96xbf16, #tpu.memory_space<vmem>>, %arg4: memref<1x1x1x96xf32, #tpu.memory_space<vmem>>, %arg5: memref<1x1x32x32xbf16, #tpu.memory_space<vmem>>, %arg6: memref<1x1x1x32xf32, #tpu.memory_space<vmem>>, %arg7: memref<1x1x1x32xf32, #tpu.memory_space<vmem>>, %arg8: memref<1x1x1x32xf32, #tpu.memory_space<vmem>>, %arg9: memref<1x32x64xbf16, #tpu.memory_space<vmem>>, %arg10: memref<1x1x64xf32, #tpu.memory_space<vmem>>, %arg11: memref<1x64x32xbf16, #tpu.memory_space<vmem>>, %arg12: memref<1x1x32xf32, #tpu.memory_space<vmem>>, %arg13: memref<1x1x32xf32, #tpu.memory_space<vmem>>, %arg14: memref<1x1x32xf32, #tpu.memory_space<vmem>>, %arg15: memref<32x128xbf16, #tpu.memory_space<vmem>>, %arg16: memref<1x128xf32, #tpu.memory_space<vmem>>, %arg17: memref<128x32xbf16, #tpu.memory_space<vmem>>, %arg18: memref<1x32xf32, #tpu.memory_space<vmem>>, %arg19: memref<2x8x32xf32, #tpu.memory_space<vmem>>, %arg20: memref<1x2x2x8x8xf32, #tpu.memory_space<vmem>>, %arg21: memref<2x32xf32, #tpu.memory_space<vmem>>, %arg22: memref<2x8x32xf32, #tpu.memory_space<vmem>>) attributes {dimension_semantics = [#tpu.dimension_semantics<arbitrary>], iteration_bounds = array<i64: 2>, scalar_prefetch = 0 : i64, scratch_operands = 1 : i64, tpu.core_type = #tpu.core_type<tc>, window_params = [{pipeline_mode = #tpu.pipeline_mode<synchronous>, transform_indices = @transform_0, window_bounds = array<i64: 2, 8, 32>}, {pipeline_mode = #tpu.pipeline_mode<synchronous>, transform_indices = @transform_1, window_bounds = array<i64: 2, 8, 8>}, {transform_indices = @transform_2, window_bounds = array<i64: 1, 1, 32, 96>}, {transform_indices = @transform_3, window_bounds = array<i64: 1, 1, 1, 96>}, {transform_indices = @transform_4, window_bounds = array<i64: 1, 1, 32, 32>}, {transform_indices = @transform_5, window_bounds = array<i64: 1, 1, 1, 32>}, {transform_indices = @transform_6, window_bounds = array<i64: 1, 1, 1, 32>}, {transform_indices = @transform_7, window_bounds = array<i64: 1, 1, 1, 32>}, {transform_indices = @transform_8, window_bounds = array<i64: 1, 32, 64>}, {transform_indices = @transform_9, window_bounds = array<i64: 1, 1, 64>}, {transform_indices = @transform_10, window_bounds = array<i64: 1, 64, 32>}, {transform_indices = @transform_11, window_bounds = array<i64: 1, 1, 32>}, {transform_indices = @transform_12, window_bounds = array<i64: 1, 1, 32>}, {transform_indices = @transform_13, window_bounds = array<i64: 1, 1, 32>}, {pipeline_mode = #tpu.pipeline_mode<synchronous>, transform_indices = @transform_14, window_bounds = array<i64: 32, 128>}, {pipeline_mode = #tpu.pipeline_mode<synchronous>, transform_indices = @transform_15, window_bounds = array<i64: 1, 128>}, {pipeline_mode = #tpu.pipeline_mode<synchronous>, transform_indices = @transform_16, window_bounds = array<i64: 128, 32>}, {pipeline_mode = #tpu.pipeline_mode<synchronous>, transform_indices = @transform_17, window_bounds = array<i64: 1, 32>}, {pipeline_mode = #tpu.pipeline_mode<synchronous>, transform_indices = @transform_18, window_bounds = array<i64: 2, 8, 32>}, {transform_indices = @transform_19, window_bounds = array<i64: 1, 2, 2, 8, 8>}, {pipeline_mode = #tpu.pipeline_mode<synchronous>, transform_indices = @transform_20, window_bounds = array<i64: 2, 32>}]} {
    %c0_i32 = arith.constant 0 : i32
    %0 = arith.cmpi eq, %arg0, %c0_i32 : i32
    %1 = arith.extui %0 : i1 to i32
    %c0_i32_0 = arith.constant 0 : i32
    %2 = arith.cmpi ne, %1, %c0_i32_0 : i32
    scf.if %2 {
      %c0_93 = arith.constant 0 : index
      %c0_94 = arith.constant 0 : index
      %c0_95 = arith.constant 0 : index
      %175 = vector.load %arg1[%c0_93, %c0_94, %c0_95] : memref<2x8x32xf32, #tpu.memory_space<vmem>>, vector<2x8x32xf32>
      %c0_96 = arith.constant 0 : index
      %c0_97 = arith.constant 0 : index
      %c0_98 = arith.constant 0 : index
      %176 = vector.load %arg22[%c0_96, %c0_97, %c0_98] : memref<2x8x32xf32, #tpu.memory_space<vmem>>, vector<2x8x32xf32>
      tpu.vector_store %arg22[%c0_96, %c0_97, %c0_98], %175 {strides = array<i32>} : memref<2x8x32xf32, #tpu.memory_space<vmem>>, vector<2x8x32xf32>,
    } else {
    }
    %c0 = arith.constant 0 : index
    %c0_1 = arith.constant 0 : index
    %c0_2 = arith.constant 0 : index
    %3 = vector.load %arg22[%c0, %c0_1, %c0_2] : memref<2x8x32xf32, #tpu.memory_space<vmem>>, vector<2x8x32xf32>
    %c0_3 = arith.constant 0 : index
    %c0_4 = arith.constant 0 : index
    %c0_5 = arith.constant 0 : index
    %4 = vector.load %arg2[%c0_3, %c0_4, %c0_5] : memref<2x8x8xf32, #tpu.memory_space<vmem>>, vector<2x8x8xf32>
    %c0_6 = arith.constant 0 : index
    %c0_7 = arith.constant 0 : index
    %c0_8 = arith.constant 0 : index
    %c0_9 = arith.constant 0 : index
    %5 = vector.load %arg3[%c0_6, %c0_7, %c0_8, %c0_9] : memref<1x1x32x96xbf16, #tpu.memory_space<vmem>>, vector<1x1x32x96xbf16>
    %6 = vector.shape_cast %5 : vector<1x1x32x96xbf16> to vector<32x96xbf16>
    %c0_10 = arith.constant 0 : index
    %c0_11 = arith.constant 0 : index
    %c0_12 = arith.constant 0 : index
    %c0_13 = arith.constant 0 : index
    %7 = vector.load %arg4[%c0_10, %c0_11, %c0_12, %c0_13] : memref<1x1x1x96xf32, #tpu.memory_space<vmem>>, vector<1x1x1x96xf32>
    %8 = vector.shape_cast %7 : vector<1x1x1x96xf32> to vector<1x96xf32>
    %c0_14 = arith.constant 0 : index
    %c0_15 = arith.constant 0 : index
    %c0_16 = arith.constant 0 : index
    %c0_17 = arith.constant 0 : index
    %9 = vector.load %arg5[%c0_14, %c0_15, %c0_16, %c0_17] : memref<1x1x32x32xbf16, #tpu.memory_space<vmem>>, vector<1x1x32x32xbf16>
    %10 = vector.shape_cast %9 : vector<1x1x32x32xbf16> to vector<32x32xbf16>
    %c0_18 = arith.constant 0 : index
    %c0_19 = arith.constant 0 : index
    %c0_20 = arith.constant 0 : index
    %c0_21 = arith.constant 0 : index
    %11 = vector.load %arg6[%c0_18, %c0_19, %c0_20, %c0_21] : memref<1x1x1x32xf32, #tpu.memory_space<vmem>>, vector<1x1x1x32xf32>
    %12 = vector.shape_cast %11 : vector<1x1x1x32xf32> to vector<1x32xf32>
    %c0_22 = arith.constant 0 : index
    %c0_23 = arith.constant 0 : index
    %c0_24 = arith.constant 0 : index
    %c0_25 = arith.constant 0 : index
    %13 = vector.load %arg7[%c0_22, %c0_23, %c0_24, %c0_25] : memref<1x1x1x32xf32, #tpu.memory_space<vmem>>, vector<1x1x1x32xf32>
    %14 = vector.shape_cast %13 : vector<1x1x1x32xf32> to vector<1x32xf32>
    %c0_26 = arith.constant 0 : index
    %c0_27 = arith.constant 0 : index
    %c0_28 = arith.constant 0 : index
    %c0_29 = arith.constant 0 : index
    %15 = vector.load %arg8[%c0_26, %c0_27, %c0_28, %c0_29] : memref<1x1x1x32xf32, #tpu.memory_space<vmem>>, vector<1x1x1x32xf32>
    %16 = vector.shape_cast %15 : vector<1x1x1x32xf32> to vector<1x32xf32>
    %17 = vector.shape_cast %3 : vector<2x8x32xf32> to vector<16x32xf32>
    %18 = arith.truncf %17 : vector<16x32xf32> to vector<16x32xbf16>
    %19 = vector.shape_cast %3 : vector<2x8x32xf32> to vector<16x32xf32>
    %20 = arith.truncf %19 : vector<16x32xf32> to vector<16x32xbf16>
    %21 = vector.extract_strided_slice %6 {offsets = [0, 0], sizes = [32, 32], strides = [1, 1]} : vector<32x96xbf16> to vector<32x32xbf16>
    %cst = arith.constant dense<0.000000e+00> : vector<16x32xf32>
    %22 = tpu.matmul %18, %21, %cst {dimension_numbers = #tpu.dot_dimension_numbers<[1], [0], [0], [1], [0, 0, 1, 1], [], []>} : vector<16x32xbf16>, vector<32x32xbf16>, vector<16x32xf32> -> vector<16x32xf32>
    %23 = vector.extract_strided_slice %8 {offsets = [0, 0], sizes = [1, 32], strides = [1, 1]} : vector<1x96xf32> to vector<1x32xf32>
    %24 = vector.broadcast %23 : vector<1x32xf32> to vector<16x32xf32>
    %25 = arith.addf %22, %24 : vector<16x32xf32>
    %26 = vector.extract_strided_slice %6 {offsets = [0, 32], sizes = [32, 64], strides = [1, 1]} : vector<32x96xbf16> to vector<32x64xbf16>
    %cst_30 = arith.constant dense<0.000000e+00> : vector<16x64xf32>
    %27 = tpu.matmul %20, %26, %cst_30 {dimension_numbers = #tpu.dot_dimension_numbers<[1], [0], [0], [1], [0, 0, 1, 1], [], []>} : vector<16x32xbf16>, vector<32x64xbf16>, vector<16x64xf32> -> vector<16x64xf32>
    %28 = vector.extract_strided_slice %8 {offsets = [0, 32], sizes = [1, 64], strides = [1, 1]} : vector<1x96xf32> to vector<1x64xf32>
    %29 = vector.broadcast %28 : vector<1x64xf32> to vector<16x64xf32>
    %30 = arith.addf %27, %29 : vector<16x64xf32>
    %31 = vector.extract_strided_slice %30 {offsets = [0, 0], sizes = [16, 32], strides = [1, 1]} : vector<16x64xf32> to vector<16x32xf32>
    %32 = vector.extract_strided_slice %30 {offsets = [0, 32], sizes = [16, 32], strides = [1, 1]} : vector<16x64xf32> to vector<16x32xf32>
    %33 = vector.shape_cast %25 : vector<16x32xf32> to vector<2x8x32xf32>
    %34 = vector.shape_cast %31 : vector<16x32xf32> to vector<2x8x32xf32>
    %35 = vector.shape_cast %32 : vector<16x32xf32> to vector<2x8x32xf32>
    %36 = vector.extract_strided_slice %33 {offsets = [0, 0, 0], sizes = [2, 8, 16], strides = [1, 1, 1]} : vector<2x8x32xf32> to vector<2x8x16xf32>
    %37 = arith.truncf %36 : vector<2x8x16xf32> to vector<2x8x16xbf16>
    %38 = vector.extract_strided_slice %34 {offsets = [0, 0, 0], sizes = [2, 8, 16], strides = [1, 1, 1]} : vector<2x8x32xf32> to vector<2x8x16xf32>
    %39 = arith.truncf %38 : vector<2x8x16xf32> to vector<2x8x16xbf16>
    %40 = vector.extract_strided_slice %35 {offsets = [0, 0, 0], sizes = [2, 8, 16], strides = [1, 1, 1]} : vector<2x8x32xf32> to vector<2x8x16xf32>
    %41 = arith.truncf %40 : vector<2x8x16xf32> to vector<2x8x16xbf16>
    "tpu.trace_start"() <{level = 10 : i32, message = "bqd,bkd->bqk"}> : () -> ()
    %cst_31 = arith.constant dense<0.000000e+00> : vector<2x8x8xf32>
    %42 = tpu.matmul %37, %39, %cst_31 {dimension_numbers = #tpu.dot_dimension_numbers<[2], [2], [1], [1], [0, 0, 0, 1, 1, 1], [0], [0]>} : vector<2x8x16xbf16>, vector<2x8x16xbf16>, vector<2x8x8xf32> -> vector<2x8x8xf32>
    "tpu.trace_stop"() : () -> ()
    %cst_32 = arith.constant 2.500000e-01 : f32
    %43 = vector.broadcast %cst_32 : f32 to vector<2x8x8xf32>
    %44 = arith.mulf %42, %43 : vector<2x8x8xf32>
    %cst_33 = arith.constant 0.000000e+00 : f32
    %45 = vector.broadcast %cst_33 : f32 to vector<2x8x8xf32>
    %46 = arith.cmpf ogt, %4, %45 : vector<2x8x8xf32>
    %cst_34 = arith.constant -1.000000e+30 : f32
    %47 = vector.broadcast %cst_34 : f32 to vector<2x8x8xf32>
    %48 = arith.select %46, %47, %44 : vector<2x8x8xi1>, vector<2x8x8xf32>
    %cst_35 = arith.constant dense<0xFF800000> : vector<2x8xf32>
    %49 = vector.multi_reduction <maximumf>, %48, %cst_35 [2] : vector<2x8x8xf32> to vector<2x8xf32>
    %50 = vector.shape_cast %49 : vector<2x8xf32> to vector<2x8x1xf32>
    %51 = vector.broadcast %50 : vector<2x8x1xf32> to vector<2x8x8xf32>
    %52 = arith.subf %48, %51 : vector<2x8x8xf32>
    %53 = math.exp %52 : vector<2x8x8xf32>
    %cst_36 = arith.constant dense<0.000000e+00> : vector<2x8xf32>
    %54 = vector.multi_reduction <add>, %53, %cst_36 [2] : vector<2x8x8xf32> to vector<2x8xf32>
    %55 = vector.shape_cast %54 : vector<2x8xf32> to vector<2x8x1xf32>
    %56 = tpu.reciprocal %55 {approx = true} : vector<2x8x1xf32> -> vector<2x8x1xf32>
    %57 = vector.broadcast %56 : vector<2x8x1xf32> to vector<2x8x8xf32>
    %58 = arith.mulf %53, %57 : vector<2x8x8xf32>
    %59 = arith.truncf %58 : vector<2x8x8xf32> to vector<2x8x8xbf16>
    "tpu.trace_start"() <{level = 10 : i32, message = "bqk,bkd->bqd"}> : () -> ()
    %cst_37 = arith.constant dense<0.000000e+00> : vector<2x8x16xf32>
    %60 = tpu.matmul %59, %41, %cst_37 {dimension_numbers = #tpu.dot_dimension_numbers<[2], [1], [1], [2], [0, 0, 0, 1, 1, 2], [0], [0]>} : vector<2x8x8xbf16>, vector<2x8x16xbf16>, vector<2x8x16xf32> -> vector<2x8x16xf32>
    "tpu.trace_stop"() : () -> ()
    %61 = vector.extract_strided_slice %33 {offsets = [0, 0, 16], sizes = [2, 8, 16], strides = [1, 1, 1]} : vector<2x8x32xf32> to vector<2x8x16xf32>
    %62 = arith.truncf %61 : vector<2x8x16xf32> to vector<2x8x16xbf16>
    %63 = vector.extract_strided_slice %34 {offsets = [0, 0, 16], sizes = [2, 8, 16], strides = [1, 1, 1]} : vector<2x8x32xf32> to vector<2x8x16xf32>
    %64 = arith.truncf %63 : vector<2x8x16xf32> to vector<2x8x16xbf16>
    %65 = vector.extract_strided_slice %35 {offsets = [0, 0, 16], sizes = [2, 8, 16], strides = [1, 1, 1]} : vector<2x8x32xf32> to vector<2x8x16xf32>
    %66 = arith.truncf %65 : vector<2x8x16xf32> to vector<2x8x16xbf16>
    "tpu.trace_start"() <{level = 10 : i32, message = "bqd,bkd->bqk"}> : () -> ()
    %cst_38 = arith.constant dense<0.000000e+00> : vector<2x8x8xf32>
    %67 = tpu.matmul %62, %64, %cst_38 {dimension_numbers = #tpu.dot_dimension_numbers<[2], [2], [1], [1], [0, 0, 0, 1, 1, 1], [0], [0]>} : vector<2x8x16xbf16>, vector<2x8x16xbf16>, vector<2x8x8xf32> -> vector<2x8x8xf32>
    "tpu.trace_stop"() : () -> ()
    %cst_39 = arith.constant 2.500000e-01 : f32
    %68 = vector.broadcast %cst_39 : f32 to vector<2x8x8xf32>
    %69 = arith.mulf %67, %68 : vector<2x8x8xf32>
    %cst_40 = arith.constant 0.000000e+00 : f32
    %70 = vector.broadcast %cst_40 : f32 to vector<2x8x8xf32>
    %71 = arith.cmpf ogt, %4, %70 : vector<2x8x8xf32>
    %cst_41 = arith.constant -1.000000e+30 : f32
    %72 = vector.broadcast %cst_41 : f32 to vector<2x8x8xf32>
    %73 = arith.select %71, %72, %69 : vector<2x8x8xi1>, vector<2x8x8xf32>
    %cst_42 = arith.constant dense<0xFF800000> : vector<2x8xf32>
    %74 = vector.multi_reduction <maximumf>, %73, %cst_42 [2] : vector<2x8x8xf32> to vector<2x8xf32>
    %75 = vector.shape_cast %74 : vector<2x8xf32> to vector<2x8x1xf32>
    %76 = vector.broadcast %75 : vector<2x8x1xf32> to vector<2x8x8xf32>
    %77 = arith.subf %73, %76 : vector<2x8x8xf32>
    %78 = math.exp %77 : vector<2x8x8xf32>
    %cst_43 = arith.constant dense<0.000000e+00> : vector<2x8xf32>
    %79 = vector.multi_reduction <add>, %78, %cst_43 [2] : vector<2x8x8xf32> to vector<2x8xf32>
    %80 = vector.shape_cast %79 : vector<2x8xf32> to vector<2x8x1xf32>
    %81 = tpu.reciprocal %80 {approx = true} : vector<2x8x1xf32> -> vector<2x8x1xf32>
    %82 = vector.broadcast %81 : vector<2x8x1xf32> to vector<2x8x8xf32>
    %83 = arith.mulf %78, %82 : vector<2x8x8xf32>
    %84 = arith.truncf %83 : vector<2x8x8xf32> to vector<2x8x8xbf16>
    "tpu.trace_start"() <{level = 10 : i32, message = "bqk,bkd->bqd"}> : () -> ()
    %cst_44 = arith.constant dense<0.000000e+00> : vector<2x8x16xf32>
    %85 = tpu.matmul %84, %66, %cst_44 {dimension_numbers = #tpu.dot_dimension_numbers<[2], [1], [1], [2], [0, 0, 0, 1, 1, 2], [0], [0]>} : vector<2x8x8xbf16>, vector<2x8x16xbf16>, vector<2x8x16xf32> -> vector<2x8x16xf32>
    "tpu.trace_stop"() : () -> ()
    %86 = tpu.concatenate %60, %85 in 2 : vector<2x8x16xf32>, vector<2x8x16xf32> -> vector<2x8x32xf32>
    %87 = vector.shape_cast %86 : vector<2x8x32xf32> to vector<16x32xf32>
    %88 = arith.truncf %87 : vector<16x32xf32> to vector<16x32xbf16>
    %cst_45 = arith.constant dense<0.000000e+00> : vector<16x32xf32>
    %89 = tpu.matmul %88, %10, %cst_45 {dimension_numbers = #tpu.dot_dimension_numbers<[1], [0], [0], [1], [0, 0, 1, 1], [], []>} : vector<16x32xbf16>, vector<32x32xbf16>, vector<16x32xf32> -> vector<16x32xf32>
    %90 = vector.broadcast %12 : vector<1x32xf32> to vector<16x32xf32>
    %91 = arith.addf %89, %90 : vector<16x32xf32>
    %92 = vector.shape_cast %3 : vector<2x8x32xf32> to vector<16x32xf32>
    %93 = arith.addf %91, %92 : vector<16x32xf32>
    %cst_46 = arith.constant dense<0.000000e+00> : vector<16xf32>
    %94 = vector.multi_reduction <add>, %93, %cst_46 [1] : vector<16x32xf32> to vector<16xf32>
    %95 = vector.shape_cast %94 : vector<16xf32> to vector<16x1xf32>
    %cst_47 = arith.constant 3.200000e+01 : f32
    %96 = vector.broadcast %cst_47 : f32 to vector<16x1xf32>
    %97 = arith.divf %95, %96 : vector<16x1xf32>
    %98 = vector.broadcast %97 : vector<16x1xf32> to vector<16x32xf32>
    %99 = arith.subf %93, %98 : vector<16x32xf32>
    %100 = arith.mulf %99, %99 : vector<16x32xf32>
    %cst_48 = arith.constant dense<0.000000e+00> : vector<16xf32>
    %101 = vector.multi_reduction <add>, %100, %cst_48 [1] : vector<16x32xf32> to vector<16xf32>
    %102 = vector.shape_cast %101 : vector<16xf32> to vector<16x1xf32>
    %cst_49 = arith.constant 3.200000e+01 : f32
    %103 = vector.broadcast %cst_49 : f32 to vector<16x1xf32>
    %104 = arith.divf %102, %103 : vector<16x1xf32>
    %105 = vector.broadcast %97 : vector<16x1xf32> to vector<16x32xf32>
    %106 = arith.subf %93, %105 : vector<16x32xf32>
    %cst_50 = arith.constant 9.99999974E-6 : f32
    %107 = vector.broadcast %cst_50 : f32 to vector<16x1xf32>
    %108 = arith.addf %104, %107 : vector<16x1xf32>
    %109 = math.rsqrt %108 : vector<16x1xf32>
    %110 = vector.broadcast %109 : vector<16x1xf32> to vector<16x32xf32>
    %111 = arith.mulf %106, %110 : vector<16x32xf32>
    %112 = vector.broadcast %14 : vector<1x32xf32> to vector<16x32xf32>
    %113 = arith.mulf %111, %112 : vector<16x32xf32>
    %114 = vector.broadcast %16 : vector<1x32xf32> to vector<16x32xf32>
    %115 = arith.addf %113, %114 : vector<16x32xf32>
    %116 = vector.shape_cast %115 : vector<16x32xf32> to vector<2x8x32xf32>
    %c0_51 = arith.constant 0 : index
    %c0_52 = arith.constant 0 : index
    %c0_53 = arith.constant 0 : index
    %c0_54 = arith.constant 0 : index
    %c0_55 = arith.constant 0 : index
    %117 = vector.load %arg20[%c0_51, %c0_52, %c0_53, %c0_54, %c0_55] : memref<1x2x2x8x8xf32, #tpu.memory_space<vmem>>, vector<1x1x2x8x8xf32>
    %118 = vector.shape_cast %117 : vector<1x1x2x8x8xf32> to vector<2x8x8xf32>
    %119 = vector.shape_cast %58 : vector<2x8x8xf32> to vector<1x1x2x8x8xf32>
    tpu.vector_store %arg20[%c0_51, %c0_52, %c0_53, %c0_54, %c0_55], %119 {strides = array<i32>} : memref<1x2x2x8x8xf32, #tpu.memory_space<vmem>>, vector<1x1x2x8x8xf32>,
    %c0_56 = arith.constant 0 : index
    %c1 = arith.constant 1 : index
    %c0_57 = arith.constant 0 : index
    %c0_58 = arith.constant 0 : index
    %c0_59 = arith.constant 0 : index
    %120 = vector.load %arg20[%c0_56, %c1, %c0_57, %c0_58, %c0_59] : memref<1x2x2x8x8xf32, #tpu.memory_space<vmem>>, vector<1x1x2x8x8xf32>
    %121 = vector.shape_cast %120 : vector<1x1x2x8x8xf32> to vector<2x8x8xf32>
    %122 = vector.shape_cast %83 : vector<2x8x8xf32> to vector<1x1x2x8x8xf32>
    tpu.vector_store %arg20[%c0_56, %c1, %c0_57, %c0_58, %c0_59], %122 {strides = array<i32>} : memref<1x2x2x8x8xf32, #tpu.memory_space<vmem>>, vector<1x1x2x8x8xf32>,
    %c0_60 = arith.constant 0 : index
    %c0_61 = arith.constant 0 : index
    %c0_62 = arith.constant 0 : index
    %123 = vector.load %arg9[%c0_60, %c0_61, %c0_62] : memref<1x32x64xbf16, #tpu.memory_space<vmem>>, vector<1x32x64xbf16>
    %124 = vector.shape_cast %123 : vector<1x32x64xbf16> to vector<32x64xbf16>
    %c0_63 = arith.constant 0 : index
    %c0_64 = arith.constant 0 : index
    %c0_65 = arith.constant 0 : index
    %125 = vector.load %arg10[%c0_63, %c0_64, %c0_65] : memref<1x1x64xf32, #tpu.memory_space<vmem>>, vector<1x1x64xf32>
    %126 = vector.shape_cast %125 : vector<1x1x64xf32> to vector<1x64xf32>
    %c0_66 = arith.constant 0 : index
    %c0_67 = arith.constant 0 : index
    %c0_68 = arith.constant 0 : index
    %127 = vector.load %arg11[%c0_66, %c0_67, %c0_68] : memref<1x64x32xbf16, #tpu.memory_space<vmem>>, vector<1x64x32xbf16>
    %128 = vector.shape_cast %127 : vector<1x64x32xbf16> to vector<64x32xbf16>
    %c0_69 = arith.constant 0 : index
    %c0_70 = arith.constant 0 : index
    %c0_71 = arith.constant 0 : index
    %129 = vector.load %arg12[%c0_69, %c0_70, %c0_71] : memref<1x1x32xf32, #tpu.memory_space<vmem>>, vector<1x1x32xf32>
    %130 = vector.shape_cast %129 : vector<1x1x32xf32> to vector<1x32xf32>
    %c0_72 = arith.constant 0 : index
    %c0_73 = arith.constant 0 : index
    %c0_74 = arith.constant 0 : index
    %131 = vector.load %arg13[%c0_72, %c0_73, %c0_74] : memref<1x1x32xf32, #tpu.memory_space<vmem>>, vector<1x1x32xf32>
    %132 = vector.shape_cast %131 : vector<1x1x32xf32> to vector<1x32xf32>
    %c0_75 = arith.constant 0 : index
    %c0_76 = arith.constant 0 : index
    %c0_77 = arith.constant 0 : index
    %133 = vector.load %arg14[%c0_75, %c0_76, %c0_77] : memref<1x1x32xf32, #tpu.memory_space<vmem>>, vector<1x1x32xf32>
    %134 = vector.shape_cast %133 : vector<1x1x32xf32> to vector<1x32xf32>
    %135 = vector.shape_cast %116 : vector<2x8x32xf32> to vector<16x32xf32>
    %136 = arith.truncf %135 : vector<16x32xf32> to vector<16x32xbf16>
    %cst_78 = arith.constant dense<0.000000e+00> : vector<16x64xf32>
    %137 = tpu.matmul %136, %124, %cst_78 {dimension_numbers = #tpu.dot_dimension_numbers<[1], [0], [0], [1], [0, 0, 1, 1], [], []>} : vector<16x32xbf16>, vector<32x64xbf16>, vector<16x64xf32> -> vector<16x64xf32>
    %138 = vector.broadcast %126 : vector<1x64xf32> to vector<16x64xf32>
    %139 = arith.addf %137, %138 : vector<16x64xf32>
    %cst_79 = arith.constant 0.000000e+00 : f32
    %140 = vector.broadcast %cst_79 : f32 to vector<16x64xf32>
    %141 = arith.maximumf %139, %140 : vector<16x64xf32>
    %142 = arith.truncf %141 : vector<16x64xf32> to vector<16x64xbf16>
    %cst_80 = arith.constant dense<0.000000e+00> : vector<16x32xf32>
    %143 = tpu.matmul %142, %128, %cst_80 {dimension_numbers = #tpu.dot_dimension_numbers<[1], [0], [0], [1], [0, 0, 1, 1], [], []>} : vector<16x64xbf16>, vector<64x32xbf16>, vector<16x32xf32> -> vector<16x32xf32>
    %144 = vector.broadcast %130 : vector<1x32xf32> to vector<16x32xf32>
    %145 = arith.addf %143, %144 : vector<16x32xf32>
    %146 = arith.addf %145, %135 : vector<16x32xf32>
    %cst_81 = arith.constant dense<0.000000e+00> : vector<16xf32>
    %147 = vector.multi_reduction <add>, %146, %cst_81 [1] : vector<16x32xf32> to vector<16xf32>
    %148 = vector.shape_cast %147 : vector<16xf32> to vector<16x1xf32>
    %cst_82 = arith.constant 3.200000e+01 : f32
    %149 = vector.broadcast %cst_82 : f32 to vector<16x1xf32>
    %150 = arith.divf %148, %149 : vector<16x1xf32>
    %151 = vector.broadcast %150 : vector<16x1xf32> to vector<16x32xf32>
    %152 = arith.subf %146, %151 : vector<16x32xf32>
    %153 = arith.mulf %152, %152 : vector<16x32xf32>
    %cst_83 = arith.constant dense<0.000000e+00> : vector<16xf32>
    %154 = vector.multi_reduction <add>, %153, %cst_83 [1] : vector<16x32xf32> to vector<16xf32>
    %155 = vector.shape_cast %154 : vector<16xf32> to vector<16x1xf32>
    %cst_84 = arith.constant 3.200000e+01 : f32
    %156 = vector.broadcast %cst_84 : f32 to vector<16x1xf32>
    %157 = arith.divf %155, %156 : vector<16x1xf32>
    %158 = vector.broadcast %150 : vector<16x1xf32> to vector<16x32xf32>
    %159 = arith.subf %146, %158 : vector<16x32xf32>
    %cst_85 = arith.constant 9.99999974E-6 : f32
    %160 = vector.broadcast %cst_85 : f32 to vector<16x1xf32>
    %161 = arith.addf %157, %160 : vector<16x1xf32>
    %162 = math.rsqrt %161 : vector<16x1xf32>
    %163 = vector.broadcast %162 : vector<16x1xf32> to vector<16x32xf32>
    %164 = arith.mulf %159, %163 : vector<16x32xf32>
    %165 = vector.broadcast %132 : vector<1x32xf32> to vector<16x32xf32>
    %166 = arith.mulf %164, %165 : vector<16x32xf32>
    %167 = vector.broadcast %134 : vector<1x32xf32> to vector<16x32xf32>
    %168 = arith.addf %166, %167 : vector<16x32xf32>
    %169 = vector.shape_cast %168 : vector<16x32xf32> to vector<2x8x32xf32>
    %c0_86 = arith.constant 0 : index
    %c0_87 = arith.constant 0 : index
    %c0_88 = arith.constant 0 : index
    %170 = vector.load %arg22[%c0_86, %c0_87, %c0_88] : memref<2x8x32xf32, #tpu.memory_space<vmem>>, vector<2x8x32xf32>
    tpu.vector_store %arg22[%c0_86, %c0_87, %c0_88], %169 {strides = array<i32>} : memref<2x8x32xf32, #tpu.memory_space<vmem>>, vector<2x8x32xf32>,
    %c0_89 = arith.constant 0 : index
    %c0_90 = arith.constant 0 : index
    %c0_91 = arith.constant 0 : index
    %171 = vector.load %arg19[%c0_89, %c0_90, %c0_91] : memref<2x8x32xf32, #tpu.memory_space<vmem>>, vector<2x8x32xf32>
    tpu.vector_store %arg19[%c0_89, %c0_90, %c0_91], %169 {strides = array<i32>} : memref<2x8x32xf32, #tpu.memory_space<vmem>>, vector<2x8x32xf32>,
    %c1_i32 = arith.constant 1 : i32
    %172 = arith.cmpi eq, %arg0, %c1_i32 : i32
    %173 = arith.extui %172 : i1 to i32
    %c0_i32_92 = arith.constant 0 : i32
    %174 = arith.cmpi ne, %173, %c0_i32_92 : i32
    scf.if %174 {
      %175 = vector.extract_strided_slice %169 {offsets = [0, 0, 0], sizes = [2, 1, 32], strides = [1, 1, 1]} : vector<2x8x32xf32> to vector<2x1x32xf32>
      %176 = vector.shape_cast %175 : vector<2x1x32xf32> to vector<2x32xf32>
      %177 = arith.truncf %176 : vector<2x32xf32> to vector<2x32xbf16>
      %c0_93 = arith.constant 0 : index
      %c0_94 = arith.constant 0 : index
      %178 = vector.load %arg15[%c0_93, %c0_94] : memref<32x128xbf16, #tpu.memory_space<vmem>>, vector<32x128xbf16>
      %cst_95 = arith.constant dense<0.000000e+00> : vector<2x128xf32>
      %179 = tpu.matmul %177, %178, %cst_95 {dimension_numbers = #tpu.dot_dimension_numbers<[1], [0], [0], [1], [0, 0, 1, 1], [], []>} : vector<2x32xbf16>, vector<32x128xbf16>, vector<2x128xf32> -> vector<2x128xf32>
      %c0_96 = arith.constant 0 : index
      %c0_97 = arith.constant 0 : index
      %180 = vector.load %arg16[%c0_96, %c0_97] : memref<1x128xf32, #tpu.memory_space<vmem>>, vector<1x128xf32>
      %181 = vector.broadcast %180 : vector<1x128xf32> to vector<2x128xf32>
      %182 = arith.addf %179, %181 : vector<2x128xf32>
      %cst_98 = arith.constant 0.000000e+00 : f32
      %183 = vector.broadcast %cst_98 : f32 to vector<2x128xf32>
      %184 = arith.maximumf %182, %183 : vector<2x128xf32>
      %185 = arith.truncf %184 : vector<2x128xf32> to vector<2x128xbf16>
      %c0_99 = arith.constant 0 : index
      %c0_100 = arith.constant 0 : index
      %186 = vector.load %arg17[%c0_99, %c0_100] : memref<128x32xbf16, #tpu.memory_space<vmem>>, vector<128x32xbf16>
      %cst_101 = arith.constant dense<0.000000e+00> : vector<2x32xf32>
      %187 = tpu.matmul %185, %186, %cst_101 {dimension_numbers = #tpu.dot_dimension_numbers<[1], [0], [0], [1], [0, 0, 1, 1], [], []>} : vector<2x128xbf16>, vector<128x32xbf16>, vector<2x32xf32> -> vector<2x32xf32>
      %c0_102 = arith.constant 0 : index
      %c0_103 = arith.constant 0 : index
      %188 = vector.load %arg18[%c0_102, %c0_103] : memref<1x32xf32, #tpu.memory_space<vmem>>, vector<1x32xf32>
      %189 = vector.broadcast %188 : vector<1x32xf32> to vector<2x32xf32>
      %190 = arith.addf %187, %189 : vector<2x32xf32>
      %cst_104 = arith.constant dense<0.000000e+00> : vector<2xf32>
      %191 = vector.multi_reduction <add>, %190, %cst_104 [1] : vector<2x32xf32> to vector<2xf32>
      %192 = vector.shape_cast %191 : vector<2xf32> to vector<2x1xf32>
      %cst_105 = arith.constant 3.200000e+01 : f32
      %193 = vector.broadcast %cst_105 : f32 to vector<2x1xf32>
      %194 = arith.divf %192, %193 : vector<2x1xf32>
      %195 = vector.broadcast %194 : vector<2x1xf32> to vector<2x32xf32>
      %196 = arith.subf %190, %195 : vector<2x32xf32>
      %197 = arith.mulf %196, %196 : vector<2x32xf32>
      %cst_106 = arith.constant dense<0.000000e+00> : vector<2xf32>
      %198 = vector.multi_reduction <add>, %197, %cst_106 [1] : vector<2x32xf32> to vector<2xf32>
      %199 = vector.shape_cast %198 : vector<2xf32> to vector<2x1xf32>
      %cst_107 = arith.constant 3.200000e+01 : f32
      %200 = vector.broadcast %cst_107 : f32 to vector<2x1xf32>
      %201 = arith.divf %199, %200 : vector<2x1xf32>
      %202 = vector.broadcast %194 : vector<2x1xf32> to vector<2x32xf32>
      %203 = arith.subf %190, %202 : vector<2x32xf32>
      %cst_108 = arith.constant 9.99999974E-6 : f32
      %204 = vector.broadcast %cst_108 : f32 to vector<2x1xf32>
      %205 = arith.addf %201, %204 : vector<2x1xf32>
      %206 = math.rsqrt %205 : vector<2x1xf32>
      %207 = vector.broadcast %206 : vector<2x1xf32> to vector<2x32xf32>
      %208 = arith.mulf %203, %207 : vector<2x32xf32>
      %c0_109 = arith.constant 0 : index
      %c0_110 = arith.constant 0 : index
      %209 = vector.load %arg21[%c0_109, %c0_110] : memref<2x32xf32, #tpu.memory_space<vmem>>, vector<2x32xf32>
      tpu.vector_store %arg21[%c0_109, %c0_110], %208 {strides = array<i32>} : memref<2x32xf32, #tpu.memory_space<vmem>>, vector<2x32xf32>,
    } else {
    }
    return
  }
  func.func @transform_0(%arg0: i32) -> (i32, i32, i32) {
    %c0_i32 = arith.constant 0 : i32
    %c0_i32_0 = arith.constant 0 : i32
    %c0_i32_1 = arith.constant 0 : i32
    %c0_i32_2 = arith.constant 0 : i32
    return %c0_i32, %c0_i32_0, %c0_i32_1 : i32, i32, i32
  }
  func.func @transform_1(%arg0: i32) -> (i32, i32, i32) {
    %c0_i32 = arith.constant 0 : i32
    %c0_i32_0 = arith.constant 0 : i32
    %c0_i32_1 = arith.constant 0 : i32
    %c0_i32_2 = arith.constant 0 : i32
    return %c0_i32, %c0_i32_0, %c0_i32_1 : i32, i32, i32
  }
  func.func @transform_2(%arg0: i32) -> (i32, i32, i32, i32) {
    %c0_i32 = arith.constant 0 : i32
    %c0_i32_0 = arith.constant 0 : i32
    %c0_i32_1 = arith.constant 0 : i32
    %c0_i32_2 = arith.constant 0 : i32
    return %arg0, %c0_i32, %c0_i32_0, %c0_i32_1 : i32, i32, i32, i32
  }
  func.func @transform_3(%arg0: i32) -> (i32, i32, i32, i32) {
    %c0_i32 = arith.constant 0 : i32
    %c0_i32_0 = arith.constant 0 : i32
    %c0_i32_1 = arith.constant 0 : i32
    %c0_i32_2 = arith.constant 0 : i32
    return %arg0, %c0_i32, %c0_i32_0, %c0_i32_1 : i32, i32, i32, i32
  }
  func.func @transform_4(%arg0: i32) -> (i32, i32, i32, i32) {
    %c0_i32 = arith.constant 0 : i32
    %c0_i32_0 = arith.constant 0 : i32
    %c0_i32_1 = arith.constant 0 : i32
    %c0_i32_2 = arith.constant 0 : i32
    return %arg0, %c0_i32, %c0_i32_0, %c0_i32_1 : i32, i32, i32, i32
  }
  func.func @transform_5(%arg0: i32) -> (i32, i32, i32, i32) {
    %c0_i32 = arith.constant 0 : i32
    %c0_i32_0 = arith.constant 0 : i32
    %c0_i32_1 = arith.constant 0 : i32
    %c0_i32_2 = arith.constant 0 : i32
    return %arg0, %c0_i32, %c0_i32_0, %c0_i32_1 : i32, i32, i32, i32
  }
  func.func @transform_6(%arg0: i32) -> (i32, i32, i32, i32) {
    %c0_i32 = arith.constant 0 : i32
    %c0_i32_0 = arith.constant 0 : i32
    %c0_i32_1 = arith.constant 0 : i32
    %c0_i32_2 = arith.constant 0 : i32
    return %arg0, %c0_i32, %c0_i32_0, %c0_i32_1 : i32, i32, i32, i32
  }
  func.func @transform_7(%arg0: i32) -> (i32, i32, i32, i32) {
    %c0_i32 = arith.constant 0 : i32
    %c0_i32_0 = arith.constant 0 : i32
    %c0_i32_1 = arith.constant 0 : i32
    %c0_i32_2 = arith.constant 0 : i32
    return %arg0, %c0_i32, %c0_i32_0, %c0_i32_1 : i32, i32, i32, i32
  }
  func.func @transform_8(%arg0: i32) -> (i32, i32, i32) {
    %c0_i32 = arith.constant 0 : i32
    %c0_i32_0 = arith.constant 0 : i32
    %c0_i32_1 = arith.constant 0 : i32
    return %arg0, %c0_i32, %c0_i32_0 : i32, i32, i32
  }
  func.func @transform_9(%arg0: i32) -> (i32, i32, i32) {
    %c0_i32 = arith.constant 0 : i32
    %c0_i32_0 = arith.constant 0 : i32
    %c0_i32_1 = arith.constant 0 : i32
    return %arg0, %c0_i32, %c0_i32_0 : i32, i32, i32
  }
  func.func @transform_10(%arg0: i32) -> (i32, i32, i32) {
    %c0_i32 = arith.constant 0 : i32
    %c0_i32_0 = arith.constant 0 : i32
    %c0_i32_1 = arith.constant 0 : i32
    return %arg0, %c0_i32, %c0_i32_0 : i32, i32, i32
  }
  func.func @transform_11(%arg0: i32) -> (i32, i32, i32) {
    %c0_i32 = arith.constant 0 : i32
    %c0_i32_0 = arith.constant 0 : i32
    %c0_i32_1 = arith.constant 0 : i32
    return %arg0, %c0_i32, %c0_i32_0 : i32, i32, i32
  }
  func.func @transform_12(%arg0: i32) -> (i32, i32, i32) {
    %c0_i32 = arith.constant 0 : i32
    %c0_i32_0 = arith.constant 0 : i32
    %c0_i32_1 = arith.constant 0 : i32
    return %arg0, %c0_i32, %c0_i32_0 : i32, i32, i32
  }
  func.func @transform_13(%arg0: i32) -> (i32, i32, i32) {
    %c0_i32 = arith.constant 0 : i32
    %c0_i32_0 = arith.constant 0 : i32
    %c0_i32_1 = arith.constant 0 : i32
    return %arg0, %c0_i32, %c0_i32_0 : i32, i32, i32
  }
  func.func @transform_14(%arg0: i32) -> (i32, i32) {
    %c0_i32 = arith.constant 0 : i32
    %c0_i32_0 = arith.constant 0 : i32
    %c0_i32_1 = arith.constant 0 : i32
    return %c0_i32, %c0_i32_0 : i32, i32
  }
  func.func @transform_15(%arg0: i32) -> (i32, i32) {
    %c0_i32 = arith.constant 0 : i32
    %c0_i32_0 = arith.constant 0 : i32
    %c0_i32_1 = arith.constant 0 : i32
    return %c0_i32, %c0_i32_0 : i32, i32
  }
  func.func @transform_16(%arg0: i32) -> (i32, i32) {
    %c0_i32 = arith.constant 0 : i32
    %c0_i32_0 = arith.constant 0 : i32
    %c0_i32_1 = arith.constant 0 : i32
    return %c0_i32, %c0_i32_0 : i32, i32
  }
  func.func @transform_17(%arg0: i32) -> (i32, i32) {
    %c0_i32 = arith.constant 0 : i32
    %c0_i32_0 = arith.constant 0 : i32
    %c0_i32_1 = arith.constant 0 : i32
    return %c0_i32, %c0_i32_0 : i32, i32
  }
  func.func @transform_18(%arg0: i32) -> (i32, i32, i32) {
    %c0_i32 = arith.constant 0 : i32
    %c0_i32_0 = arith.constant 0 : i32
    %c0_i32_1 = arith.constant 0 : i32
    %c0_i32_2 = arith.constant 0 : i32
    return %c0_i32, %c0_i32_0, %c0_i32_1 : i32, i32, i32
  }
  func.func @transform_19(%arg0: i32) -> (i32, i32, i32, i32, i32) {
    %c0_i32 = arith.constant 0 : i32
    %c0_i32_0 = arith.constant 0 : i32
    %c0_i32_1 = arith.constant 0 : i32
    %c0_i32_2 = arith.constant 0 : i32
    %c0_i32_3 = arith.constant 0 : i32
    return %arg0, %c0_i32, %c0_i32_0, %c0_i32_1, %c0_i32_2 : i32, i32, i32, i32, i32
  }
  func.func @transform_20(%arg0: i32) -> (i32, i32) {
    %c0_i32 = arith.constant 0 : i32
    %c0_i32_0 = arith.constant 0 : i32
    %c0_i32_1 = arith.constant 0 : i32
    return %c0_i32, %c0_i32_0 : i32, i32
  }
}

</mosaic_0001>

<bundles_post_ra>
// kernel: sentence_aware_forward.2
= control target key start
LH: loop header
LB: loop body
LE: loop exit
PB: predicated region body
PF: predicated region fallthrough
CT: control target
= control target key end

     0   :  { %s2313_s0 = inlined_call_operand.vmem [shape: f32[2,8,32], index: 0, kind: input, shape index: {}]   ;;  %s2314_s1 = inlined_call_operand.vmem [shape: f32[2,8,8], index: 1, kind: input, shape index: {}]   ;;  %s2315_s2 = inlined_call_operand.vmem [shape: bf16[2,1,32,96], index: 2, kind: input, shape index: {}]   ;;  %s2316_s3 = inlined_call_operand.vmem [shape: f32[2,1,1,96], index: 3, kind: input, shape index: {}]   ;;  %s2317_s4 = inlined_call_operand.vmem [shape: bf16[2,1,32,32], index: 4, kind: input, shape index: {}]   ;;  %s2318_s5 = inlined_call_operand.vmem [shape: f32[2,1,1,32], index: 5, kind: input, shape index: {}]   ;;  %s2319_s6 = inlined_call_operand.vmem [shape: f32[2,1,1,32], index: 6, kind: input, shape index: {}]   ;;  %s2320_s7 = inlined_call_operand.vmem [shape: f32[2,1,1,32], index: 7, kind: input, shape index: {}]   ;;  %s2321_s8 = inlined_call_operand.vmem [shape: bf16[2,32,64], index: 8, kind: input, shape index: {}]   ;;  %s2322_s9 = inlined_call_operand.vmem [shape: f32[2,1,64], index: 9, kind: input, shape index: {}]   ;;  %s2323_s10 = inlined_call_operand.vmem [shape: bf16[2,64,32], index: 10, kind: input, shape index: {}]   ;;  %s2324_s11 = inlined_call_operand.vmem [shape: f32[2,1,32], index: 11, kind: input, shape index: {}]   ;;  %s2325_s12 = inlined_call_operand.vmem [shape: f32[2,1,32], index: 12, kind: input, shape index: {}]   ;;  %s2326_s13 = inlined_call_operand.vmem [shape: f32[2,1,32], index: 13, kind: input, shape index: {}]   ;;  %s2327_s14 = inlined_call_operand.vmem [shape: bf16[32,128], index: 14, kind: input, shape index: {}]   ;;  %s2328_s15 = inlined_call_operand.vmem [shape: f32[1,128], index: 15, kind: input, shape index: {}]   ;;  %s2329_s16 = inlined_call_operand.vmem [shape: bf16[128,32], index: 16, kind: input, shape index: {}]   ;;  %s2330_s17 = inlined_call_operand.vmem [shape: f32[1,32], index: 17, kind: input, shape index: {}]   ;;  %s2331_s18 = inlined_call_operand.vmem [shape: f32[2,8,32], index: 18, kind: output, shape index: {0}]   ;;  %s2332_s19 = inlined_call_operand.vmem [shape: f32[2,2,2,8,8], index: 19, kind: output, shape index: {1}]   ;;  %s2333_s20 = inlined_call_operand.vmem [shape: f32[2,32], index: 20, kind: output, shape index: {2}]  }
   0x1   :  { %2341 = sst [smem:[#allocation5_spill]] %s2313_s0 }
   0x2   :  { %2342 = sst [smem:[#allocation6_spill]] %s2314_s1  ;;  %s2039_s1 = smov 0  }
   0x3   :  { %2343 = sst [smem:[#allocation7_spill]] %s2315_s2 }
   0x4   :  { %2344 = sst [smem:[#allocation8_spill]] %s2316_s3 }
   0x5   :  { %2345 = sst [smem:[#allocation9_spill]] %s2317_s4 }
   0x6   :  { %2346 = sst [smem:[#allocation10_spill]] %s2327_s14 }
   0x7   :  { %2347 = sst [smem:[#allocation11_spill]] %s2328_s15 }
   0x8   :  { %2348 = sst [smem:[#allocation12_spill]] %s2329_s16 }
   0x9   :  { %2349 = sst [smem:[#allocation13_spill]] %s2330_s17 }
   0xa   :  { %2350 = sst [smem:[#allocation14_spill]] %s2331_s18 }
   0xb   :  { %2351 = sst [smem:[#allocation15_spill]] %s2333_s20 }
   0xc LB: > { %2352 = sst [smem:[#allocation3_spill]] %s1927_s1  ;;  %s2045_s22 = sadd.s32 4294967295, %s1927_s1   ;;  %s1927_s1 = sphi %s2039_s1, %s31_s1  }
   0xd   : > { %2353 = sst [smem:[#allocation4_spill]] %s2045_s22  ;;  %p1729_p0 = scmp.ge.s32.totalorder %s1927_s1, 1 }
   0xe   : > { %p651_p1 = scmp.lt.s32.totalorder %s1927_s1, 3 }
  0x10   : > { %p652_p2 = pnand %p1729_p0, %p651_p1 }
  0x11   : > { %p748_p3 = scmp.lt.s32.totalorder (!%p652_p2), %s2045_s22, 1  ;;  %s2355_s4 = sld [smem:[#allocation7_spill]] (!%p652_p2) }
  0x12   : > { %655 = sbr.rel (%p652_p2) target bundleno = 2574 (0xa0e), region = 92  ;;  %s2356_s21 = sld [smem:[#allocation9_spill]] (!%p652_p2) }
  0x13   : > { %s2357_s17 = sld [smem:[#allocation4_spill]] (!%p652_p2) }
  0x17   : > { %s2051_s23 = scalar_select %p748_p3, %s2045_s22, 1 }
  0x19   : > { %s1840_s24 = sshll.u32 %s2051_s23, 4  ;;  %s785_s22 = scalar_lea.vmem %s2324_s11, %s2051_s23 }
  0x1a   : > { %s752_s29 = scalar_lea.vmem %s2355_s4, %s1840_s24  ;;  %s2064_s1 = scalar_lea.vmem %s2356_s21, %s1840_s24 }
  0x1b   : > { %s2081_s28 = scalar_lea.vmem %s2321_s8, %s1840_s24  ;;  %s1843_s21 = sshll.u32 %s2051_s23, 5 }
  0x1c   : > { %s2091_s15 = scalar_lea.vmem %s2323_s10, %s1843_s21  ;;  %s788_s3 = scalar_lea.vmem %s2325_s12, %s2051_s23 }
  0x1d   : > { %s791_s18 = scalar_lea.vmem %s2326_s13, %s2051_s23  ;;  %s2108_s0 = scalar_lea.vmem %s2332_s19, %s1843_s21 }
  0x1e   : > { %p1740_p4 = scmp.ne.s32.totalorder %s2357_s17, 0 }
  0x1f   : > { %s2358_s14 = sld [smem:[#allocation5_spill]] (!%p1740_p4) }
  0x20   : > { %801 = sbr.rel (%p1740_p4) target bundleno = 40 (0x28), region = 96 }
  0x25   : > { %v802_v0 = vld [vmem:[%s2358_s14] sm:$0xff]  ;;  %vm804_vm0 = vcmask 261120   ;;  %v803_v1 = vld [vmem:[%s2358_s14 + $0x8] sm:$0xff] }
  0x26   : > { %805 = vst.msk [vmem:[#allocation2] sm:$0xff] %vm804_vm0, %v802_v0 }
  0x27   : > { %806 = vst.msk [vmem:[#allocation2 + $0x8] sm:$0xff] %vm804_vm0, %v803_v1 }
  0x28 PF: > { %v1846_v2 = vld [vmem:[%s752_s29 + $0x8] sm:$0xff]  ;;  %s1929_s21 = smov 96   ;;  %v1845_v5 = vld [vmem:[%s752_s29] sm:$0xff]  ;;  %vm839_vm1 = vcmask 261120   ;;  %s2359_s24 = sld [smem:[#allocation8_spill]]  ;;  %vm884_vm2 = vcmask 130048  }
  0x29   : > { %859 = vrot.lane.b32.xlu0 %v1846_v2, %s1929_s21  ;;  %849 = vmatpush.bf16.msra.mxu0 %v1846_v2  ;;  %s1930_s29 = smov 112   ;;  %s2361_s17 = sld [smem:[#allocation6_spill]]  ;;  %vm929_vm4 = vcmask 64512   ;;  %vm962_vm6 = vcmask 1043456   ;;  %vm1315_vm14 = vcmask 523264  }
  0x2a   : > { %s1931_s25 = smov 80   ;;  %s2362_s2 = scalar_lea.vmem %s2318_s5, %s2051_s23 }
  0x2b   : > { %s2364_s4 = scalar_lea.vmem %s2320_s7, %s2051_s23  ;;  %s2365_s16 = scalar_lea.vmem %s2322_s9, %s2051_s23 }
  0x2d   : > { %v2117_v3 = vld [vmem:[#allocation2] sm:$0xff]  ;;  %850 = vmatpush.bf16.msra.mxu0 %v1845_v5 }
  0x2e   : > { %v2119_v4 = vld [vmem:[#allocation2 + $0x8] sm:$0xff]  ;;  %s2360_s27 = scalar_lea.vmem %s2359_s24, %s2051_s23  ;;  %s2363_s24 = scalar_lea.vmem %s2319_s6, %s2051_s23 }
  0x2f   : > { %v823_v6 = vpack.c.bf16 %v2119_v4, %v2117_v3  ;;  %v1883_v7 = vld [vmem:[%s2360_s27] ss:$0 sm:$0xff]  ;;  %v810_v44 = vld [vmem:[%s2361_s17 + $0x8] sm:$0xff] }
  0x30   : > { %863 = vrot.lane.b32.xlu1 %v1883_v7, %s1929_s21  ;;  %v809_v39 = vld [vmem:[%s2361_s17] sm:$0xff]  ;;  %vm926_vm5 = vcmp.gt.f32.partialorder %v810_v44, 0.0 }
  0x31   : > { %1749 = vmatmul.msk.bf16.vlgmr.msra.gmra.mxu0 %vm839_vm1, %v823_v6  ;;  %857 = vrot.lane.b32.xlu0 %v1845_v5, %s1929_s21  ;;  %vm925_vm3 = vcmp.gt.f32.partialorder %v809_v39, 0.0 }
  0x9b   : > { %v860_v8 = vpop.permute.xlu0 %859 }
  0x9c   : > { %872 = vmatpush.bf16.msra.mxu1 %v860_v8 }
  0xa2   : > { %v864_v17 = vpop.permute.xlu1 %863 }
  0xa3   : > { %v858_v9 = vpop.permute.xlu0 %857 }
  0xa4   : > { %873 = vmatpush.bf16.msra.mxu1 %v858_v9 }
  0xa7   : > { %1750 = vmatmul.msk.bf16.vlgmr.msra.gmra.mxu1 %vm839_vm1, %v823_v6 }
  0xae   : > { %v852_v10 = vpop.f32.mrf.mxu0 }
  0xaf   : > { %v853_v11 = vadd.f32 %v1883_v7, %v852_v10 }
  0xb1   : > { %v880_v25 = vpack.c.bf16 %v853_v11, %v853_v11 }
  0xb3   : > { %v1004_v31 = vunpack.c.l.b16 %v880_v25 }
  0xb5   : > { %v1005_v32 = vpack.c.b16 %v1004_v31, %v1004_v31 }
  0xb6   : > { %v854_v12 = vpop.f32.mrf.mxu0 }
  0xb7   : > { %v855_v13 = vadd.f32 %v1883_v7, %v854_v12 }
  0xb9   : > { %v881_v14 = vpack.c.bf16 %v855_v13, %v855_v13 }
  0xbb   : > { %v1030_v15 = vunpack.c.l.b16 %v881_v14 }
  0xbd   : > { %v1031_v16 = vpack.c.b16 %v1030_v15, %v1030_v15 }
  0xbf   : > { %1032 = vrot.lane.b32.xlu0 %v1031_v16, %s1930_s29 }
 0x124   : > { %v875_v18 = vpop.f32.mrf.mxu1 }
 0x125   : > { %v876_v19 = vadd.f32 %v875_v18, %v864_v17 }
 0x127   : > { %v882_v20 = vpack.c.bf16 %v876_v19, %v876_v19 }
 0x129   : > { %v955_v21 = vunpack.c.l.b16 %v882_v20  ;;  %v889_v22 = vsel %vm884_vm2, %v882_v20, 0 }
 0x12a   : > { %898 = vmatpush.bf16.xpose.msra.mxu2 %v889_v22 }
 0x12b   : > { %v2134_v23 = vpack.c.b16 %v955_v21, %v955_v21 }
 0x12c   : > { %v877_v24 = vpop.f32.mrf.mxu1 }
 0x12d   : > { %v878_v26 = vadd.f32 %v877_v24, %v864_v17  ;;  %1008 = vrot.lane.b32.xlu1 %v2134_v23, %s1930_s29 }
 0x12f   : > { %v883_v27 = vpack.c.bf16 %v878_v26, %v878_v26 }
 0x131   : > { %v980_v28 = vunpack.c.l.b16 %v883_v27  ;;  %1751 = vmatmul.msk.bf16.vlgmr.msra.gmra.mxu2 %vm884_vm2, %v880_v25  ;;  %v908_v29 = vsel %vm884_vm2, %v883_v27, 0  ;;  %v1033_v35 = vpop.permute.xlu0 %1032 }
 0x132   : > { %917 = vmatpush.bf16.xpose.msra.mxu3 %v908_v29 }
 0x133   : > { %v2139_v30 = vpack.c.b16 %v980_v28, %v980_v28 }
 0x135   : > { %1034 = vrot.lane.b32.xlu2 %v2139_v30, %s1930_s29 }
 0x139   : > { %1752 = vmatmul.msk.bf16.vlgmr.msra.gmra.mxu3 %vm884_vm2, %v881_v14 }
 0x13d   : > { %1006 = vrot.lane.b32.xlu2 %v1005_v32, %s1930_s29 }
 0x18f   : > { %v1035_v33 = vpop.permute.xlu2 %1034 }
 0x190   : > { %v1040_v34 = vsel %vm884_vm2, %v1035_v33, 0 }
 0x191   : > { %1049 = vmatpush.bf16.xpose.msrb.mxu3 %v1040_v34 }
 0x197   : > { %v1007_v38 = vpop.permute.xlu2 %1006 }
 0x198   : > { %1756 = vmatmul.msk.bf16.vlgmr.msrb.gmra.mxu3 %vm884_vm2, %v1033_v35 }
 0x19f   : > { %v1009_v36 = vpop.permute.xlu1 %1008 }
 0x1a0   : > { %v1014_v37 = vsel %vm884_vm2, %v1009_v36, 0 }
 0x1a1   : > { %1023 = vmatpush.bf16.xpose.msrb.mxu2 %v1014_v37 }
 0x1a8   : > { %1755 = vmatmul.msk.bf16.vlgmr.msrb.gmra.mxu2 %vm884_vm2, %v1007_v38 }
 0x1b4   : > { %v900_v40 = vpop.f32.mrf.mxu2 }
 0x1b5   : > { %v923_v41 = vmul.f32 0.25, %v900_v40 }
 0x1b7   : > { %v927_v42 = vsel %vm925_vm3, -1e+30, %v923_v41 }
 0x1b8   : > { %v930_v43 = vsel %vm929_vm4, %v927_v42, -inf }
 0x1b9   : > { %931 = vmax.xlane.f32.xlu1 %v930_v43 }
 0x1bc   : > { %v902_v45 = vpop.f32.mrf.mxu2  ;;  %v919_v46 = vpop.f32.mrf.mxu3 }
 0x1bd   : > { %v924_v47 = vmul.f32 0.25, %v919_v46 }
 0x1bf   : > { %v928_v48 = vsel %vm926_vm5, -1e+30, %v924_v47  ;;  %v1848_v47 = vld [vmem:[%s2064_s1 + $0x8] sm:$0xff] }
 0x1c0   : > { %v933_v49 = vsel %vm929_vm4, %v928_v48, -inf  ;;  %1160 = vmatpush.bf16.msra.mxu2 %v1848_v47 }
 0x1c1   : > { %934 = vmax.xlane.f32.xlu2 %v933_v49 }
 0x1c4   : > { %v921_v50 = vpop.f32.mrf.mxu3 }
 0x21b   : > { %v1051_v51 = vpop.f32.mrf.mxu3 }
 0x21c   : > { %v1056_v52 = vmul.f32 0.25, %v1051_v51 }
 0x21e   : > { %v1058_v53 = vsel %vm926_vm5, -1e+30, %v1056_v52 }
 0x21f   : > { %v1062_v54 = vsel %vm929_vm4, %v1058_v53, -inf }
 0x220   : > { %1063 = vmax.xlane.f32.xlu2 %v1062_v54 }
 0x223   : > { %v1053_v55 = vpop.f32.mrf.mxu3 }
 0x22b   : > { %v1025_v56 = vpop.f32.mrf.mxu2 }
 0x22c   : > { %v1055_v57 = vmul.f32 0.25, %v1025_v56  ;;  %v932_v58 = vpop.xlane.xlu1 %931 }
 0x22d   : > { %v936_v59 = vsub.f32 %v927_v42, %v932_v58 }
 0x22e   : > { %v1057_v60 = vsel %vm925_vm3, -1e+30, %v1055_v57 }
 0x22f   : > { %v938_v61 = vmul.f32 1.442695, %v936_v59  ;;  %v1059_v62 = vsel %vm929_vm4, %v1057_v60, -inf }
 0x230   : > { %1060 = vmax.xlane.f32.xlu0 %v1059_v62 }
 0x231   : > { %1891 = vpow2.f32 %v938_v61 }
 0x233   : > { %v1027_v63 = vpop.f32.mrf.mxu2 }
 0x234   : > { %v935_v0 = vpop.xlane.xlu2 %934 }
 0x235   : > { %v937_v1 = vsub.f32 %v928_v48, %v935_v0 }
 0x237   : > { %v1892_v2 = vpop.eup %1891  ;;  %v940_v5 = vmul.f32 1.442695, %v937_v1 }
 0x238   : > { %v942_v6 = vsel %vm929_vm4, %v1892_v2, 0.0 }
 0x239   : > { %1893 = vpow2.f32 %v940_v5  ;;  %943 = vadd.xlane.f32.xlu1 %v942_v6 }
 0x23f   : > { %v1894_v7 = vpop.eup %1893 }
 0x240   : > { %v945_v8 = vsel %vm929_vm4, %v1894_v7, 0.0 }
 0x241   : > { %946 = vadd.xlane.f32.xlu2 %v945_v8 }
 0x244   : > { %957 = vrot.lane.b32.xlu0 %v2134_v23, %s1929_s21 }
 0x24c   : > { %1083 = vrot.lane.b32.xlu0 %v2134_v23, %s1931_s25 }
 0x252   : > { %982 = vrot.lane.b32.xlu1 %v2139_v30, %s1929_s21  ;;  %s1932_s21 = smov 16  }
 0x293   : > { %v1064_v9 = vpop.xlane.xlu2 %1063 }
 0x294   : > { %v1066_v12 = vsub.f32 %v1058_v53, %v1064_v9  ;;  %v1847_v53 = vld [vmem:[%s2064_s1] sm:$0xff]  ;;  %s2366_s1 = sld [smem:[#allocation14_spill]] }
 0x295   : > { %1161 = vmatpush.bf16.msra.mxu2 %v1847_v53  ;;  %v1854_v53 = vld [vmem:[%s2091_s15 + $0x18] sm:$0xff] }
 0x296   : > { %v1069_v14 = vmul.f32 1.442695, %v1066_v12 }
 0x2a3   : > { %v1061_v10 = vpop.xlane.xlu0 %1060 }
 0x2a4   : > { %v1065_v11 = vsub.f32 %v1057_v60, %v1061_v10  ;;  %v1884_v60 = vld [vmem:[%s2362_s2] ss:$0 sm:$0xff] }
 0x2a6   : > { %v1067_v13 = vmul.f32 1.442695, %v1065_v11 }
 0x2a8   : > { %1895 = vpow2.f32 %v1067_v13 }
 0x2ac   : > { %v944_v15 = vpop.xlane.xlu1 %943 }
 0x2ad   : > { %1897 = vrcp.f32 %v944_v15 }
 0x2ae   : > { %v1896_v16 = vpop.eup %1895  ;;  %1899 = vpow2.f32 %v1069_v14 }
 0x2af   : > { %v1071_v17 = vsel %vm929_vm4, %v1896_v16, 0.0 }
 0x2b0   : > { %1072 = vadd.xlane.f32.xlu2 %v1071_v17 }
 0x2b3   : > { %v1898_v18 = vpop.eup %1897 }
 0x2b4   : > { %v1900_v19 = vpop.eup %1899  ;;  %v950_v20 = vmul.f32 %v1898_v18, %v1892_v2  ;;  %v947_v21 = vpop.xlane.xlu2 %946 }
 0x2b5   : > { %1901 = vrcp.f32 %v947_v21  ;;  %v1074_v23 = vsel %vm929_vm4, %v1900_v19, 0.0 }
 0x2b6   : > { %1231 = vst.msk [vmem:[%s2108_s0] sm:$0xff] %vm929_vm4, %v950_v20  ;;  %v958_v22 = vpop.permute.xlu0 %957  ;;  %v952_v25 = vpack.c.bf16 %v950_v20, %v950_v20 }
 0x2b7   : > { %v964_v24 = vsel %vm962_vm6, %v958_v22, 0  ;;  %v1850_v22 = vld [vmem:[%s2081_s28 + $0x8] sm:$0xff] }
 0x2b8   : > { %1075 = vadd.xlane.f32.xlu2 %v1074_v23  ;;  %973 = vmatpush.bf16.msrb.mxu0 %v964_v24 }
 0x2b9   : > { %1277 = vmatpush.bf16.msra.mxu3 %v1850_v22 }
 0x2bb   : > { %v1902_v26 = vpop.eup %1901  ;;  %1753 = vmatmul.msk.bf16.vlgmr.msrb.gmra.mxu0 %vm929_vm4, %v952_v25  ;;  %v1849_v25 = vld [vmem:[%s2081_s28] sm:$0xff]  ;;  %s2367_s28 = smov %s2366_s1 }
 0x2bc   : > { %v951_v27 = vmul.f32 %v1902_v26, %v1894_v7  ;;  %v1933_v7 = vmov 32.0  }
 0x2bd   : > { %1278 = vmatpush.bf16.msra.mxu3 %v1849_v25 }
 0x2be   : > { %1232 = vst.msk [vmem:[%s2108_s0 + $0x8] sm:$0xff] %vm929_vm4, %v951_v27  ;;  %v1084_v28 = vpop.permute.xlu0 %1083  ;;  %v953_v33 = vpack.c.bf16 %v951_v27, %v951_v27 }
 0x2bf   : > { %v1089_v29 = vsel %vm962_vm6, %v1084_v28, 0 }
 0x2c0   : > { %1098 = vmatpush.bf16.msra.mxu0 %v1089_v29 }
 0x2c4   : > { %v983_v31 = vpop.permute.xlu1 %982  ;;  %1323 = vmatpush.bf16.msrb.mxu0 %v1854_v53 }
 0x2c5   : > { %v988_v32 = vsel %vm962_vm6, %v983_v31, 0 }
 0x2c6   : > { %997 = vmatpush.bf16.msrb.mxu1 %v988_v32 }
 0x2c9   : > { %1754 = vmatmul.msk.bf16.vlgmr.msrb.gmra.mxu1 %vm929_vm4, %v953_v33 }
 0x2d0   : > { %1104 = vrot.lane.b32.xlu2 %v2139_v30, %s1931_s25 }
 0x323   : > { %v1073_v34 = vpop.xlane.xlu2 %1072 }
 0x324   : > { %1903 = vrcp.f32 %v1073_v34 }
 0x32a   : > { %v1904_v35 = vpop.eup %1903 }
 0x32b   : > { %v1079_v36 = vmul.f32 %v1904_v35, %v1896_v16  ;;  %v1076_v37 = vpop.xlane.xlu2 %1075 }
 0x32c   : > { %1905 = vrcp.f32 %v1076_v37 }
 0x32d   : > { %v1081_v38 = vpack.c.bf16 %v1079_v36, %v1079_v36  ;;  %1768 = vst.msk [vmem:[%s2108_s0 + $0x10] sm:$0xff] %vm929_vm4, %v1079_v36  ;;  %1907 = vrcp.f32 %v1933_v7 }
 0x32f   : > { %1757 = vmatmul.msk.bf16.vlgmr.msra.gmra.mxu0 %vm929_vm4, %v1081_v38 }
 0x332   : > { %v1906_v39 = vpop.eup %1905 }
 0x333   : > { %v1080_v40 = vmul.f32 %v1906_v39, %v1900_v19  ;;  %v1105_v41 = vpop.permute.xlu2 %1104  ;;  %v1908_v8 = vpop.eup %1907 }
 0x334   : > { %v1110_v42 = vsel %vm962_vm6, %v1105_v41, 0  ;;  %v1177_v9 = vmul.f32 32.0, %v1908_v8  ;;  %vm1181_vm7 = vweird.f32 %v1908_v8 }
 0x335   : > { %v1082_v43 = vpack.c.bf16 %v1080_v40, %v1080_v40  ;;  %1769 = vst.msk [vmem:[%s2108_s0 + $0x18] sm:$0xff] %vm929_vm4, %v1080_v40  ;;  %1119 = vmatpush.bf16.msra.mxu1 %v1110_v42 }
 0x336   : > { %v1178_v10 = vsub.f32 1.0, %v1177_v9 }
 0x338   : > { %v975_v30 = vpop.f32.mrf.mxu0  ;;  %1758 = vmatmul.msk.bf16.vlgmr.msra.gmra.mxu1 %vm929_vm4, %v1082_v43  ;;  %v1179_v11 = vmul.f32 %v1908_v8, %v1178_v10  ;;  %v1885_v43 = vld [vmem:[%s2363_s24] ss:$0 sm:$0xff]  ;;  %s2368_s24 = sld [smem:[#allocation4_spill]] }
 0x33a   : > { %v1180_v12 = vadd.f32 %v1908_v8, %v1179_v11 }
 0x33e   : > { %p1796_p5 = scmp.ne.s32.totalorder %s2368_s24, 1 }
 0x33f   : > { %s2372_s26 = sld [smem:[#allocation13_spill]] (!%p1796_p5) }
 0x340   : > { %v977_v44 = vpop.f32.mrf.mxu0 }
 0x346   : > { %v999_v45 = vpop.f32.mrf.mxu1 }
 0x34e   : > { %v1001_v46 = vpop.f32.mrf.mxu1 }
 0x34f   : > { %v1886_v46 = vld [vmem:[%s2364_s4] ss:$0 sm:$0xff]  ;;  %s2369_s4 = sld [smem:[#allocation10_spill]] (!%p1796_p5) }
 0x3ac   : > { %v1100_v48 = vpop.f32.mrf.mxu0 }
 0x3b4   : > { %v1102_v49 = vpop.f32.mrf.mxu0 }
 0x3b5   : > { %v1121_v50 = vpop.f32.mrf.mxu1 }
 0x3b6   : > { %v1878_v51 = vpack.i.bf16 %v1121_v50, %v1100_v48 }
 0x3b8   : > { %1879 = vrot.lane.b32.xlu1 %v1878_v51, %s1932_s21 }
 0x3bd   : > { %v1123_v52 = vpop.f32.mrf.mxu1 }
 0x42a   : > { %v1880_v54 = vpop.permute.xlu1 %1879 }
 0x42b   : > { %v1882_v55 = vunpack.i.h.bf16 %v1880_v54  ;;  %v1881_v56 = vunpack.i.l.bf16 %v1880_v54  ;;  %v1853_v54 = vld [vmem:[%s2091_s15 + $0x10] sm:$0xff] }
 0x42c   : > { %1324 = vmatpush.bf16.msrb.mxu0 %v1853_v54 }
 0x42d   : > { %v1134_v57 = vsel %vm884_vm2, %v999_v45, %v1882_v55  ;;  %v1133_v58 = vsel %vm884_vm2, %v975_v30, %v1881_v56  ;;  %v1852_v55 = vld [vmem:[%s2091_s15 + $0x8] sm:$0xff]  ;;  %v1851_v56 = vld [vmem:[%s2091_s15] sm:$0xff]  ;;  %s2371_s15 = sld [smem:[#allocation11_spill]] (!%p1796_p5) }
 0x42e   : > { %v1135_v59 = vpack.c.bf16 %v1134_v57, %v1133_v58  ;;  %v1887_v58 = vld [vmem:[%s2365_s16] ss:$0 sm:$0xff]  ;;  %s2370_s16 = sld [smem:[#allocation12_spill]] (!%p1796_p5) }
 0x430   : > { %1767 = vmatmul.msk.bf16.vlgmr.msra.gmra.mxu2 %vm839_vm1, %v1135_v59  ;;  %1325 = vmatpush.bf16.msrb.mxu0 %v1852_v55 }
 0x434   : > { %1326 = vmatpush.bf16.msrb.mxu0 %v1851_v56 }
 0x4b3   : > { %v1163_v61 = vpop.f32.mrf.mxu2 }
 0x4b4   : > { %v1164_v62 = vadd.f32 %v1884_v60, %v1163_v61 }
 0x4b6   : > { %v1168_v63 = vadd.f32 %v1164_v62, %v2117_v3  ;;  %v2201_v3 = vsel %vm1181_vm7, %v1908_v8, %v1180_v12 }
 0x4b8   : > { %v1170_v0 = vsel %vm839_vm1, %v1168_v63, 0.0 }
 0x4b9   : > { %1171 = vadd.xlane.f32.xlu0 %v1170_v0 }
 0x4bb   : > { %v1165_v1 = vpop.f32.mrf.mxu2 }
 0x4bc   : > { %v1166_v2 = vadd.f32 %v1884_v60, %v1165_v1  ;;  %v1888_v1 = vld [vmem:[%s785_s22] ss:$0 sm:$0xff] }
 0x4be   : > { %v1169_v5 = vadd.f32 %v1166_v2, %v2119_v4 }
 0x4c0   : > { %v1173_v6 = vsel %vm839_vm1, %v1169_v5, 0.0 }
 0x4c1   : > { %1174 = vadd.xlane.f32.xlu1 %v1173_v6 }
 0x52c   : > { %v1172_v13 = vpop.xlane.xlu0 %1171 }
 0x52d   : > { %v1183_v14 = vmul.f32 %v2201_v3, %v1172_v13 }
 0x52f   : > { %v1185_v15 = vsub.f32 %v1168_v63, %v1183_v14 }
 0x531   : > { %v1187_v4 = vmul.f32 %v1185_v15, %v1185_v15 }
 0x533   : > { %v1189_v16 = vsel %vm839_vm1, %v1187_v4, 0.0 }
 0x534   : > { %v1175_v17 = vpop.xlane.xlu1 %1174  ;;  %1190 = vadd.xlane.f32.xlu2 %v1189_v16 }
 0x535   : > { %v1184_v18 = vmul.f32 %v2201_v3, %v1175_v17 }
 0x537   : > { %v1186_v19 = vsub.f32 %v1169_v5, %v1184_v18 }
 0x539   : > { %v1188_v20 = vmul.f32 %v1186_v19, %v1186_v19 }
 0x53b   : > { %v1192_v21 = vsel %vm839_vm1, %v1188_v20, 0.0 }
 0x53c   : > { %1193 = vadd.xlane.f32.xlu0 %v1192_v21 }
 0x5a7   : > { %v1191_v23 = vpop.xlane.xlu2 %1190 }
 0x5a8   : > { %v1195_v24 = vmul.f32 %v1191_v23, %v2201_v3 }
 0x5aa   : > { %v1197_v26 = vadd.f32 1e-05, %v1195_v24 }
 0x5ac   : > { %1909 = vrsqrt.f32 %v1197_v26  ;;  %vm1205_vm9 = vweird.f32 %v1197_v26 }
 0x5af   : > { %v1194_v27 = vpop.xlane.xlu0 %1193 }
 0x5b0   : > { %v1196_v28 = vmul.f32 %v1194_v27, %v2201_v3 }
 0x5b2   : > { %v1910_v29 = vpop.eup %1909  ;;  %v1198_v31 = vadd.f32 1e-05, %v1196_v28 }
 0x5b3   : > { %v1200_v32 = vmul.f32 %v1910_v29, %v1197_v26  ;;  %vm1206_vm8 = vweird.f32 %v1910_v29 }
 0x5b4   : > { %1911 = vrsqrt.f32 %v1198_v31  ;;  %vm1207_vm10 = vmor %vm1205_vm9, %vm1206_vm8  ;;  %vm1215_vm12 = vweird.f32 %v1198_v31 }
 0x5b5   : > { %v1201_v33 = vmul.f32 %v1910_v29, %v1200_v32 }
 0x5b7   : > { %v1202_v34 = vmul.f32 0.5, %v1201_v33 }
 0x5b9   : > { %v1203_v35 = vsub.f32 1.5, %v1202_v34 }
 0x5ba   : > { %v1912_v36 = vpop.eup %1911 }
 0x5bb   : > { %v1204_v37 = vmul.f32 %v1910_v29, %v1203_v35  ;;  %v1210_v38 = vmul.f32 %v1912_v36, %v1198_v31  ;;  %vm1216_vm11 = vweird.f32 %v1912_v36 }
 0x5bc   : > { %vm1217_vm13 = vmor %vm1215_vm12, %vm1216_vm11 }
 0x5bd   : > { %v1211_v39 = vmul.f32 %v1912_v36, %v1210_v38  ;;  %v1208_v40 = vsel %vm1207_vm10, %v1910_v29, %v1204_v37 }
 0x5be   : > { %v1219_v30 = vmul.f32 %v1208_v40, %v1185_v15 }
 0x5bf   : > { %v1212_v41 = vmul.f32 0.5, %v1211_v39  ;;  %v1890_v39 = vld [vmem:[%s791_s18] ss:$0 sm:$0xff] }
 0x5c0   : > { %v1224_v47 = vmul.f32 %v1885_v43, %v1219_v30 }
 0x5c1   : > { %v1213_v42 = vsub.f32 1.5, %v1212_v41 }
 0x5c2   : > { %v1229_v50 = vadd.f32 %v1886_v46, %v1224_v47 }
 0x5c3   : > { %v1214_v44 = vmul.f32 %v1912_v36, %v1213_v42 }
 0x5c5   : > { %v1218_v45 = vsel %vm1217_vm13, %v1912_v36, %v1214_v44  ;;  %v1889_v36 = vld [vmem:[%s788_s3] ss:$0 sm:$0xff] }
 0x5c6   : > { %v1220_v48 = vmul.f32 %v1218_v45, %v1186_v19 }
 0x5c8   : > { %v1225_v49 = vmul.f32 %v1885_v43, %v1220_v48 }
 0x5ca   : > { %v1230_v51 = vadd.f32 %v1886_v46, %v1225_v49 }
 0x5cc   : > { %v1252_v52 = vpack.c.bf16 %v1230_v51, %v1229_v50 }
 0x5ce   : > { %1778 = vmatmul.msk.bf16.vlgmr.msra.gmra.mxu3 %vm839_vm1, %v1252_v52 }
 0x651   : > { %v1280_v57 = vpop.f32.mrf.mxu3 }
 0x652   : > { %v1281_v59 = vadd.f32 %v1887_v58, %v1280_v57 }
 0x654   : > { %v1285_v62 = vmax.f32 %v1281_v59, 0.0 }
 0x659   : > { %v1282_v60 = vpop.f32.mrf.mxu3 }
 0x65a   : > { %v1283_v61 = vadd.f32 %v1887_v58, %v1282_v60 }
 0x65c   : > { %v1286_v63 = vmax.f32 %v1283_v61, 0.0 }
 0x65e   : > { %v1287_v0 = vpack.c.bf16 %v1286_v63, %v1285_v62 }
 0x660   : > { %1795 = vmatmul.msk.bf16.vlgmr.msrb.gmra.mxu0 %vm1315_vm14, %v1287_v0 }
 0x6dd   : > { %v1328_v2 = vpop.f32.mrf.mxu0 }
 0x6de   : > { %v1329_v5 = vadd.f32 %v1888_v1, %v1328_v2 }
 0x6e0   : > { %v1333_v6 = vadd.f32 %v1329_v5, %v1229_v50 }
 0x6e2   : > { %v1335_v7 = vsel %vm839_vm1, %v1333_v6, 0.0 }
 0x6e3   : > { %1336 = vadd.xlane.f32.xlu1 %v1335_v7 }
 0x6e5   : > { %v1330_v8 = vpop.f32.mrf.mxu0 }
 0x6e6   : > { %v1331_v9 = vadd.f32 %v1888_v1, %v1330_v8 }
 0x6e8   : > { %v1334_v10 = vadd.f32 %v1331_v9, %v1230_v51 }
 0x6ea   : > { %v1338_v11 = vsel %vm839_vm1, %v1334_v10, 0.0 }
 0x6eb   : > { %1339 = vadd.xlane.f32.xlu0 %v1338_v11 }
 0x756   : > { %v1337_v12 = vpop.xlane.xlu1 %1336 }
 0x757   : > { %v1341_v13 = vmul.f32 %v1337_v12, %v2201_v3 }
 0x759   : > { %v1343_v14 = vsub.f32 %v1333_v6, %v1341_v13 }
 0x75b   : > { %v1345_v15 = vmul.f32 %v1343_v14, %v1343_v14 }
 0x75d   : > { %v1347_v4 = vsel %vm839_vm1, %v1345_v15, 0.0 }
 0x75e   : > { %v1340_v16 = vpop.xlane.xlu0 %1339  ;;  %1348 = vadd.xlane.f32.xlu1 %v1347_v4 }
 0x75f   : > { %v1342_v17 = vmul.f32 %v1340_v16, %v2201_v3 }
 0x761   : > { %v1344_v18 = vsub.f32 %v1334_v10, %v1342_v17 }
 0x763   : > { %v1346_v19 = vmul.f32 %v1344_v18, %v1344_v18 }
 0x765   : > { %v1350_v20 = vsel %vm839_vm1, %v1346_v19, 0.0 }
 0x766   : > { %1351 = vadd.xlane.f32.xlu0 %v1350_v20 }
 0x7d1   : > { %v1349_v21 = vpop.xlane.xlu1 %1348 }
 0x7d2   : > { %v1353_v22 = vmul.f32 %v1349_v21, %v2201_v3 }
 0x7d4   : > { %v1355_v23 = vadd.f32 1e-05, %v1353_v22 }
 0x7d6   : > { %1913 = vrsqrt.f32 %v1355_v23  ;;  %vm1363_vm0 = vweird.f32 %v1355_v23 }
 0x7d9   : > { %v1352_v24 = vpop.xlane.xlu0 %1351 }
 0x7da   : > { %v1354_v25 = vmul.f32 %v1352_v24, %v2201_v3 }
 0x7dc   : > { %v1914_v26 = vpop.eup %1913  ;;  %v1356_v27 = vadd.f32 1e-05, %v1354_v25 }
 0x7dd   : > { %v1358_v28 = vmul.f32 %v1914_v26, %v1355_v23  ;;  %vm1364_vm15 = vweird.f32 %v1914_v26 }
 0x7de   : > { %1915 = vrsqrt.f32 %v1356_v27  ;;  %vm1365_vm2 = vmor %vm1363_vm0, %vm1364_vm15  ;;  %vm1373_vm4 = vweird.f32 %v1356_v27 }
 0x7df   : > { %v1359_v29 = vmul.f32 %v1914_v26, %v1358_v28 }
 0x7e1   : > { %v1360_v31 = vmul.f32 0.5, %v1359_v29 }
 0x7e3   : > { %v1361_v32 = vsub.f32 1.5, %v1360_v31 }
 0x7e4   : > { %v1916_v33 = vpop.eup %1915 }
 0x7e5   : > { %v1362_v34 = vmul.f32 %v1914_v26, %v1361_v32  ;;  %v1368_v35 = vmul.f32 %v1916_v33, %v1356_v27  ;;  %vm1374_vm3 = vweird.f32 %v1916_v33 }
 0x7e6   : > { %vm1375_vm5 = vmor %vm1373_vm4, %vm1374_vm3 }
 0x7e7   : > { %v1366_v37 = vsel %vm1365_vm2, %v1914_v26, %v1362_v34  ;;  %v1369_v38 = vmul.f32 %v1916_v33, %v1368_v35 }
 0x7e8   : > { %v1377_v40 = vmul.f32 %v1366_v37, %v1343_v14 }
 0x7e9   : > { %v1370_v41 = vmul.f32 0.5, %v1369_v38 }
 0x7ea   : > { %v1382_v42 = vmul.f32 %v1889_v36, %v1377_v40 }
 0x7eb   : > { %v1371_v43 = vsub.f32 1.5, %v1370_v41 }
 0x7ec   : > { %v1387_v30 = vadd.f32 %v1890_v39, %v1382_v42 }
 0x7ed   : > { %v1372_v44 = vmul.f32 %v1916_v33, %v1371_v43 }
 0x7ee   : > { %1389 = vst.msk [vmem:[#allocation2] sm:$0xff] %vm839_vm1, %v1387_v30 }
 0x7ef   : > { %1391 = vst.msk [vmem:[%s2366_s1] sm:$0xff] %vm839_vm1, %v1387_v30  ;;  %v1376_v45 = vsel %vm1375_vm5, %v1916_v33, %v1372_v44  ;;  %s2373_s1 = sld [smem:[#allocation15_spill]] (!%p1796_p5) }
 0x7f0   : > { %v1378_v46 = vmul.f32 %v1376_v45, %v1344_v18 }
 0x7f2   : > { %v1383_v47 = vmul.f32 %v1889_v36, %v1378_v46 }
 0x7f3   : > { %1396 = sbr.rel (%p1796_p5) target bundleno = 2574 (0xa0e), region = 100 }
 0x7f4   : > { %v1388_v48 = vadd.f32 %v1890_v39, %v1383_v47 }
 0x7f6   : > { %1390 = vst.msk [vmem:[#allocation2 + $0x8] sm:$0xff] %vm839_vm1, %v1388_v48 }
 0x7f7   : > { %1392 = vst.msk [vmem:[%s2367_s28 + $0x8] sm:$0xff] %vm839_vm1, %v1388_v48 }
 0x7f8   : > { %v1856_v49 = vld [vmem:[%s2369_s4 + $0x8] sm:$0xff]  ;;  %v1397_v50 = vpack.c.bf16 %v1387_v30, %v1387_v30  ;;  %v1398_v51 = vpack.c.bf16 %v1388_v48, %v1388_v48  ;;  %v1864_v52 = vld [vmem:[%s2370_s16 + $0x38] sm:$0xff]  ;;  %v1855_v53 = vld [vmem:[%s2369_s4] sm:$0xff]  ;;  %vm1412_vm6 = vcmask 1041409  }
 0x7f9   : > { %1436 = vmatpush.bf16.msra.mxu0 %v1856_v49  ;;  %1513 = vmatpush.bf16.msra.mxu1 %v1864_v52  ;;  %v1863_v56 = vld [vmem:[%s2370_s16 + $0x30] sm:$0xff]  ;;  %v1862_v59 = vld [vmem:[%s2370_s16 + $0x28] sm:$0xff]  ;;  %v1861_v61 = vld [vmem:[%s2370_s16 + $0x20] sm:$0xff] }
 0x7fa   : > { %v1409_v54 = vunpack.c.l.b16 %v1397_v50  ;;  %v1410_v55 = vunpack.c.l.b16 %v1398_v51  ;;  %v1860_v62 = vld [vmem:[%s2370_s16 + $0x18] sm:$0xff]  ;;  %v1859_v63 = vld [vmem:[%s2370_s16 + $0x10] sm:$0xff]  ;;  %v1858_v0 = vld [vmem:[%s2370_s16 + $0x8] sm:$0xff] }
 0x7fb   : > { %v1857_v1 = vld [vmem:[%s2370_s16] sm:$0xff] }
 0x7fc   : > { %v1411_v57 = vrot.slane %v1410_v55, 7  ;;  %v1917_v2 = vld [vmem:[%s2371_s15] ss:$0 sm:$0xff] }
 0x7fd   : > { %1437 = vmatpush.bf16.msra.mxu0 %v1855_v53  ;;  %1514 = vmatpush.bf16.msra.mxu1 %v1863_v56  ;;  %v1918_v10 = vld [vmem:[%s2372_s26] ss:$0 sm:$0xff] }
 0x7fe   : > { %v1413_v58 = vsel %vm1412_vm6, %v1411_v57, %v1409_v54 }
 0x7ff   : > { %v1414_v60 = vpack.c.b16 %v1413_v58, %v1413_v58 }
 0x801   : > { %1805 = vmatmul.msk.bf16.vlgmr.msra.gmra.mxu0 %vm839_vm1, %v1414_v60  ;;  %1515 = vmatpush.bf16.msra.mxu1 %v1862_v59  ;;  %vm1526_vm1 = vcmask 254976  }
 0x805   : > { %1516 = vmatpush.bf16.msra.mxu1 %v1861_v61 }
 0x809   : > { %1517 = vmatpush.bf16.msra.mxu1 %v1860_v62 }
 0x80d   : > { %1518 = vmatpush.bf16.msra.mxu1 %v1859_v63 }
 0x811   : > { %1519 = vmatpush.bf16.msra.mxu1 %v1858_v0 }
 0x815   : > { %1520 = vmatpush.bf16.msra.mxu1 %v1857_v1 }
 0x87e   : > { %v1439_v5 = vpop.f32.mrf.mxu0 }
 0x87f   : > { %v1440_v6 = vadd.f32 %v1917_v2, %v1439_v5 }
 0x881   : > { %v1443_v7 = vmax.f32 %v1440_v6, 0.0 }
 0x883   : > { %v1444_v8 = vpack.c.bf16 %v1443_v7, %v1443_v7 }
 0x885   : > { %1521 = vmatmul.bf16.vlgmr.msra.gmra.mxu1 %v1444_v8 }
 0x886   : > { %v1441_v9 = vpop.f32.mrf.mxu0 }
 0x902   : > { %v1522_v11 = vpop.f32.mrf.mxu1 }
 0x903   : > { %v1523_v12 = vadd.f32 %v1918_v10, %v1522_v11 }
 0x905   : > { %v1527_v13 = vsel %vm1526_vm1, %v1523_v12, 0.0 }
 0x906   : > { %1528 = vadd.xlane.f32.xlu0 %v1527_v13 }
 0x90a   : > { %v1524_v14 = vpop.f32.mrf.mxu1 }
 0x979   : > { %v1529_v15 = vpop.xlane.xlu0 %1528 }
 0x97a   : > { %v1530_v4 = vmul.f32 %v1529_v15, %v2201_v3 }
 0x97c   : > { %v1531_v16 = vsub.f32 %v1523_v12, %v1530_v4 }
 0x97e   : > { %v1532_v17 = vmul.f32 %v1531_v16, %v1531_v16 }
 0x980   : > { %v1533_v18 = vsel %vm1526_vm1, %v1532_v17, 0.0 }
 0x981   : > { %1534 = vadd.xlane.f32.xlu0 %v1533_v18 }
 0x9f4   : > { %v1535_v19 = vpop.xlane.xlu0 %1534 }
 0x9f5   : > { %v1536_v20 = vmul.f32 %v1535_v19, %v2201_v3 }
 0x9f7   : > { %v1537_v21 = vadd.f32 1e-05, %v1536_v20 }
 0x9f9   : > { %1919 = vrsqrt.f32 %v1537_v21  ;;  %vm1544_vm8 = vweird.f32 %v1537_v21 }
 0x9ff   : > { %v1920_v22 = vpop.eup %1919 }
 0xa00   : > { %v1539_v23 = vmul.f32 %v1920_v22, %v1537_v21  ;;  %vm1545_vm7 = vweird.f32 %v1920_v22 }
 0xa01   : > { %vm1546_vm9 = vmor %vm1544_vm8, %vm1545_vm7 }
 0xa02   : > { %v1540_v24 = vmul.f32 %v1920_v22, %v1539_v23 }
 0xa04   : > { %v1541_v25 = vmul.f32 0.5, %v1540_v24 }
 0xa06   : > { %v1542_v26 = vsub.f32 1.5, %v1541_v25 }
 0xa08   : > { %v1543_v27 = vmul.f32 %v1920_v22, %v1542_v26 }
 0xa0a   : > { %v1547_v28 = vsel %vm1546_vm9, %v1920_v22, %v1543_v27 }
 0xa0b   : > { %v1548_v29 = vmul.f32 %v1547_v28, %v1531_v16 }
 0xa0d   : > { %1549 = vst.msk [vmem:[%s2373_s1] sm:$0x3] %vm1526_vm1, %v1548_v29 }
 0xa0e PF: > { %s2374_s18 = sld [smem:[#allocation3_spill]] }
 0xa14   : > { %s31_s1 = sadd.s32 1, %s2374_s18  }
 0xa15   : > { %p28_p6 = scmp.ge.s32.totalorder %s31_s1, 4  }
 0xa17   :  { %30 = sbr.rel (!%p28_p6) target bundleno = 12 (0xc), region = 180 }

// kernel: sentence_aware_forward.3
= control target key start
LH: loop header
LB: loop body
LE: loop exit
PB: predicated region body
PF: predicated region fallthrough
CT: control target
= control target key end

     0   :  { %s3606_s0 = inlined_call_operand.vmem [shape: f32[2,8,32], index: 0, kind: input, shape index: {}]   ;;  %s3607_s1 = inlined_call_operand.vmem [shape: f32[2,8,32], index: 1, kind: input, shape index: {}]   ;;  %s3608_s2 = inlined_call_operand.vmem [shape: f32[2,8,32], index: 2, kind: input, shape index: {}]   ;;  %s3609_s3 = inlined_call_operand.vmem [shape: f32[2,8,8], index: 3, kind: input, shape index: {}]   ;;  %s3610_s4 = inlined_call_operand.vmem [shape: f32[2,8,8], index: 4, kind: input, shape index: {}]   ;;  %s3611_s5 = inlined_call_operand.vmem [shape: bf16[2,3,32,96], index: 5, kind: input, shape index: {}]   ;;  %s3612_s6 = inlined_call_operand.vmem [shape: f32[2,3,1,96], index: 6, kind: input, shape index: {}]   ;;  %s3613_s7 = inlined_call_operand.vmem [shape: bf16[2,3,32,32], index: 7, kind: input, shape index: {}]   ;;  %s3614_s8 = inlined_call_operand.vmem [shape: f32[2,3,1,32], index: 8, kind: input, shape index: {}]   ;;  %s3615_s9 = inlined_call_operand.vmem [shape: f32[2,3,1,32], index: 9, kind: input, shape index: {}]   ;;  %s3616_s10 = inlined_call_operand.vmem [shape: f32[2,3,1,32], index: 10, kind: input, shape index: {}]   ;;  %s3617_s11 = inlined_call_operand.vmem [shape: bf16[2,32,64], index: 11, kind: input, shape index: {}]   ;;  %s3618_s12 = inlined_call_operand.vmem [shape: f32[2,1,64], index: 12, kind: input, shape index: {}]   ;;  %s3619_s13 = inlined_call_operand.vmem [shape: bf16[2,64,32], index: 13, kind: input, shape index: {}]   ;;  %s3620_s14 = inlined_call_operand.vmem [shape: f32[2,1,32], index: 14, kind: input, shape index: {}]   ;;  %s3621_s15 = inlined_call_operand.vmem [shape: f32[2,1,32], index: 15, kind: input, shape index: {}]   ;;  %s3622_s16 = inlined_call_operand.vmem [shape: f32[2,1,32], index: 16, kind: input, shape index: {}]   ;;  %s3623_s17 = inlined_call_operand.vmem [shape: bf16[32,128], index: 17, kind: input, shape index: {}]   ;;  %s3624_s18 = inlined_call_operand.hbm [shape: f32[2,8,128], index: 18, kind: output, shape index: {0}]   ;;  %s3625_s19 = inlined_call_operand.vmem [shape: f32[2,2,8,128], index: 19, kind: output, shape index: {1}]   ;;  %s3626_s20 = inlined_call_operand.vmem [shape: f32[2,2,2,8,8], index: 20, kind: output, shape index: {2}]   ;;  %s3627_s21 = inlined_call_operand.vmem [shape: f32[2,2,2,8,8], index: 21, kind: output, shape index: {3}]  }
   0x1   :  { %3636 = sst [smem:[#allocation8_spill]] %s3606_s0 }
   0x2   :  { %3637 = sst [smem:[#allocation9_spill]] %s3607_s1 }
   0x3   :  { %3638 = sst [smem:[#allocation10_spill]] %s3608_s2 }
   0x4   :  { %3639 = sst [smem:[#allocation11_spill]] %s3609_s3 }
   0x5   :  { %3640 = sst [smem:[#allocation12_spill]] %s3610_s4 }
   0x6   :  { %3641 = sst [smem:[#allocation13_spill]] %s3611_s5 }
   0x7   :  { %3642 = sst [smem:[#allocation14_spill]] %s3612_s6 }
   0x8   :  { %3643 = sst [smem:[#allocation15_spill]] %s3613_s7 }
   0x9   :  { %3644 = sst [smem:[#allocation16_spill]] %s3614_s8 }
   0xa   :  { %3645 = sst [smem:[#allocation17_spill]] %s3615_s9 }
   0xb   :  { %3646 = sst [smem:[#allocation18_spill]] %s3616_s10 }
   0xc   :  { %3647 = sst [smem:[#allocation19_spill]] %s3617_s11 }
   0xd   :  { %3648 = sst [smem:[#allocation20_spill]] %s3618_s12 }
   0xe   :  { %3649 = sst [smem:[#allocation21_spill]] %s3619_s13 }
   0xf   :  { %3650 = sst [smem:[#allocation22_spill]] %s3620_s14 }
  0x10   :  { %3651 = sst [smem:[#allocation23_spill]] %s3623_s17 }
  0x11   :  { %3652 = sst [smem:[#allocation24_spill]] %s3624_s18 }
  0x12   :  { %3653 = sst [smem:[#allocation25_spill]] %s3626_s20 }
  0x13   :  { %3654 = sst [smem:[#allocation26_spill]] %s3627_s21 }
  0x14   :  { %27 = vsyncpa [#allocation4], 0  ;;  %s3101_s2 = smov 0  }
  0x15 LB: > { %3655 = sst [smem:[#allocation6_spill]] %s2980_s2  ;;  %s3107_s25 = sadd.s32 4294967295, %s2980_s2   ;;  %s2980_s2 = sphi %s3101_s2, %s33_s2  }
  0x16   : > { %3656 = sst [smem:[#allocation7_spill]] %s3107_s25  ;;  %p2632_p0 = scmp.ge.s32.totalorder %s2980_s2, 1 }
  0x17   : > { %p688_p1 = scmp.lt.s32.totalorder %s2980_s2, 3 }
  0x19   : > { %p689_p2 = pnand %p2632_p0, %p688_p1 }
  0x1a   : > { %p801_p3 = scmp.lt.s32.totalorder (!%p689_p2), %s3107_s25, 1  ;;  %s3657_s11 = sld [smem:[#allocation19_spill]] (!%p689_p2) }
  0x1b   : > { %692 = sbr.rel (%p689_p2) target bundleno = 4174 (0x104e), region = 92  ;;  %s3658_s22 = sld [smem:[#allocation13_spill]] (!%p689_p2) }
  0x1c   : > { %s3659_s7 = sld [smem:[#allocation15_spill]] (!%p689_p2) }
  0x1d   : > { %s3660_s6 = sld [smem:[#allocation14_spill]] (!%p689_p2) }
  0x1e   : > { %s3661_s8 = sld [smem:[#allocation16_spill]] (!%p689_p2) }
  0x1f   : > { %s3662_s9 = sld [smem:[#allocation17_spill]] (!%p689_p2) }
  0x20   : > { %s3113_s26 = scalar_select %p801_p3, %s3107_s25, 1 }
  0x21   : > { %s3663_s10 = sld [smem:[#allocation18_spill]] }
  0x22   : > { %s2820_s27 = smul.u32 48, %s3113_s26  ;;  %s2795_s3 = sshll.u32 %s3113_s26, 4 }
  0x23   : > { %s2821_s28 = smul.u32 3, %s3113_s26  ;;  %s3121_s4 = scalar_lea.vmem %s3657_s11, %s2795_s3 }
  0x24   : > { %s3126_s23 = scalar_lea.vmem %s3658_s22, %s2820_s27  ;;  %s3131_s2 = scalar_lea.vmem %s3659_s7, %s2820_s27 }
  0x25   : > { %s3136_s25 = scalar_lea.vmem %s3660_s6, %s2821_s28  ;;  %s3141_s29 = scalar_lea.vmem %s3661_s8, %s2821_s28 }
  0x26   : > { %s3146_s30 = scalar_lea.vmem %s3662_s9, %s2821_s28  ;;  %s2796_s18 = sshll.u32 %s3113_s26, 5 }
  0x27   : > { %s3151_s27 = scalar_lea.vmem %s3663_s10, %s2821_s28  ;;  %s3665_s13 = sld [smem:[#allocation21_spill]] }
  0x28   : > { %s845_s5 = scalar_lea.vmem %s3621_s15, %s3113_s26  ;;  %s848_s10 = scalar_lea.vmem %s3622_s16, %s3113_s26 }
  0x29   : > { %s3178_s17 = scalar_lea.vmem %s3625_s19, %s2795_s3  ;;  %s3668_s11 = sld [smem:[#allocation26_spill]] }
  0x2a   : > { %s3669_s9 = sld [smem:[#allocation7_spill]] }
  0x2d   : > { %s3161_s20 = scalar_lea.vmem %s3665_s13, %s2796_s18  ;;  %s3667_s13 = sld [smem:[#allocation25_spill]] }
  0x2f   : > { %s3188_s14 = scalar_lea.vmem %s3668_s11, %s2796_s18 }
  0x30   : > { %p2645_p4 = scmp.ne.s32.totalorder %s3669_s9, 0 }
  0x31   : > { %s3670_s22 = sld [smem:[#allocation8_spill]] (!%p2645_p4) }
  0x32   : > { %868 = sbr.rel (%p2645_p4) target bundleno = 58 (0x3a), region = 96 }
  0x33   : > { %s3183_s12 = scalar_lea.vmem %s3667_s13, %s2796_s18 }
  0x37   : > { %v869_v0 = vld [vmem:[%s3670_s22] sm:$0xff]  ;;  %vm871_vm0 = vcmask 261120   ;;  %v870_v1 = vld [vmem:[%s3670_s22 + $0x8] sm:$0xff] }
  0x38   : > { %872 = vst.msk [vmem:[#allocation2] sm:$0xff] %vm871_vm0, %v869_v0 }
  0x39   : > { %873 = vst.msk [vmem:[#allocation2 + $0x8] sm:$0xff] %vm871_vm0, %v870_v1 }
  0x3a PF: > { %v2801_v2 = vld [vmem:[%s3126_s23 + $0x8] sm:$0xff]  ;;  %s2982_s13 = smov 96   ;;  %v2800_v5 = vld [vmem:[%s3126_s23] sm:$0xff]  ;;  %vm910_vm1 = vcmask 261120   ;;  %s2983_s18 = smov 112   ;;  %vm955_vm2 = vcmask 130048  }
  0x3b   : > { %930 = vrot.lane.b32.xlu0 %v2801_v2, %s2982_s13  ;;  %920 = vmatpush.bf16.msra.mxu0 %v2801_v2  ;;  %v2860_v7 = vld [vmem:[%s3136_s25] ss:$0 sm:$0xff]  ;;  %s3671_s6 = sld [smem:[#allocation11_spill]]  ;;  %vm1000_vm4 = vcmask 64512   ;;  %vm1033_vm6 = vcmask 1043456   ;;  %s2984_s21 = smov 80  }
  0x3c   : > { %934 = vrot.lane.b32.xlu1 %v2860_v7, %s2982_s13  ;;  %s3672_s28 = sld [smem:[#allocation10_spill]] }
  0x3d   : > { %s3673_s24 = sld [smem:[#allocation9_spill]] }
  0x3e   : > { %s3674_s0 = sld [smem:[#allocation12_spill]] }
  0x3f   : > { %v3198_v3 = vld [vmem:[#allocation2] sm:$0xff]  ;;  %921 = vmatpush.bf16.msra.mxu0 %v2800_v5 }
  0x40   : > { %v3200_v4 = vld [vmem:[#allocation2 + $0x8] sm:$0xff] }
  0x41   : > { %v3206_v6 = vpack.c.bf16 %v3200_v4, %v3198_v3  ;;  %v3244_v39 = vld [vmem:[%s3671_s6] sm:$0xff]  ;;  %v3253_v44 = vld [vmem:[%s3671_s6 + $0x8] sm:$0xff] }
  0x42   : > { %vm996_vm3 = vcmp.gt.f32.partialorder %v3244_v39, 0.0  ;;  %vm997_vm5 = vcmp.gt.f32.partialorder %v3253_v44, 0.0 }
  0x43   : > { %2654 = vmatmul.msk.bf16.vlgmr.msra.gmra.mxu0 %vm910_vm1, %v3206_v6  ;;  %928 = vrot.lane.b32.xlu0 %v2800_v5, %s2982_s13 }
  0xad   : > { %v931_v8 = vpop.permute.xlu0 %930 }
  0xae   : > { %943 = vmatpush.bf16.msra.mxu1 %v931_v8  ;;  %v935_v17 = vpop.permute.xlu1 %934 }
  0xb5   : > { %v929_v9 = vpop.permute.xlu0 %928 }
  0xb6   : > { %944 = vmatpush.bf16.msra.mxu1 %v929_v9 }
  0xb9   : > { %2655 = vmatmul.msk.bf16.vlgmr.msra.gmra.mxu1 %vm910_vm1, %v3206_v6 }
  0xc0   : > { %v923_v10 = vpop.f32.mrf.mxu0 }
  0xc1   : > { %v924_v11 = vadd.f32 %v2860_v7, %v923_v10 }
  0xc3   : > { %v951_v25 = vpack.c.bf16 %v924_v11, %v924_v11 }
  0xc5   : > { %v1075_v31 = vunpack.c.l.b16 %v951_v25 }
  0xc7   : > { %v1076_v32 = vpack.c.b16 %v1075_v31, %v1075_v31 }
  0xc8   : > { %v925_v12 = vpop.f32.mrf.mxu0 }
  0xc9   : > { %v926_v13 = vadd.f32 %v2860_v7, %v925_v12  ;;  %v2805_v12 = vld [vmem:[%s3126_s23 + $0x18] sm:$0xff] }
  0xcb   : > { %v952_v14 = vpack.c.bf16 %v926_v13, %v926_v13  ;;  %v2804_v13 = vld [vmem:[%s3126_s23 + $0x10] sm:$0xff] }
  0xcd   : > { %v1101_v15 = vunpack.c.l.b16 %v952_v14 }
  0xcf   : > { %v1102_v16 = vpack.c.b16 %v1101_v15, %v1101_v15 }
  0xd1   : > { %1103 = vrot.lane.b32.xlu0 %v1102_v16, %s2983_s18 }
 0x136   : > { %v946_v18 = vpop.f32.mrf.mxu1 }
 0x137   : > { %v3216_v19 = vadd.f32 %v946_v18, %v935_v17 }
 0x139   : > { %v953_v20 = vpack.c.bf16 %v3216_v19, %v3216_v19 }
 0x13b   : > { %v960_v21 = vsel %vm955_vm2, %v953_v20, 0  ;;  %v1026_v22 = vunpack.c.l.b16 %v953_v20 }
 0x13c   : > { %969 = vmatpush.bf16.xpose.msra.mxu2 %v960_v21 }
 0x13d   : > { %v3221_v23 = vpack.c.b16 %v1026_v22, %v1026_v22 }
 0x13e   : > { %v948_v24 = vpop.f32.mrf.mxu1 }
 0x13f   : > { %v3223_v26 = vadd.f32 %v948_v24, %v935_v17  ;;  %1079 = vrot.lane.b32.xlu1 %v3221_v23, %s2983_s18 }
 0x141   : > { %v954_v27 = vpack.c.bf16 %v3223_v26, %v3223_v26 }
 0x143   : > { %2656 = vmatmul.msk.bf16.vlgmr.msra.gmra.mxu2 %vm955_vm2, %v951_v25  ;;  %v979_v28 = vsel %vm955_vm2, %v954_v27, 0  ;;  %v1051_v29 = vunpack.c.l.b16 %v954_v27  ;;  %v1104_v35 = vpop.permute.xlu0 %1103 }
 0x144   : > { %988 = vmatpush.bf16.xpose.msra.mxu3 %v979_v28 }
 0x145   : > { %v3231_v30 = vpack.c.b16 %v1051_v29, %v1051_v29 }
 0x147   : > { %1105 = vrot.lane.b32.xlu2 %v3231_v30, %s2983_s18 }
 0x14b   : > { %2657 = vmatmul.msk.bf16.vlgmr.msra.gmra.mxu3 %vm955_vm2, %v952_v14 }
 0x14f   : > { %1077 = vrot.lane.b32.xlu2 %v1076_v32, %s2983_s18 }
 0x1a1   : > { %v1106_v33 = vpop.permute.xlu2 %1105 }
 0x1a2   : > { %v1111_v34 = vsel %vm955_vm2, %v1106_v33, 0 }
 0x1a3   : > { %1120 = vmatpush.bf16.xpose.msrb.mxu3 %v1111_v34 }
 0x1a9   : > { %v1078_v38 = vpop.permute.xlu2 %1077 }
 0x1aa   : > { %2661 = vmatmul.msk.bf16.vlgmr.msrb.gmra.mxu3 %vm955_vm2, %v1104_v35 }
 0x1ab   : > { %1347 = vmatpush.bf16.msra.mxu3 %v2805_v12 }
 0x1af   : > { %1348 = vmatpush.bf16.msra.mxu3 %v2804_v13 }
 0x1b1   : > { %v1080_v36 = vpop.permute.xlu1 %1079 }
 0x1b2   : > { %v1085_v37 = vsel %vm955_vm2, %v1080_v36, 0 }
 0x1b3   : > { %1094 = vmatpush.bf16.xpose.msrb.mxu2 %v1085_v37 }
 0x1ba   : > { %2660 = vmatmul.msk.bf16.vlgmr.msrb.gmra.mxu2 %vm955_vm2, %v1078_v38 }
 0x1c6   : > { %v971_v40 = vpop.f32.mrf.mxu2 }
 0x1c7   : > { %v994_v41 = vmul.f32 0.25, %v971_v40 }
 0x1c9   : > { %v998_v42 = vsel %vm996_vm3, -1e+30, %v994_v41 }
 0x1ca   : > { %v1001_v43 = vsel %vm1000_vm4, %v998_v42, -inf }
 0x1cb   : > { %1002 = vmax.xlane.f32.xlu1 %v1001_v43  ;;  %v3298_v43 = vld [vmem:[%s3672_s28 + $0x8] sm:$0xff] }
 0x1ce   : > { %v973_v45 = vpop.f32.mrf.mxu2  ;;  %v990_v46 = vpop.f32.mrf.mxu3 }
 0x1cf   : > { %v995_v47 = vmul.f32 0.25, %v990_v46  ;;  %v2861_v46 = vld [vmem:[%s3136_s25 + $0x1] ss:$0 sm:$0xff] }
 0x1d1   : > { %v999_v48 = vsel %vm997_vm5, -1e+30, %v995_v47 }
 0x1d2   : > { %v1004_v49 = vsel %vm1000_vm4, %v999_v48, -inf }
 0x1d3   : > { %1005 = vmax.xlane.f32.xlu2 %v1004_v49 }
 0x1d6   : > { %v992_v50 = vpop.f32.mrf.mxu3 }
 0x1e4   : > { %1053 = vrot.lane.b32.xlu1 %v3231_v30, %s2982_s13 }
 0x22d   : > { %v1122_v51 = vpop.f32.mrf.mxu3 }
 0x22e   : > { %v1127_v52 = vmul.f32 0.25, %v1122_v51 }
 0x230   : > { %v1129_v53 = vsel %vm997_vm5, -1e+30, %v1127_v52 }
 0x231   : > { %v1133_v54 = vsel %vm1000_vm4, %v1129_v53, -inf }
 0x232   : > { %1134 = vmax.xlane.f32.xlu2 %v1133_v54 }
 0x235   : > { %v1124_v55 = vpop.f32.mrf.mxu3 }
 0x23d   : > { %v1096_v56 = vpop.f32.mrf.mxu2 }
 0x23e   : > { %v1126_v57 = vmul.f32 0.25, %v1096_v56  ;;  %v1003_v58 = vpop.xlane.xlu1 %1002 }
 0x23f   : > { %v1007_v59 = vsub.f32 %v998_v42, %v1003_v58  ;;  %v3293_v42 = vld [vmem:[%s3672_s28] sm:$0xff] }
 0x240   : > { %v1128_v60 = vsel %vm996_vm3, -1e+30, %v1126_v57  ;;  %v1322_v45 = vpack.c.bf16 %v3298_v43, %v3293_v42 }
 0x241   : > { %v1009_v61 = vmul.f32 1.442695, %v1007_v59  ;;  %v1130_v62 = vsel %vm1000_vm4, %v1128_v60, -inf }
 0x242   : > { %1131 = vmax.xlane.f32.xlu0 %v1130_v62  ;;  %2693 = vmatmul.msk.bf16.vlgmr.msra.gmra.mxu3 %vm910_vm1, %v1322_v45 }
 0x243   : > { %2876 = vpow2.f32 %v1009_v61 }
 0x245   : > { %v1098_v63 = vpop.f32.mrf.mxu2 }
 0x246   : > { %v1006_v0 = vpop.xlane.xlu2 %1005 }
 0x247   : > { %v1008_v1 = vsub.f32 %v999_v48, %v1006_v0  ;;  %v2802_v0 = vld [vmem:[%s3131_s2] sm:$0xff] }
 0x249   : > { %v2877_v2 = vpop.eup %2876  ;;  %v1011_v5 = vmul.f32 1.442695, %v1008_v1 }
 0x24a   : > { %v1013_v7 = vsel %vm1000_vm4, %v2877_v2, 0.0 }
 0x24b   : > { %2878 = vpow2.f32 %v1011_v5  ;;  %1014 = vadd.xlane.f32.xlu1 %v1013_v7 }
 0x251   : > { %v2879_v8 = vpop.eup %2878 }
 0x252   : > { %v1016_v9 = vsel %vm1000_vm4, %v2879_v8, 0.0 }
 0x253   : > { %1017 = vadd.xlane.f32.xlu2 %v1016_v9 }
 0x256   : > { %v1054_v10 = vpop.permute.xlu1 %1053  ;;  %1028 = vrot.lane.b32.xlu0 %v3221_v23, %s2982_s13 }
 0x257   : > { %v1059_v11 = vsel %vm1033_vm6, %v1054_v10, 0 }
 0x258   : > { %1068 = vmatpush.bf16.msrb.mxu1 %v1059_v11 }
 0x25e   : > { %1154 = vrot.lane.b32.xlu0 %v3221_v23, %s2984_s21 }
 0x264   : > { %1357 = vrot.lane.b32.xlu1 %v2805_v12, %s2982_s13 }
 0x266   : > { %1355 = vrot.lane.b32.xlu0 %v2804_v13, %s2982_s13 }
 0x26c   : > { %1361 = vrot.lane.b32.xlu1 %v2861_v46, %s2982_s13 }
 0x2a5   : > { %v1135_v14 = vpop.xlane.xlu2 %1134 }
 0x2a6   : > { %v1137_v17 = vsub.f32 %v1129_v53, %v1135_v14 }
 0x2a8   : > { %v1140_v20 = vmul.f32 1.442695, %v1137_v17 }
 0x2b5   : > { %v1132_v15 = vpop.xlane.xlu0 %1131 }
 0x2b6   : > { %v1136_v16 = vsub.f32 %v1128_v60, %v1132_v15  ;;  %v2803_v60 = vld [vmem:[%s3131_s2 + $0x8] sm:$0xff] }
 0x2b7   : > { %1231 = vmatpush.bf16.msra.mxu2 %v2803_v60 }
 0x2b8   : > { %v1138_v18 = vmul.f32 1.442695, %v1136_v16 }
 0x2ba   : > { %2880 = vpow2.f32 %v1138_v18 }
 0x2bb   : > { %1232 = vmatpush.bf16.msra.mxu2 %v2802_v0 }
 0x2be   : > { %v1015_v21 = vpop.xlane.xlu1 %1014 }
 0x2bf   : > { %2882 = vrcp.f32 %v1015_v21 }
 0x2c0   : > { %v2881_v22 = vpop.eup %2880  ;;  %2884 = vpow2.f32 %v1140_v20 }
 0x2c1   : > { %v1142_v23 = vsel %vm1000_vm4, %v2881_v22, 0.0 }
 0x2c2   : > { %1143 = vadd.xlane.f32.xlu2 %v1142_v23 }
 0x2c5   : > { %v2883_v24 = vpop.eup %2882  ;;  %v1350_v61 = vpop.f32.mrf.mxu3 }
 0x2c6   : > { %v2885_v25 = vpop.eup %2884  ;;  %v1021_v27 = vmul.f32 %v2883_v24, %v2877_v2  ;;  %v1018_v28 = vpop.xlane.xlu2 %1017  ;;  %v1351_v62 = vadd.f32 %v2861_v46, %v1350_v61 }
 0x2c7   : > { %2886 = vrcp.f32 %v1018_v28  ;;  %v1145_v31 = vsel %vm1000_vm4, %v2885_v25, 0.0 }
 0x2c8   : > { %2309 = vst.msk [vmem:[%s3183_s12] sm:$0xff] %vm1000_vm4, %v1021_v27  ;;  %v1029_v29 = vpop.permute.xlu0 %1028  ;;  %v1023_v33 = vpack.c.bf16 %v1021_v27, %v1021_v27  ;;  %v1378_v63 = vpack.c.bf16 %v1351_v62, %v1351_v62 }
 0x2c9   : > { %v1035_v32 = vsel %vm1033_vm6, %v1029_v29, 0 }
 0x2ca   : > { %1146 = vadd.xlane.f32.xlu2 %v1145_v31  ;;  %1044 = vmatpush.bf16.msrb.mxu0 %v1035_v32  ;;  %v1499_v1 = vunpack.c.l.b16 %v1378_v63 }
 0x2cc   : > { %v1500_v2 = vpack.c.b16 %v1499_v1, %v1499_v1 }
 0x2cd   : > { %v2887_v34 = vpop.eup %2886  ;;  %2658 = vmatmul.msk.bf16.vlgmr.msrb.gmra.mxu0 %vm1000_vm4, %v1023_v33  ;;  %v1352_v10 = vpop.f32.mrf.mxu3 }
 0x2ce   : > { %v1022_v35 = vmul.f32 %v2887_v34, %v2879_v8  ;;  %v1353_v14 = vadd.f32 %v2861_v46, %v1352_v10 }
 0x2d0   : > { %2310 = vst.msk [vmem:[%s3183_s12 + $0x8] sm:$0xff] %vm1000_vm4, %v1022_v35  ;;  %v1155_v36 = vpop.permute.xlu0 %1154  ;;  %v1024_v37 = vpack.c.bf16 %v1022_v35, %v1022_v35  ;;  %v1379_v18 = vpack.c.bf16 %v1353_v14, %v1353_v14 }
 0x2d1   : > { %v1160_v38 = vsel %vm1033_vm6, %v1155_v36, 0 }
 0x2d2   : > { %2659 = vmatmul.msk.bf16.vlgmr.msrb.gmra.mxu1 %vm1000_vm4, %v1024_v37  ;;  %1169 = vmatpush.bf16.msra.mxu0 %v1160_v38  ;;  %v1525_v23 = vunpack.c.l.b16 %v1379_v18 }
 0x2d4   : > { %v1526_v27 = vpack.c.b16 %v1525_v23, %v1525_v23 }
 0x2d6   : > { %v1358_v40 = vpop.permute.xlu1 %1357 }
 0x2d7   : > { %1370 = vmatpush.bf16.msrb.mxu0 %v1358_v40 }
 0x2d8   : > { %v1356_v41 = vpop.permute.xlu0 %1355 }
 0x2db   : > { %1371 = vmatpush.bf16.msrb.mxu0 %v1356_v41 }
 0x2e2   : > { %1175 = vrot.lane.b32.xlu2 %v3231_v30, %s2984_s21 }
 0x2ea   : > { %1501 = vrot.lane.b32.xlu2 %v1500_v2, %s2983_s18 }
 0x335   : > { %v1144_v30 = vpop.xlane.xlu2 %1143 }
 0x336   : > { %2888 = vrcp.f32 %v1144_v30 }
 0x33c   : > { %v2889_v47 = vpop.eup %2888 }
 0x33d   : > { %v1150_v48 = vmul.f32 %v2889_v47, %v2881_v22  ;;  %v1147_v49 = vpop.xlane.xlu2 %1146 }
 0x33e   : > { %2890 = vrcp.f32 %v1147_v49 }
 0x33f   : > { %v1152_v50 = vpack.c.bf16 %v1150_v48, %v1150_v48  ;;  %2777 = vst.msk [vmem:[%s3183_s12 + $0x10] sm:$0xff] %vm1000_vm4, %v1150_v48 }
 0x341   : > { %2662 = vmatmul.msk.bf16.vlgmr.msra.gmra.mxu0 %vm1000_vm4, %v1152_v50 }
 0x344   : > { %v2891_v51 = vpop.eup %2890 }
 0x345   : > { %v1151_v52 = vmul.f32 %v2891_v51, %v2885_v25  ;;  %v1176_v53 = vpop.permute.xlu2 %1175 }
 0x346   : > { %v1181_v54 = vsel %vm1033_vm6, %v1176_v53, 0 }
 0x347   : > { %v1153_v55 = vpack.c.bf16 %v1151_v52, %v1151_v52  ;;  %2778 = vst.msk [vmem:[%s3183_s12 + $0x18] sm:$0xff] %vm1000_vm4, %v1151_v52  ;;  %1190 = vmatpush.bf16.msra.mxu1 %v1181_v54  ;;  %s2985_s12 = smov 16   ;;  %v2862_v52 = vld [vmem:[%s3141_s29] ss:$0 sm:$0xff] }
 0x34a   : > { %v1046_v56 = vpop.f32.mrf.mxu0  ;;  %2663 = vmatmul.msk.bf16.vlgmr.msra.gmra.mxu1 %vm1000_vm4, %v1153_v55 }
 0x34d   : > { %v1502_v40 = vpop.permute.xlu2 %1501 }
 0x34f   : > { %v1070_v57 = vpop.f32.mrf.mxu1 }
 0x351   : > { %2694 = vmatmul.msk.bf16.vlgmr.msrb.gmra.mxu0 %vm910_vm1, %v3206_v6  ;;  %v1362_v6 = vpop.permute.xlu1 %1361 }
 0x352   : > { %v1048_v58 = vpop.f32.mrf.mxu0 }
 0x357   : > { %v1072_v59 = vpop.f32.mrf.mxu1 }
 0x3be   : > { %v1171_v5 = vpop.f32.mrf.mxu0 }
 0x3c6   : > { %v1173_v7 = vpop.f32.mrf.mxu0 }
 0x3c7   : > { %v1192_v8 = vpop.f32.mrf.mxu1 }
 0x3c8   : > { %v2845_v9 = vpack.i.bf16 %v1192_v8, %v1171_v5 }
 0x3ca   : > { %2846 = vrot.lane.b32.xlu0 %v2845_v9, %s2985_s12 }
 0x3ce   : > { %v1373_v11 = vpop.f32.mrf.mxu0 }
 0x3cf   : > { %v3318_v12 = vadd.f32 %v1373_v11, %v1362_v6  ;;  %v1194_v13 = vpop.f32.mrf.mxu1 }
 0x3d1   : > { %v1380_v15 = vpack.c.bf16 %v3318_v12, %v3318_v12 }
 0x3d3   : > { %v1386_v16 = vsel %vm955_vm2, %v1380_v15, 0  ;;  %v1451_v17 = vunpack.c.l.b16 %v1380_v15 }
 0x3d4   : > { %1395 = vmatpush.bf16.xpose.msrb.mxu1 %v1386_v16 }
 0x3d5   : > { %v3323_v20 = vpack.c.b16 %v1451_v17, %v1451_v17 }
 0x3d6   : > { %v1375_v21 = vpop.f32.mrf.mxu0 }
 0x3d7   : > { %v3325_v22 = vadd.f32 %v1375_v21, %v1362_v6  ;;  %1503 = vrot.lane.b32.xlu1 %v3323_v20, %s2983_s18 }
 0x3d9   : > { %v1381_v24 = vpack.c.bf16 %v3325_v22, %v3325_v22 }
 0x3db   : > { %2695 = vmatmul.msk.bf16.vlgmr.msrb.gmra.mxu1 %vm955_vm2, %v1378_v63  ;;  %v1405_v25 = vsel %vm955_vm2, %v1381_v24, 0  ;;  %v1475_v28 = vunpack.c.l.b16 %v1381_v24 }
 0x3dc   : > { %1414 = vmatpush.bf16.xpose.msrb.mxu2 %v1405_v25 }
 0x3dd   : > { %v3333_v29 = vpack.c.b16 %v1475_v28, %v1475_v28 }
 0x3df   : > { %1529 = vrot.lane.b32.xlu0 %v3333_v29, %s2983_s18  ;;  %1527 = vrot.lane.b32.xlu1 %v1526_v27, %s2983_s18 }
 0x43c   : > { %v2847_v31 = vpop.permute.xlu0 %2846 }
 0x43d   : > { %v2849_v32 = vunpack.i.h.bf16 %v2847_v31  ;;  %v2848_v33 = vunpack.i.l.bf16 %v2847_v31 }
 0x43f   : > { %v1205_v34 = vsel %vm955_vm2, %v1070_v57, %v2849_v32  ;;  %v1204_v35 = vsel %vm955_vm2, %v1046_v56, %v2848_v33 }
 0x440   : > { %v1206_v36 = vpack.c.bf16 %v1205_v34, %v1204_v35 }
 0x442   : > { %2672 = vmatmul.msk.bf16.vlgmr.msra.gmra.mxu2 %vm910_vm1, %v1206_v36 }
 0x449   : > { %v1504_v37 = vpop.permute.xlu1 %1503 }
 0x44a   : > { %v1509_v38 = vsel %vm955_vm2, %v1504_v37, 0 }
 0x44b   : > { %1518 = vmatpush.bf16.xpose.msra.mxu1 %v1509_v38 }
 0x451   : > { %v1530_v41 = vpop.permute.xlu0 %1529  ;;  %v1528_v50 = vpop.permute.xlu1 %1527 }
 0x452   : > { %v1535_v45 = vsel %vm955_vm2, %v1530_v41, 0  ;;  %2696 = vmatmul.msk.bf16.vlgmr.msrb.gmra.mxu2 %vm955_vm2, %v1379_v18  ;;  %2699 = vmatmul.msk.bf16.vlgmr.msra.gmra.mxu1 %vm955_vm2, %v1502_v40 }
 0x453   : > { %1544 = vmatpush.bf16.xpose.msra.mxu2 %v1535_v45 }
 0x458   : > { %v1397_v30 = vpop.f32.mrf.mxu1 }
 0x459   : > { %v1420_v46 = vmul.f32 0.25, %v1397_v30 }
 0x45b   : > { %v1424_v47 = vsel %vm996_vm3, -1e+30, %v1420_v46 }
 0x45c   : > { %v1426_v48 = vsel %vm1000_vm4, %v1424_v47, -inf }
 0x45d   : > { %1427 = vmax.xlane.f32.xlu0 %v1426_v48 }
 0x460   : > { %v1399_v49 = vpop.f32.mrf.mxu1 }
 0x462   : > { %2700 = vmatmul.msk.bf16.vlgmr.msra.gmra.mxu2 %vm955_vm2, %v1528_v50 }
 0x4c5   : > { %v1234_v51 = vpop.f32.mrf.mxu2 }
 0x4c6   : > { %v1235_v13 = vadd.f32 %v2862_v52, %v1234_v51 }
 0x4c8   : > { %v3369_v14 = vadd.f32 %v1235_v13, %v3198_v3 }
 0x4ca   : > { %v1241_v44 = vsel %vm910_vm1, %v3369_v14, 0.0 }
 0x4cd   : > { %v1236_v53 = vpop.f32.mrf.mxu2 }
 0x4ce   : > { %v3350_v54 = vadd.f32 %v2862_v52, %v1236_v53 }
 0x4cf   : > { %v1520_v55 = vpop.f32.mrf.mxu1 }
 0x4d0   : > { %v1550_v56 = vmul.f32 0.25, %v1520_v55  ;;  %v1428_v57 = vpop.xlane.xlu0 %1427 }
 0x4d1   : > { %v1432_v58 = vsub.f32 %v1424_v47, %v1428_v57 }
 0x4d2   : > { %v1552_v59 = vsel %vm996_vm3, -1e+30, %v1550_v56 }
 0x4d3   : > { %v1554_v60 = vsel %vm1000_vm4, %v1552_v59, -inf  ;;  %v1434_v61 = vmul.f32 1.442695, %v1432_v58 }
 0x4d4   : > { %1555 = vmax.xlane.f32.xlu1 %v1554_v60 }
 0x4d5   : > { %v1416_v62 = vpop.f32.mrf.mxu2  ;;  %2892 = vpow2.f32 %v1434_v61 }
 0x4d6   : > { %v1421_v63 = vmul.f32 0.25, %v1416_v62 }
 0x4d7   : > { %v1522_v0 = vpop.f32.mrf.mxu1 }
 0x4d8   : > { %v1425_v1 = vsel %vm997_vm5, -1e+30, %v1421_v63 }
 0x4d9   : > { %v1429_v2 = vsel %vm1000_vm4, %v1425_v1, -inf }
 0x4da   : > { %1430 = vmax.xlane.f32.xlu2 %v1429_v2 }
 0x4db   : > { %v2893_v7 = vpop.eup %2892 }
 0x4dc   : > { %v1438_v8 = vsel %vm1000_vm4, %v2893_v7, 0.0 }
 0x4dd   : > { %v1418_v5 = vpop.f32.mrf.mxu2 }
 0x4e2   : > { %1439 = vadd.xlane.f32.xlu2 %v1438_v8 }
 0x4e5   : > { %v1546_v39 = vpop.f32.mrf.mxu2 }
 0x4e6   : > { %v1551_v9 = vmul.f32 0.25, %v1546_v39  ;;  %v2986_v39 = vmov 32.0  }
 0x4e8   : > { %v1553_v6 = vsel %vm997_vm5, -1e+30, %v1551_v9 }
 0x4e9   : > { %v1557_v10 = vsel %vm1000_vm4, %v1553_v6, -inf }
 0x4ea   : > { %1558 = vmax.xlane.f32.xlu0 %v1557_v10  ;;  %v2807_v10 = vld [vmem:[%s3131_s2 + $0x18] sm:$0xff] }
 0x4eb   : > { %1655 = vmatpush.bf16.msrb.mxu1 %v2807_v10  ;;  %v876_v10 = vld [vmem:[%s3673_s24] sm:$0xff] }
 0x4ed   : > { %v1548_v11 = vpop.f32.mrf.mxu2 }
 0x4fa   : > { %1477 = vrot.lane.b32.xlu2 %v3333_v29, %s2982_s13 }
 0x4fe   : > { %1453 = vrot.lane.b32.xlu0 %v3323_v20, %s2982_s13 }
 0x506   : > { %1578 = vrot.lane.b32.xlu0 %v3323_v20, %s2984_s21 }
 0x530   : > { %1242 = vadd.xlane.f32.xlu0 %v1241_v44 }
 0x547   : > { %v1556_v15 = vpop.xlane.xlu1 %1555 }
 0x548   : > { %v1560_v16 = vsub.f32 %v1552_v59, %v1556_v15 }
 0x54a   : > { %v1562_v17 = vmul.f32 1.442695, %v1560_v16 }
 0x54c   : > { %2894 = vpow2.f32 %v1562_v17 }
 0x54d   : > { %v1431_v18 = vpop.xlane.xlu2 %1430 }
 0x54e   : > { %v1433_v21 = vsub.f32 %v1425_v1, %v1431_v18  ;;  %v1240_v18 = vadd.f32 %v3350_v54, %v3200_v4 }
 0x550   : > { %v1436_v23 = vmul.f32 1.442695, %v1433_v21 }
 0x552   : > { %v2895_v24 = vpop.eup %2894  ;;  %2896 = vpow2.f32 %v1436_v23  ;;  %v1244_v23 = vsel %vm910_vm1, %v1240_v18, 0.0 }
 0x553   : > { %v1566_v25 = vsel %vm1000_vm4, %v2895_v24, 0.0 }
 0x554   : > { %1567 = vadd.xlane.f32.xlu1 %v1566_v25 }
 0x555   : > { %v1440_v20 = vpop.xlane.xlu2 %1439 }
 0x558   : > { %v2897_v27 = vpop.eup %2896 }
 0x559   : > { %v1441_v3 = vsel %vm1000_vm4, %v2897_v27, 0.0 }
 0x55c   : > { %1442 = vadd.xlane.f32.xlu1 %v1441_v3 }
 0x55d   : > { %v1478_v28 = vpop.permute.xlu2 %1477  ;;  %v1559_v31 = vpop.xlane.xlu0 %1558 }
 0x55e   : > { %v1483_v32 = vsel %vm1033_vm6, %v1478_v28, 0  ;;  %v1561_v33 = vsub.f32 %v1553_v6, %v1559_v31  ;;  %v2865_v31 = vld [vmem:[%s3141_s29 + $0x1] ss:$0 sm:$0xff] }
 0x55f   : > { %1492 = vmatpush.bf16.msra.mxu0 %v1483_v32 }
 0x560   : > { %v1564_v34 = vmul.f32 1.442695, %v1561_v33 }
 0x562   : > { %2898 = vpow2.f32 %v1564_v34 }
 0x563   : > { %2900 = vrcp.f32 %v1440_v20  ;;  %v2806_v20 = vld [vmem:[%s3131_s2 + $0x10] sm:$0xff] }
 0x564   : > { %1656 = vmatpush.bf16.msrb.mxu1 %v2806_v20 }
 0x568   : > { %v2899_v35 = vpop.eup %2898 }
 0x569   : > { %v1569_v36 = vsel %vm1000_vm4, %v2899_v35, 0.0  ;;  %v2901_v37 = vpop.eup %2900 }
 0x56a   : > { %1570 = vadd.xlane.f32.xlu1 %v1569_v36  ;;  %v1446_v38 = vmul.f32 %v2901_v37, %v2893_v7 }
 0x56c   : > { %v1448_v45 = vpack.c.bf16 %v1446_v38, %v1446_v38 }
 0x570   : > { %v1454_v40 = vpop.permute.xlu0 %1453 }
 0x571   : > { %v1459_v41 = vsel %vm1033_vm6, %v1454_v40, 0 }
 0x572   : > { %1468 = vmatpush.bf16.msrb.mxu3 %v1459_v41 }
 0x575   : > { %2697 = vmatmul.msk.bf16.vlgmr.msrb.gmra.mxu3 %vm1000_vm4, %v1448_v45 }
 0x578   : > { %v1579_v30 = vpop.permute.xlu0 %1578 }
 0x579   : > { %v1584_v46 = vsel %vm1033_vm6, %v1579_v30, 0 }
 0x57a   : > { %1593 = vmatpush.bf16.msra.mxu3 %v1584_v46 }
 0x583   : > { %1599 = vrot.lane.b32.xlu1 %v3333_v29, %s2984_s21 }
 0x5a3   : > { %v1243_v16 = vpop.xlane.xlu0 %1242 }
 0x5c7   : > { %v1568_v47 = vpop.xlane.xlu1 %1567 }
 0x5c8   : > { %2902 = vrcp.f32 %v1568_v47  ;;  %v2809_v47 = vld [vmem:[%s3126_s23 + $0x28] sm:$0xff] }
 0x5c9   : > { %1767 = vmatpush.bf16.msrb.mxu2 %v2809_v47 }
 0x5ce   : > { %v2903_v48 = vpop.eup %2902 }
 0x5cf   : > { %v1574_v49 = vmul.f32 %v2903_v48, %v2895_v24  ;;  %v1443_v50 = vpop.xlane.xlu1 %1442 }
 0x5d0   : > { %2904 = vrcp.f32 %v1443_v50 }
 0x5d1   : > { %v1576_v51 = vpack.c.bf16 %v1574_v49, %v1574_v49 }
 0x5d3   : > { %2701 = vmatmul.msk.bf16.vlgmr.msra.gmra.mxu3 %vm1000_vm4, %v1576_v51 }
 0x5d6   : > { %v2905_v52 = vpop.eup %2904 }
 0x5d7   : > { %v1447_v53 = vmul.f32 %v2905_v52, %v2897_v27  ;;  %v2808_v52 = vld [vmem:[%s3126_s23 + $0x20] sm:$0xff] }
 0x5d8   : > { %1768 = vmatpush.bf16.msrb.mxu2 %v2808_v52 }
 0x5d9   : > { %v1449_v55 = vpack.c.bf16 %v1447_v53, %v1447_v53 }
 0x5db   : > { %2698 = vmatmul.msk.bf16.vlgmr.msra.gmra.mxu0 %vm1000_vm4, %v1449_v55 }
 0x5dd   : > { %v1571_v56 = vpop.xlane.xlu1 %1570 }
 0x5de   : > { %2906 = vrcp.f32 %v1571_v56 }
 0x5df   : > { %2908 = vrcp.f32 %v2986_v39 }
 0x5e4   : > { %v2907_v57 = vpop.eup %2906 }
 0x5e5   : > { %v1575_v58 = vmul.f32 %v2907_v57, %v2899_v35  ;;  %v2909_v9 = vpop.eup %2908 }
 0x5e6   : > { %v1248_v6 = vmul.f32 32.0, %v2909_v9  ;;  %vm1252_vm7 = vweird.f32 %v2909_v9 }
 0x5e7   : > { %v1577_v60 = vpack.c.bf16 %v1575_v58, %v1575_v58 }
 0x5e8   : > { %v1249_v11 = vsub.f32 1.0, %v1248_v6 }
 0x5ea   : > { %v1250_v13 = vmul.f32 %v2909_v9, %v1249_v11  ;;  %v877_v11 = vld [vmem:[%s3673_s24 + $0x8] sm:$0xff] }
 0x5ec   : > { %v1251_v44 = vadd.f32 %v2909_v9, %v1250_v13 }
 0x5ee   : > { %v3388_v15 = vsel %vm1252_vm7, %v2909_v9, %v1251_v44 }
 0x5ef   : > { %v1254_v17 = vmul.f32 %v3388_v15, %v1243_v16 }
 0x5f1   : > { %v3394_v21 = vsub.f32 %v3369_v14, %v1254_v17 }
 0x5f3   : > { %v1258_v24 = vmul.f32 %v3394_v21, %v3394_v21 }
 0x5f5   : > { %v1600_v59 = vpop.permute.xlu1 %1599  ;;  %v1260_v25 = vsel %vm910_vm1, %v1258_v24, 0.0 }
 0x5f6   : > { %v1605_v29 = vsel %vm1033_vm6, %v1600_v59, 0 }
 0x5f7   : > { %1614 = vmatpush.bf16.msrb.mxu0 %v1605_v29 }
 0x5f8   : > { %v1470_v61 = vpop.f32.mrf.mxu3 }
 0x5fa   : > { %2702 = vmatmul.msk.bf16.vlgmr.msrb.gmra.mxu0 %vm1000_vm4, %v1577_v60 }
 0x600   : > { %v1472_v62 = vpop.f32.mrf.mxu3 }
 0x656   : > { %v1595_v63 = vpop.f32.mrf.mxu3 }
 0x658   : > { %v1494_v0 = vpop.f32.mrf.mxu0 }
 0x65e   : > { %v1597_v1 = vpop.f32.mrf.mxu3 }
 0x65f   : > { %v3434_v1 = vld [vmem:[%s3136_s25 + $0x2] ss:$0 sm:$0xff] }
 0x660   : > { %v1496_v2 = vpop.f32.mrf.mxu0 }
 0x677   : > { %v1616_v5 = vpop.f32.mrf.mxu0 }
 0x678   : > { %v2850_v7 = vpack.i.bf16 %v1616_v5, %v1595_v63 }
 0x67a   : > { %2851 = vrot.lane.b32.xlu2 %v2850_v7, %s2985_s12 }
 0x67f   : > { %v1618_v8 = vpop.f32.mrf.mxu0 }
 0x6a3   : > { %1245 = vadd.xlane.f32.xlu2 %v1244_v23 }
 0x6ab   : > { %1261 = vadd.xlane.f32.xlu2 %v1260_v25 }
 0x6d4   : > { %v2852_v27 = vpop.permute.xlu2 %2851 }
 0x6d5   : > { %v2854_v3 = vunpack.i.h.bf16 %v2852_v27  ;;  %v2853_v28 = vunpack.i.l.bf16 %v2852_v27 }
 0x6d7   : > { %v1629_v4 = vsel %vm955_vm2, %v1494_v0, %v2854_v3  ;;  %v1628_v54 = vsel %vm955_vm2, %v1470_v61, %v2853_v28 }
 0x6d8   : > { %v1630_v14 = vpack.c.bf16 %v1629_v4, %v1628_v54 }
 0x6da   : > { %2711 = vmatmul.msk.bf16.vlgmr.msrb.gmra.mxu1 %vm910_vm1, %v1630_v14 }
 0x716   : > { %v1246_v36 = vpop.xlane.xlu2 %1245 }
 0x717   : > { %v1255_v38 = vmul.f32 %v3388_v15, %v1246_v36 }
 0x719   : > { %v3409_v45 = vsub.f32 %v1240_v18, %v1255_v38  ;;  %v1742_v18 = vpack.c.bf16 %v877_v11, %v876_v10 }
 0x71b   : > { %v1259_v46 = vmul.f32 %v3409_v45, %v3409_v45 }
 0x71e   : > { %v1262_v29 = vpop.xlane.xlu2 %1261 }
 0x71f   : > { %v1266_v61 = vmul.f32 %v1262_v29, %v3388_v15 }
 0x721   : > { %v1268_v63 = vadd.f32 1e-05, %v1266_v61 }
 0x723   : > { %2910 = vrsqrt.f32 %v1268_v63  ;;  %vm1276_vm12 = vweird.f32 %v1268_v63 }
 0x729   : > { %v2911_v2 = vpop.eup %2910 }
 0x72a   : > { %v1271_v39 = vmul.f32 %v2911_v2, %v1268_v63  ;;  %vm1277_vm9 = vweird.f32 %v2911_v2 }
 0x72b   : > { %vm1278_vm14 = vmor %vm1276_vm12, %vm1277_vm9 }
 0x72c   : > { %v1272_v13 = vmul.f32 %v2911_v2, %v1271_v39 }
 0x72e   : > { %v1273_v25 = vmul.f32 0.5, %v1272_v13 }
 0x730   : > { %v1274_v4 = vsub.f32 1.5, %v1273_v25 }
 0x757   : > { %v1658_v32 = vpop.f32.mrf.mxu1 }
 0x758   : > { %v1659_v33 = vadd.f32 %v2865_v31, %v1658_v32 }
 0x75a   : > { %v1663_v34 = vadd.f32 %v1659_v33, %v3293_v42  ;;  %v1263_v42 = vsel %vm910_vm1, %v1259_v46, 0.0  ;;  %v1275_v33 = vmul.f32 %v2911_v2, %v1274_v4  ;;  %v2866_v46 = vld [vmem:[%s3146_s30 + $0x1] ss:$0 sm:$0xff] }
 0x75c   : > { %v1665_v35 = vsel %vm910_vm1, %v1663_v34, 0.0 }
 0x75d   : > { %1666 = vadd.xlane.f32.xlu1 %v1665_v35 }
 0x75f   : > { %v1660_v37 = vpop.f32.mrf.mxu1 }
 0x760   : > { %v1661_v40 = vadd.f32 %v2865_v31, %v1660_v37 }
 0x762   : > { %v1664_v41 = vadd.f32 %v1661_v40, %v3298_v43  ;;  %v1279_v40 = vsel %vm1278_vm14, %v2911_v2, %v1275_v33 }
 0x764   : > { %v1668_v30 = vsel %vm910_vm1, %v1664_v41, 0.0 }
 0x765   : > { %1669 = vadd.xlane.f32.xlu0 %v1668_v30 }
 0x76d   : > { %1264 = vadd.xlane.f32.xlu0 %v1263_v42 }
 0x776   : > { %1777 = vrot.lane.b32.xlu1 %v2809_v47, %s2982_s13 }
 0x7d0   : > { %v1667_v48 = vpop.xlane.xlu1 %1666 }
 0x7d1   : > { %v1671_v49 = vmul.f32 %v1667_v48, %v3388_v15  ;;  %v2863_v48 = vld [vmem:[%s3146_s30] ss:$0 sm:$0xff] }
 0x7d3   : > { %v3418_v50 = vsub.f32 %v1663_v34, %v1671_v49  ;;  %v1290_v49 = vmul.f32 %v1279_v40, %v3394_v21  ;;  %v1722_v40 = vld [vmem:[%s3674_s0 + $0x8] sm:$0xff] }
 0x7d4   : > { %vm1846_vm9 = vcmp.gt.f32.partialorder %v1722_v40, 0.0 }
 0x7d5   : > { %v1675_v43 = vmul.f32 %v3418_v50, %v3418_v50 }
 0x7d7   : > { %v1677_v51 = vsel %vm910_vm1, %v1675_v43, 0.0 }
 0x7d8   : > { %1678 = vadd.xlane.f32.xlu2 %v1677_v51  ;;  %v1670_v53 = vpop.xlane.xlu0 %1669 }
 0x7d9   : > { %v1672_v55 = vmul.f32 %v1670_v53, %v3388_v15 }
 0x7db   : > { %v3425_v56 = vsub.f32 %v1664_v41, %v1672_v55 }
 0x7dd   : > { %v1676_v57 = vmul.f32 %v3425_v56, %v3425_v56 }
 0x7df   : > { %v1680_v58 = vsel %vm910_vm1, %v1676_v57, 0.0  ;;  %v2864_v57 = vld [vmem:[%s3151_s27] ss:$0 sm:$0xff] }
 0x7e0   : > { %1681 = vadd.xlane.f32.xlu0 %v1680_v58  ;;  %v1265_v60 = vpop.xlane.xlu0 %1264  ;;  %v1295_v58 = vmul.f32 %v2863_v48, %v1290_v49 }
 0x7e1   : > { %v1267_v62 = vmul.f32 %v1265_v60, %v3388_v15 }
 0x7e2   : > { %v1300_v61 = vadd.f32 %v2864_v57, %v1295_v58 }
 0x7e3   : > { %v1269_v0 = vadd.f32 1e-05, %v1267_v62 }
 0x7e5   : > { %2912 = vrsqrt.f32 %v1269_v0  ;;  %vm1286_vm15 = vweird.f32 %v1269_v0 }
 0x7e8   : > { %v1778_v59 = vpop.permute.xlu1 %1777 }
 0x7e9   : > { %1793 = vmatpush.bf16.msrb.mxu3 %v1778_v59 }
 0x7eb   : > { %v2913_v7 = vpop.eup %2912 }
 0x7ec   : > { %v1281_v6 = vmul.f32 %v2913_v7, %v1269_v0  ;;  %vm1287_vm10 = vweird.f32 %v2913_v7 }
 0x7ed   : > { %vm1288_vm0 = vmor %vm1286_vm15, %vm1287_vm10 }
 0x7ee   : > { %v1282_v44 = vmul.f32 %v2913_v7, %v1281_v6 }
 0x7f0   : > { %1775 = vrot.lane.b32.xlu2 %v2808_v52, %s2982_s13  ;;  %v1283_v27 = vmul.f32 0.5, %v1282_v44  ;;  %v2867_v52 = vld [vmem:[%s3151_s27 + $0x1] ss:$0 sm:$0xff] }
 0x7f2   : > { %v1284_v54 = vsub.f32 1.5, %v1283_v27 }
 0x7f4   : > { %1781 = vrot.lane.b32.xlu0 %v3434_v1, %s2982_s13  ;;  %v1285_v34 = vmul.f32 %v2913_v7, %v1284_v54 }
 0x7f6   : > { %v1289_v41 = vsel %vm1288_vm0, %v2913_v7, %v1285_v34 }
 0x7f7   : > { %v1291_v43 = vmul.f32 %v1289_v41, %v3409_v45 }
 0x7f9   : > { %v1296_v59 = vmul.f32 %v2863_v48, %v1291_v43 }
 0x7fb   : > { %v1301_v62 = vadd.f32 %v2864_v57, %v1296_v59 }
 0x84b   : > { %v1679_v5 = vpop.xlane.xlu2 %1678 }
 0x84c   : > { %v1683_v8 = vmul.f32 %v1679_v5, %v3388_v15 }
 0x84e   : > { %v1685_v9 = vadd.f32 1e-05, %v1683_v8 }
 0x850   : > { %2914 = vrsqrt.f32 %v1685_v9  ;;  %vm1693_vm11 = vweird.f32 %v1685_v9 }
 0x853   : > { %v1776_v16 = vpop.permute.xlu2 %1775  ;;  %v1682_v17 = vpop.xlane.xlu0 %1681 }
 0x854   : > { %v1684_v23 = vmul.f32 %v1682_v17, %v3388_v15  ;;  %1794 = vmatpush.bf16.msrb.mxu3 %v1776_v16 }
 0x856   : > { %v2915_v24 = vpop.eup %2914  ;;  %v1686_v20 = vadd.f32 1e-05, %v1684_v23 }
 0x857   : > { %v1688_v3 = vmul.f32 %v2915_v24, %v1685_v9  ;;  %2733 = vmatmul.msk.bf16.vlgmr.msrb.gmra.mxu3 %vm910_vm1, %v1742_v18  ;;  %vm1694_vm8 = vweird.f32 %v2915_v24 }
 0x858   : > { %2916 = vrsqrt.f32 %v1686_v20  ;;  %vm1695_vm13 = vmor %vm1693_vm11, %vm1694_vm8  ;;  %vm1703_vm5 = vweird.f32 %v1686_v20 }
 0x859   : > { %v1689_v28 = vmul.f32 %v2915_v24, %v1688_v3 }
 0x85b   : > { %v1690_v14 = vmul.f32 0.5, %v1689_v28 }
 0x85d   : > { %v1691_v31 = vsub.f32 1.5, %v1690_v14 }
 0x85e   : > { %v2917_v32 = vpop.eup %2916 }
 0x85f   : > { %v1692_v35 = vmul.f32 %v2915_v24, %v1691_v31  ;;  %v1698_v36 = vmul.f32 %v2917_v32, %v1686_v20  ;;  %vm1704_vm3 = vweird.f32 %v2917_v32 }
 0x860   : > { %vm1705_vm7 = vmor %vm1703_vm5, %vm1704_vm3 }
 0x861   : > { %v1696_v37 = vsel %vm1695_vm13, %v2915_v24, %v1692_v35  ;;  %v1699_v38 = vmul.f32 %v2917_v32, %v1698_v36 }
 0x862   : > { %v1707_v42 = vmul.f32 %v1696_v37, %v3418_v50 }
 0x863   : > { %v1700_v30 = vmul.f32 0.5, %v1699_v38 }
 0x864   : > { %v1712_v53 = vmul.f32 %v2866_v46, %v1707_v42 }
 0x865   : > { %v1701_v47 = vsub.f32 1.5, %v1700_v30 }
 0x866   : > { %v1717_v60 = vadd.f32 %v2867_v52, %v1712_v53  ;;  %v1782_v2 = vpop.permute.xlu0 %1781 }
 0x867   : > { %v1702_v51 = vmul.f32 %v2917_v32, %v1701_v47 }
 0x868   : > { %v3455_v0 = vsub.f32 %v1300_v61, %v1717_v60 }
 0x869   : > { %v1706_v55 = vsel %vm1705_vm7, %v2917_v32, %v1702_v51 }
 0x86a   : > { %v1708_v29 = vmul.f32 %v1706_v55, %v3425_v56 }
 0x86c   : > { %v1713_v50 = vmul.f32 %v2866_v46, %v1708_v29 }
 0x86e   : > { %v1718_v63 = vadd.f32 %v2867_v52, %v1713_v50 }
 0x870   : > { %v3457_v21 = vsub.f32 %v1301_v62, %v1718_v63 }
 0x872   : > { %v1741_v45 = vpack.c.bf16 %v3457_v21, %v3455_v0 }
 0x874   : > { %2732 = vmatmul.msk.bf16.vlgmr.msrb.gmra.mxu2 %vm910_vm1, %v1741_v45 }
 0x8da   : > { %v1796_v5 = vpop.f32.mrf.mxu3 }
 0x8db   : > { %v1797_v7 = vadd.f32 %v1796_v5, %v1782_v2 }
 0x8dd   : > { %v1803_v8 = vpack.c.bf16 %v1797_v7, %v1797_v7 }
 0x8df   : > { %v1874_v39 = vunpack.c.l.b16 %v1803_v8  ;;  %v1809_v56 = vsel %vm955_vm2, %v1803_v8, 0 }
 0x8e0   : > { %1818 = vmatpush.bf16.xpose.msra.mxu0 %v1809_v56 }
 0x8e1   : > { %v3463_v9 = vpack.c.b16 %v1874_v39, %v1874_v39 }
 0x8e2   : > { %v1798_v6 = vpop.f32.mrf.mxu3 }
 0x8e3   : > { %1926 = vrot.lane.b32.xlu1 %v3463_v9, %s2983_s18  ;;  %v1799_v10 = vadd.f32 %v1798_v6, %v1782_v2 }
 0x8e5   : > { %v1804_v11 = vpack.c.bf16 %v1799_v10, %v1799_v10 }
 0x8e7   : > { %v1828_v13 = vsel %vm955_vm2, %v1804_v11, 0  ;;  %v1898_v44 = vunpack.c.l.b16 %v1804_v11 }
 0x8e8   : > { %1837 = vmatpush.bf16.xpose.msra.mxu1 %v1828_v13 }
 0x8e9   : > { %v3468_v16 = vpack.c.b16 %v1898_v44, %v1898_v44 }
 0x8eb   : > { %1952 = vrot.lane.b32.xlu0 %v3468_v16, %s2983_s18 }
 0x8f7   : > { %v1770_v17 = vpop.f32.mrf.mxu2 }
 0x8f8   : > { %v1771_v18 = vadd.f32 %v3434_v1, %v1770_v17 }
 0x8fa   : > { %v1801_v23 = vpack.c.bf16 %v1771_v18, %v1771_v18 }
 0x8fc   : > { %v1922_v24 = vunpack.c.l.b16 %v1801_v23  ;;  %2734 = vmatmul.msk.bf16.vlgmr.msra.gmra.mxu0 %vm955_vm2, %v1801_v23 }
 0x8fe   : > { %v1923_v25 = vpack.c.b16 %v1922_v24, %v1922_v24 }
 0x8ff   : > { %v1772_v20 = vpop.f32.mrf.mxu2 }
 0x900   : > { %v1773_v27 = vadd.f32 %v3434_v1, %v1772_v20  ;;  %1924 = vrot.lane.b32.xlu2 %v1923_v25, %s2983_s18  ;;  %v1721_v1 = vld [vmem:[%s3674_s0] sm:$0xff] }
 0x901   : > { %vm1845_vm8 = vcmp.gt.f32.partialorder %v1721_v1, 0.0 }
 0x902   : > { %v1802_v3 = vpack.c.bf16 %v1773_v27, %v1773_v27 }
 0x904   : > { %v1948_v28 = vunpack.c.l.b16 %v1802_v3  ;;  %2735 = vmatmul.msk.bf16.vlgmr.msra.gmra.mxu1 %vm955_vm2, %v1802_v3 }
 0x906   : > { %v1949_v4 = vpack.c.b16 %v1948_v28, %v1948_v28 }
 0x908   : > { %1950 = vrot.lane.b32.xlu1 %v1949_v4, %s2983_s18 }
 0x955   : > { %v1927_v54 = vpop.permute.xlu1 %1926 }
 0x956   : > { %v1932_v14 = vsel %vm955_vm2, %v1927_v54, 0 }
 0x957   : > { %1941 = vmatpush.bf16.xpose.msrb.mxu0 %v1932_v14 }
 0x95a   : > { %v1925_v31 = vpop.permute.xlu2 %1924 }
 0x95d   : > { %v1953_v32 = vpop.permute.xlu0 %1952 }
 0x95e   : > { %2738 = vmatmul.msk.bf16.vlgmr.msrb.gmra.mxu0 %vm955_vm2, %v1925_v31  ;;  %v1958_v33 = vsel %vm955_vm2, %v1953_v32, 0 }
 0x95f   : > { %1967 = vmatpush.bf16.xpose.msrb.mxu1 %v1958_v33 }
 0x979   : > { %v1820_v34 = vpop.f32.mrf.mxu0 }
 0x97a   : > { %v1843_v35 = vmul.f32 0.25, %v1820_v34  ;;  %v1951_v36 = vpop.permute.xlu1 %1950 }
 0x97b   : > { %2739 = vmatmul.msk.bf16.vlgmr.msrb.gmra.mxu1 %vm955_vm2, %v1951_v36 }
 0x97c   : > { %v1847_v37 = vsel %vm1845_vm8, -1e+30, %v1843_v35 }
 0x97d   : > { %v1849_v38 = vsel %vm1000_vm4, %v1847_v37, -inf }
 0x97e   : > { %1850 = vmax.xlane.f32.xlu0 %v1849_v38 }
 0x981   : > { %v1822_v41 = vpop.f32.mrf.mxu0  ;;  %v1839_v30 = vpop.f32.mrf.mxu1 }
 0x982   : > { %v1844_v46 = vmul.f32 0.25, %v1839_v30 }
 0x984   : > { %v1848_v42 = vsel %vm1846_vm9, -1e+30, %v1844_v46 }
 0x985   : > { %v1852_v47 = vsel %vm1000_vm4, %v1848_v42, -inf }
 0x986   : > { %1853 = vmax.xlane.f32.xlu2 %v1852_v47 }
 0x989   : > { %v1841_v48 = vpop.f32.mrf.mxu1 }
 0x9db   : > { %v1943_v49 = vpop.f32.mrf.mxu0 }
 0x9dc   : > { %v1973_v43 = vmul.f32 0.25, %v1943_v49 }
 0x9de   : > { %v1975_v51 = vsel %vm1845_vm8, -1e+30, %v1973_v43 }
 0x9df   : > { %v1977_v52 = vsel %vm1000_vm4, %v1975_v51, -inf }
 0x9e0   : > { %1978 = vmax.xlane.f32.xlu1 %v1977_v52  ;;  %v2811_v52 = vld [vmem:[%s3131_s2 + $0x28] sm:$0xff] }
 0x9e1   : > { %2078 = vmatpush.bf16.msra.mxu0 %v2811_v52 }
 0x9e3   : > { %v1945_v53 = vpop.f32.mrf.mxu0 }
 0x9f1   : > { %v1851_v55 = vpop.xlane.xlu0 %1850 }
 0x9f2   : > { %v1855_v57 = vsub.f32 %v1847_v37, %v1851_v55 }
 0x9f4   : > { %v1857_v58 = vmul.f32 1.442695, %v1855_v57 }
 0x9f6   : > { %2918 = vpow2.f32 %v1857_v58  ;;  %v2810_v58 = vld [vmem:[%s3131_s2 + $0x20] sm:$0xff] }
 0x9f7   : > { %2079 = vmatpush.bf16.msra.mxu0 %v2810_v58  ;;  %v2815_v58 = vld [vmem:[%s3161_s20 + $0x8] sm:$0xff] }
 0x9f8   : > { %v1969_v59 = vpop.f32.mrf.mxu1 }
 0x9f9   : > { %v1974_v29 = vmul.f32 0.25, %v1969_v59  ;;  %v1854_v60 = vpop.xlane.xlu2 %1853 }
 0x9fa   : > { %v1856_v50 = vsub.f32 %v1848_v42, %v1854_v60 }
 0x9fb   : > { %v1976_v61 = vsel %vm1846_vm9, -1e+30, %v1974_v29 }
 0x9fc   : > { %v2919_v62 = vpop.eup %2918  ;;  %v1859_v63 = vmul.f32 1.442695, %v1856_v50  ;;  %v1980_v45 = vsel %vm1000_vm4, %v1976_v61, -inf }
 0x9fd   : > { %1981 = vmax.xlane.f32.xlu0 %v1980_v45  ;;  %v1861_v2 = vsel %vm1000_vm4, %v2919_v62, 0.0 }
 0x9fe   : > { %2920 = vpow2.f32 %v1859_v63  ;;  %1862 = vadd.xlane.f32.xlu2 %v1861_v2  ;;  %v2869_v63 = vld [vmem:[%s3141_s29 + $0x2] ss:$0 sm:$0xff]  ;;  %s3675_s29 = sld [smem:[#allocation20_spill]] }
 0xa00   : > { %v1971_v5 = vpop.f32.mrf.mxu1 }
 0xa04   : > { %v2921_v7 = vpop.eup %2920 }
 0xa05   : > { %v1864_v8 = vsel %vm1000_vm4, %v2921_v7, 0.0 }
 0xa06   : > { %1865 = vadd.xlane.f32.xlu1 %v1864_v8 }
 0xa11   : > { %1876 = vrot.lane.b32.xlu0 %v3463_v9, %s2982_s13 }
 0xa16   : > { %1900 = vrot.lane.b32.xlu2 %v3468_v16, %s2982_s13 }
 0xa19   : > { %2001 = vrot.lane.b32.xlu0 %v3463_v9, %s2984_s21 }
 0xa53   : > { %v1979_v39 = vpop.xlane.xlu1 %1978 }
 0xa54   : > { %v1983_v56 = vsub.f32 %v1975_v51, %v1979_v39 }
 0xa56   : > { %v1985_v6 = vmul.f32 1.442695, %v1983_v56 }
 0xa58   : > { %2922 = vpow2.f32 %v1985_v6 }
 0xa5e   : > { %v2923_v10 = vpop.eup %2922 }
 0xa5f   : > { %v1989_v11 = vsel %vm1000_vm4, %v2923_v10, 0.0 }
 0xa60   : > { %1990 = vadd.xlane.f32.xlu1 %v1989_v11 }
 0xa70   : > { %v1982_v13 = vpop.xlane.xlu0 %1981 }
 0xa71   : > { %v1984_v44 = vsub.f32 %v1976_v61, %v1982_v13  ;;  %v1863_v17 = vpop.xlane.xlu2 %1862 }
 0xa72   : > { %2924 = vrcp.f32 %v1863_v17 }
 0xa73   : > { %v1987_v18 = vmul.f32 1.442695, %v1984_v44 }
 0xa75   : > { %2926 = vpow2.f32 %v1987_v18 }
 0xa78   : > { %v2925_v23 = vpop.eup %2924 }
 0xa79   : > { %v1869_v24 = vmul.f32 %v2925_v23, %v2919_v62  ;;  %v1901_v25 = vpop.permute.xlu2 %1900  ;;  %v1866_v9 = vpop.xlane.xlu1 %1865 }
 0xa7a   : > { %v1906_v20 = vsel %vm1033_vm6, %v1901_v25, 0  ;;  %2928 = vrcp.f32 %v1866_v9  ;;  %v2813_v25 = vld [vmem:[%s3121_s4 + $0x8] sm:$0xff] }
 0xa7b   : > { %v2927_v27 = vpop.eup %2926  ;;  %2311 = vst.msk [vmem:[%s3188_s14] sm:$0xff] %vm1000_vm4, %v1869_v24  ;;  %1915 = vmatpush.bf16.msra.mxu3 %v1906_v20  ;;  %v1871_v32 = vpack.c.bf16 %v1869_v24, %v1869_v24  ;;  %2183 = vmatpush.bf16.msra.mxu1 %v2813_v25 }
 0xa7c   : > { %v1992_v3 = vsel %vm1000_vm4, %v2927_v27, 0.0 }
 0xa7d   : > { %1993 = vadd.xlane.f32.xlu1 %v1992_v3 }
 0xa80   : > { %v2929_v28 = vpop.eup %2928 }
 0xa81   : > { %v1870_v4 = vmul.f32 %v2929_v28, %v2921_v7 }
 0xa83   : > { %v1872_v54 = vpack.c.bf16 %v1870_v4, %v1870_v4  ;;  %2312 = vst.msk [vmem:[%s3188_s14 + $0x8] sm:$0xff] %vm1000_vm4, %v1870_v4  ;;  %v1877_v14 = vpop.permute.xlu0 %1876 }
 0xa84   : > { %v1882_v31 = vsel %vm1033_vm6, %v1877_v14, 0 }
 0xa85   : > { %1891 = vmatpush.bf16.msra.mxu2 %v1882_v31  ;;  %2737 = vmatmul.msk.bf16.vlgmr.msra.gmra.mxu3 %vm1000_vm4, %v1872_v54 }
 0xa88   : > { %2736 = vmatmul.msk.bf16.vlgmr.msra.gmra.mxu2 %vm1000_vm4, %v1871_v32 }
 0xa8b   : > { %v2002_v33 = vpop.permute.xlu0 %2001 }
 0xa8c   : > { %v2007_v1 = vsel %vm1033_vm6, %v2002_v33, 0 }
 0xa8d   : > { %2016 = vmatpush.bf16.msrb.mxu2 %v2007_v1 }
 0xa96   : > { %2022 = vrot.lane.b32.xlu1 %v3468_v16, %s2984_s21  ;;  %s3677_s21 = sld [smem:[#allocation22_spill]] }
 0xa9c   : > { %s3678_s1 = scalar_lea.vmem %s3677_s21, %s3113_s26 }
 0xad3   : > { %v1991_v34 = vpop.xlane.xlu1 %1990 }
 0xad4   : > { %2930 = vrcp.f32 %v1991_v34 }
 0xada   : > { %v2931_v35 = vpop.eup %2930 }
 0xadb   : > { %v1997_v36 = vmul.f32 %v2931_v35, %v2923_v10 }
 0xadd   : > { %v1999_v37 = vpack.c.bf16 %v1997_v36, %v1997_v36  ;;  %2779 = vst.msk [vmem:[%s3188_s14 + $0x10] sm:$0xff] %vm1000_vm4, %v1997_v36 }
 0xadf   : > { %2740 = vmatmul.msk.bf16.vlgmr.msrb.gmra.mxu2 %vm1000_vm4, %v1999_v37 }
 0xaf0   : > { %v1994_v38 = vpop.xlane.xlu1 %1993 }
 0xaf1   : > { %2932 = vrcp.f32 %v1994_v38 }
 0xaf7   : > { %v2933_v40 = vpop.eup %2932 }
 0xaf8   : > { %v1998_v41 = vmul.f32 %v2933_v40, %v2927_v27  ;;  %v2812_v27 = vld [vmem:[%s3121_s4] sm:$0xff] }
 0xaf9   : > { %2184 = vmatpush.bf16.msra.mxu1 %v2812_v27 }
 0xafa   : > { %2780 = vst.msk [vmem:[%s3188_s14 + $0x18] sm:$0xff] %vm1000_vm4, %v1998_v41  ;;  %v2000_v42 = vpack.c.bf16 %v1998_v41, %v1998_v41  ;;  %s2987_s14 = smov 64  }
 0xb08   : > { %v1917_v30 = vpop.f32.mrf.mxu3  ;;  %v2023_v46 = vpop.permute.xlu1 %2022 }
 0xb09   : > { %v2028_v16 = vsel %vm1033_vm6, %v2023_v46, 0  ;;  %vm2221_vm6 = vcmask 523264   ;;  %v2870_v46 = vld [vmem:[%s3146_s30 + $0x2] ss:$0 sm:$0xff]  ;;  %s3676_s30 = scalar_lea.vmem %s3675_s29, %s3113_s26 }
 0xb0a   : > { %2037 = vmatpush.bf16.msrb.mxu3 %v2028_v16 }
 0xb0b   : > { %v1893_v47 = vpop.f32.mrf.mxu2 }
 0xb0d   : > { %2741 = vmatmul.msk.bf16.vlgmr.msrb.gmra.mxu3 %vm1000_vm4, %v2000_v42 }
 0xb10   : > { %v1919_v48 = vpop.f32.mrf.mxu3 }
 0xb11   : > { %v2871_v48 = vld [vmem:[%s3151_s27 + $0x2] ss:$0 sm:$0xff] }
 0xb13   : > { %v1895_v49 = vpop.f32.mrf.mxu2 }
 0xb62   : > { %v2018_v43 = vpop.f32.mrf.mxu2 }
 0xb6a   : > { %v2020_v51 = vpop.f32.mrf.mxu2 }
 0xb90   : > { %v2039_v53 = vpop.f32.mrf.mxu3 }
 0xb91   : > { %v2855_v55 = vpack.i.bf16 %v2039_v53, %v2018_v43 }
 0xb93   : > { %2856 = vrot.lane.b32.xlu2 %v2855_v55, %s2985_s12  ;;  %v2817_v55 = vld [vmem:[%s3161_s20 + $0x18] sm:$0xff] }
 0xb94   : > { %2229 = vmatpush.bf16.msra.mxu2 %v2817_v55 }
 0xb98   : > { %v2041_v57 = vpop.f32.mrf.mxu3 }
 0xb99   : > { %v2816_v57 = vld [vmem:[%s3161_s20 + $0x10] sm:$0xff] }
 0xb9a   : > { %2230 = vmatpush.bf16.msra.mxu2 %v2816_v57 }
 0xb9e   : > { %2231 = vmatpush.bf16.msra.mxu2 %v2815_v58 }
 0xbed   : > { %v2857_v59 = vpop.permute.xlu2 %2856 }
 0xbee   : > { %v2859_v29 = vunpack.i.h.bf16 %v2857_v59  ;;  %v2858_v60 = vunpack.i.l.bf16 %v2857_v59  ;;  %v2814_v59 = vld [vmem:[%s3161_s20] sm:$0xff] }
 0xbef   : > { %2232 = vmatpush.bf16.msra.mxu2 %v2814_v59 }
 0xbf0   : > { %v2052_v50 = vsel %vm955_vm2, %v1917_v30, %v2859_v29  ;;  %v2051_v61 = vsel %vm955_vm2, %v1893_v47, %v2858_v60  ;;  %v2872_v60 = vld [vmem:[%s3676_s30] ss:$0 sm:$0xff] }
 0xbf1   : > { %v2053_v62 = vpack.c.bf16 %v2052_v50, %v2051_v61 }
 0xbf3   : > { %2750 = vmatmul.msk.bf16.vlgmr.msra.gmra.mxu0 %vm910_vm1, %v2053_v62 }
 0xc70   : > { %v2081_v45 = vpop.f32.mrf.mxu0 }
 0xc71   : > { %v2082_v2 = vadd.f32 %v2869_v63, %v2081_v45 }
 0xc73   : > { %v2086_v5 = vadd.f32 %v2082_v2, %v3455_v0 }
 0xc75   : > { %v2088_v7 = vsel %vm910_vm1, %v2086_v5, 0.0 }
 0xc76   : > { %2089 = vadd.xlane.f32.xlu0 %v2088_v7 }
 0xc78   : > { %v2083_v8 = vpop.f32.mrf.mxu0 }
 0xc79   : > { %v2084_v39 = vadd.f32 %v2869_v63, %v2083_v8 }
 0xc7b   : > { %v2087_v56 = vadd.f32 %v2084_v39, %v3457_v21 }
 0xc7d   : > { %v2091_v6 = vsel %vm910_vm1, %v2087_v56, 0.0 }
 0xc7e   : > { %2092 = vadd.xlane.f32.xlu2 %v2091_v6 }
 0xce9   : > { %v2090_v10 = vpop.xlane.xlu0 %2089 }
 0xcea   : > { %v2094_v11 = vmul.f32 %v2090_v10, %v3388_v15 }
 0xcec   : > { %v2096_v13 = vsub.f32 %v2086_v5, %v2094_v11  ;;  %v2873_v5 = vld [vmem:[%s3678_s1] ss:$0 sm:$0xff] }
 0xcee   : > { %v2098_v44 = vmul.f32 %v2096_v13, %v2096_v13 }
 0xcf0   : > { %v2100_v17 = vsel %vm910_vm1, %v2098_v44, 0.0 }
 0xcf1   : > { %v2093_v0 = vpop.xlane.xlu2 %2092  ;;  %2101 = vadd.xlane.f32.xlu1 %v2100_v17 }
 0xcf2   : > { %v2095_v18 = vmul.f32 %v2093_v0, %v3388_v15 }
 0xcf4   : > { %v2097_v23 = vsub.f32 %v2087_v56, %v2095_v18 }
 0xcf6   : > { %v2099_v24 = vmul.f32 %v2097_v23, %v2097_v23 }
 0xcf8   : > { %v2103_v21 = vsel %vm910_vm1, %v2099_v24, 0.0 }
 0xcf9   : > { %2104 = vadd.xlane.f32.xlu0 %v2103_v21 }
 0xd0a   : > { %2301 = vrot.lane.b32.xlu1 %v3325_v22, %s2987_s14 }
 0xd64   : > { %v2102_v9 = vpop.xlane.xlu1 %2101 }
 0xd65   : > { %v2106_v20 = vmul.f32 %v2102_v9, %v3388_v15 }
 0xd67   : > { %v2108_v3 = vadd.f32 1e-05, %v2106_v20 }
 0xd69   : > { %2934 = vrsqrt.f32 %v2108_v3  ;;  %vm2116_vm4 = vweird.f32 %v2108_v3 }
 0xd6c   : > { %v2105_v28 = vpop.xlane.xlu0 %2104 }
 0xd6d   : > { %v2107_v4 = vmul.f32 %v2105_v28, %v3388_v15 }
 0xd6f   : > { %v2935_v54 = vpop.eup %2934  ;;  %v2109_v14 = vadd.f32 1e-05, %v2107_v4 }
 0xd70   : > { %v2111_v31 = vmul.f32 %v2935_v54, %v2108_v3  ;;  %vm2117_vm2 = vweird.f32 %v2935_v54 }
 0xd71   : > { %2936 = vrsqrt.f32 %v2109_v14  ;;  %vm2118_vm10 = vmor %vm2116_vm4, %vm2117_vm2  ;;  %vm2126_vm12 = vweird.f32 %v2109_v14 }
 0xd72   : > { %v2112_v32 = vmul.f32 %v2935_v54, %v2111_v31 }
 0xd74   : > { %v2113_v33 = vmul.f32 0.5, %v2112_v32 }
 0xd76   : > { %v2114_v22 = vsub.f32 1.5, %v2113_v33 }
 0xd77   : > { %v2937_v1 = vpop.eup %2936 }
 0xd78   : > { %v2115_v34 = vmul.f32 %v2935_v54, %v2114_v22  ;;  %v2121_v35 = vmul.f32 %v2937_v1, %v2109_v14  ;;  %vm2127_vm11 = vweird.f32 %v2937_v1 }
 0xd79   : > { %vm2128_vm13 = vmor %vm2126_vm12, %vm2127_vm11 }
 0xd7a   : > { %v2122_v36 = vmul.f32 %v2937_v1, %v2121_v35  ;;  %v2119_v37 = vsel %vm2118_vm10, %v2935_v54, %v2115_v34 }
 0xd7b   : > { %v2130_v16 = vmul.f32 %v2119_v37, %v2096_v13 }
 0xd7c   : > { %v2123_v38 = vmul.f32 0.5, %v2122_v36  ;;  %v2302_v40 = vpop.permute.xlu1 %2301 }
 0xd7d   : > { %v2306_v41 = vsel %vm2221_vm6, %v3223_v26, %v2302_v40  ;;  %v2135_v49 = vmul.f32 %v2870_v46, %v2130_v16  ;;  %v2875_v40 = vld [vmem:[%s848_s10] ss:$0 sm:$0xff] }
 0xd7e   : > { %v2124_v30 = vsub.f32 1.5, %v2123_v38  ;;  %2308 = vst [vmem:[%s3178_s17 + $0x8] sm:$0xff] %v2306_v41 }
 0xd7f   : > { %v2140_v52 = vadd.f32 %v2871_v48, %v2135_v49 }
 0xd80   : > { %v2125_v42 = vmul.f32 %v2937_v1, %v2124_v30 }
 0xd82   : > { %v2129_v47 = vsel %vm2128_vm13, %v2937_v1, %v2125_v42 }
 0xd83   : > { %v2131_v43 = vmul.f32 %v2129_v47, %v2097_v23 }
 0xd85   : > { %v2136_v51 = vmul.f32 %v2870_v46, %v2131_v43 }
 0xd87   : > { %v2141_v26 = vadd.f32 %v2871_v48, %v2136_v51 }
 0xd89   : > { %v2158_v53 = vpack.c.bf16 %v2141_v26, %v2140_v52 }
 0xd8b   : > { %2759 = vmatmul.msk.bf16.vlgmr.msra.gmra.mxu1 %vm910_vm1, %v2158_v53 }
 0xe08   : > { %v2186_v29 = vpop.f32.mrf.mxu1 }
 0xe09   : > { %v2187_v50 = vadd.f32 %v2872_v60, %v2186_v29 }
 0xe0b   : > { %v2191_v63 = vmax.f32 %v2187_v50, 0.0 }
 0xe10   : > { %v2188_v61 = vpop.f32.mrf.mxu1 }
 0xe11   : > { %v2189_v62 = vadd.f32 %v2872_v60, %v2188_v61 }
 0xe13   : > { %v2192_v45 = vmax.f32 %v2189_v62, 0.0 }
 0xe15   : > { %v2193_v2 = vpack.c.bf16 %v2192_v45, %v2191_v63 }
 0xe17   : > { %2776 = vmatmul.msk.bf16.vlgmr.msra.gmra.mxu2 %vm2221_vm6, %v2193_v2 }
 0xe9a   : > { %v2234_v7 = vpop.f32.mrf.mxu2 }
 0xe9b   : > { %v2235_v8 = vadd.f32 %v2873_v5, %v2234_v7 }
 0xe9d   : > { %v2239_v39 = vadd.f32 %v2235_v8, %v2140_v52 }
 0xe9f   : > { %v2241_v56 = vsel %vm910_vm1, %v2239_v39, 0.0 }
 0xea0   : > { %2242 = vadd.xlane.f32.xlu2 %v2241_v56 }
 0xea2   : > { %v2236_v6 = vpop.f32.mrf.mxu2 }
 0xea3   : > { %v2237_v10 = vadd.f32 %v2873_v5, %v2236_v6 }
 0xea5   : > { %v2240_v11 = vadd.f32 %v2237_v10, %v2141_v26 }
 0xea7   : > { %v2244_v13 = vsel %vm910_vm1, %v2240_v11, 0.0 }
 0xea8   : > { %2245 = vadd.xlane.f32.xlu0 %v2244_v13 }
 0xf13   : > { %v2243_v44 = vpop.xlane.xlu2 %2242 }
 0xf14   : > { %v2247_v17 = vmul.f32 %v2243_v44, %v3388_v15 }
 0xf16   : > { %v2249_v0 = vsub.f32 %v2239_v39, %v2247_v17 }
 0xf18   : > { %v2251_v18 = vmul.f32 %v2249_v0, %v2249_v0 }
 0xf1a   : > { %v2253_v23 = vsel %vm910_vm1, %v2251_v18, 0.0 }
 0xf1b   : > { %v2246_v24 = vpop.xlane.xlu0 %2245  ;;  %2254 = vadd.xlane.f32.xlu2 %v2253_v23 }
 0xf1c   : > { %v2248_v21 = vmul.f32 %v2246_v24, %v3388_v15 }
 0xf1e   : > { %v2250_v25 = vsub.f32 %v2240_v11, %v2248_v21 }
 0xf20   : > { %v2252_v9 = vmul.f32 %v2250_v25, %v2250_v25 }
 0xf22   : > { %v2256_v20 = vsel %vm910_vm1, %v2252_v9, 0.0 }
 0xf23   : > { %2257 = vadd.xlane.f32.xlu0 %v2256_v20 }
 0xf33   : > { %2299 = vrot.lane.b32.xlu2 %v3318_v12, %s2987_s14 }
 0xf8e   : > { %v2255_v27 = vpop.xlane.xlu2 %2254 }
 0xf8f   : > { %v2259_v3 = vmul.f32 %v2255_v27, %v3388_v15 }
 0xf91   : > { %v2261_v28 = vadd.f32 1e-05, %v2259_v3 }
 0xf93   : > { %2938 = vrsqrt.f32 %v2261_v28  ;;  %vm2269_vm15 = vweird.f32 %v2261_v28 }
 0xf96   : > { %v2258_v4 = vpop.xlane.xlu0 %2257  ;;  %v2300_v54 = vpop.permute.xlu2 %2299 }
 0xf97   : > { %v2260_v14 = vmul.f32 %v2258_v4, %v3388_v15  ;;  %v2305_v31 = vsel %vm2221_vm6, %v3216_v19, %v2300_v54  ;;  %v2874_v15 = vld [vmem:[%s845_s5] ss:$0 sm:$0xff]  ;;  %s3679_s5 = sld [smem:[#allocation7_spill]] }
 0xf98   : > { %2307 = vst [vmem:[%s3178_s17] sm:$0xff] %v2305_v31 }
 0xf99   : > { %v2939_v32 = vpop.eup %2938  ;;  %v2262_v33 = vadd.f32 1e-05, %v2260_v14 }
 0xf9a   : > { %v2264_v22 = vmul.f32 %v2939_v32, %v2261_v28  ;;  %vm2270_vm14 = vweird.f32 %v2939_v32 }
 0xf9b   : > { %2940 = vrsqrt.f32 %v2262_v33  ;;  %vm2271_vm0 = vmor %vm2269_vm15, %vm2270_vm14  ;;  %vm2279_vm5 = vweird.f32 %v2262_v33 }
 0xf9c   : > { %v2265_v12 = vmul.f32 %v2939_v32, %v2264_v22 }
 0xf9d   : > { %p2781_p5 = scmp.ne.s32.totalorder %s3679_s5, 1 }
 0xf9e   : > { %v2266_v1 = vmul.f32 0.5, %v2265_v12  ;;  %s3680_s11 = sld [smem:[#allocation23_spill]] (!%p2781_p5) }
 0xfa0   : > { %v2267_v34 = vsub.f32 1.5, %v2266_v1 }
 0xfa1   : > { %v2941_v35 = vpop.eup %2940 }
 0xfa2   : > { %v2268_v36 = vmul.f32 %v2939_v32, %v2267_v34  ;;  %v2274_v37 = vmul.f32 %v2941_v35, %v2262_v33  ;;  %vm2280_vm3 = vweird.f32 %v2941_v35 }
 0xfa3   : > { %vm2281_vm7 = vmor %vm2279_vm5, %vm2280_vm3 }
 0xfa4   : > { %v2272_v19 = vsel %vm2271_vm0, %v2939_v32, %v2268_v36  ;;  %v2275_v38 = vmul.f32 %v2941_v35, %v2274_v37 }
 0xfa5   : > { %v2283_v41 = vmul.f32 %v2272_v19, %v2249_v0 }
 0xfa6   : > { %v2276_v30 = vmul.f32 0.5, %v2275_v38 }
 0xfa7   : > { %v2288_v46 = vmul.f32 %v2874_v15, %v2283_v41 }
 0xfa8   : > { %v2277_v16 = vsub.f32 1.5, %v2276_v30 }
 0xfa9   : > { %v2293_v42 = vadd.f32 %v2875_v40, %v2288_v46 }
 0xfaa   : > { %v2278_v47 = vmul.f32 %v2941_v35, %v2277_v16 }
 0xfab   : > { %2295 = vst.msk [vmem:[#allocation2] sm:$0xff] %vm910_vm1, %v2293_v42 }
 0xfac   : > { %v2282_v48 = vsel %vm2281_vm7, %v2941_v35, %v2278_v47 }
 0xfad   : > { %v2284_v49 = vmul.f32 %v2282_v48, %v2250_v25 }
 0xfaf   : > { %v2289_v43 = vmul.f32 %v2874_v15, %v2284_v49  ;;  %2322 = sbr.rel (%p2781_p5) target bundleno = 4163 (0x1043), region = 100 }
 0xfb1   : > { %v2294_v51 = vadd.f32 %v2875_v40, %v2289_v43 }
 0xfb3   : > { %2296 = vst.msk [vmem:[#allocation2 + $0x8] sm:$0xff] %vm910_vm1, %v2294_v51 }
 0xfb4   : > { %v2819_v52 = vld [vmem:[%s3680_s11 + $0x8] sm:$0xff]  ;;  %v2818_v26 = vld [vmem:[%s3680_s11] sm:$0xff]  ;;  %v2323_v53 = vpack.c.bf16 %v2294_v51, %v2293_v42 }
 0xfb5   : > { %2349 = vmatpush.bf16.msra.mxu0 %v2819_v52 }
 0xfb9   : > { %2350 = vmatpush.bf16.msra.mxu0 %v2818_v26 }
 0xfbc   : > { %2790 = vmatmul.msk.bf16.vlgmr.msra.gmra.mxu0 %vm910_vm1, %v2323_v53 }
0x1039   : > { %v2352_v55 = vpop.f32.mrf.mxu0 }
0x103a   : > { %2357 = vst [vmem:[#allocation3] sm:$0xff] %v2352_v55 }
0x1041   : > { %v2354_v57 = vpop.f32.mrf.mxu0 }
0x1042   : > { %2358 = vst [vmem:[#allocation3 + $0x8] sm:$0xff] %v2354_v57 }
0x1043 PF: > { %s3681_s25 = sld [smem:[#allocation7_spill]]  ;;  %s2988_s9 = smov [#allocation3]  }
0x1044   : > { %s2379_s18 = sshll.u32 %s2988_s9, 4  ;;  %s3682_s2 = sld [smem:[#allocation24_spill]]  ;;  %s2380_s18 = int_to_ptr.vmem [resolvable:$true] %s2379_s18 }
0x1045   : > { %s2989_s29 = smov 128   ;;  %s2990_s30 = smov 8  }
0x1049   : > { %p2826_p6 = scmp.eq.s32.totalorder %s3681_s25, 1 }
0x104a   : > { %s2381_s4 = sshll.u32 %s3682_s2, 4  ;;  %s2382_s4 = int_to_ptr.hbm [resolvable:$true] %s2381_s4 }
0x104b   : > { %2823 = dma.vmem_to_hbm [thread:$0]  (%p2826_p6), %s2380_s18, 256, %s2382_s4, [#allocation4], %s2989_s29, %s2989_s29, %s2990_s30  }
0x104c   : > { %2975 = dma.done.wait (%p2826_p6), [#allocation4], 256  }
0x104d   : > { %2977 = vsyncadd (%p2826_p6), [#allocation4], 4294967040 }
0x104e PF: > { %s3683_s27 = sld [smem:[#allocation6_spill]] }
0x1054   : > { %s33_s2 = sadd.s32 1, %s3683_s27  }
0x1055   : > { %p30_p7 = scmp.ge.s32.totalorder %s33_s2, 4  }
0x1057   :  { %32 = sbr.rel (!%p30_p7) target bundleno = 21 (0x15), region = 210 }
0x105c   :  { %2431 = vsyncpa [#allocation4], 1 }
0x105d   :  { %2433 = vsyncpa [#allocation4 + $0x1], 1 }

</bundles_post_ra>
